<compile_context>
chip_gen: v7x
topology: tpu7x:2x2x1
jax: 0.10.0
libtpu: 0.0.40
codegen_flags: <defaults>
</compile_context>

<pallas_src>
import functools

import numpy as np

import jax
import jax.numpy as jnp
from jax.experimental import pallas as pl
from jax.experimental.pallas import tpu as pltpu

GN_EPS = 1e-5        # PyTorch GroupNorm default eps
NEG_SLOPE = 0.01     # LeakyReLU negative_slope
GN_GROUPS = 4


def _round_up(a, m):
    return (a + m - 1) // m * m


# ---------------------------------------------------------------------------
# MaxPool3d(2, 2): one kernel, input read from HBM exactly once.
# ---------------------------------------------------------------------------

def _maxpool_kernel(x_ref, o_ref):
    # x_ref: [TR, 2, H2, 2, W2, 2] (d/h/w pooling parities exposed by a free reshape)
    x = x_ref[...]
    x = jnp.max(x, axis=5)            # w-parity
    x = jnp.max(x, axis=3)            # h-parity
    o_ref[...] = jnp.max(x, axis=1)   # d-parity


def maxpool3d_2x2x2(x):
    """x: [N, C, D, H, W] (even D, H, W) -> [N, C, D/2, H/2, W/2]."""
    N, C, D, H, W = x.shape
    assert D % 2 == 0 and H % 2 == 0 and W % 2 == 0, "MaxPool3d(2,2) needs even spatial dims"
    D2, H2, W2 = D // 2, H // 2, W // 2
    R = N * C * D2
    v = x.reshape(R, 2, H2, 2, W2, 2)              # pure dim-splitting view (free)
    TR = max(t for t in range(1, min(R, 8) + 1) if R % t == 0)
    out = pl.pallas_call(
        _maxpool_kernel,
        out_shape=jax.ShapeDtypeStruct((R, H2, W2), x.dtype),
        grid=(R // TR,),
        in_specs=[pl.BlockSpec((TR, 2, H2, 2, W2, 2), lambda r: (r, 0, 0, 0, 0, 0))],
        out_specs=pl.BlockSpec((TR, H2, W2), lambda r: (r, 0, 0)),
        compiler_params=pltpu.CompilerParams(dimension_semantics=("parallel",)),
    )(v)
    return out.reshape(N, C, D2, H2, W2)


# ---------------------------------------------------------------------------
# Fused conv3d(3x3x3, pad=1, no bias) + GroupNorm(4) + LeakyReLU(0.01)
# ---------------------------------------------------------------------------

def _slab_geometry(D, H, W):
    Hp, Wp = H + 2, W + 2
    hpwp = Hp * Wp
    ts = D * hpwp                       # flattened output extent (padded-frame strides)
    maxoff = 2 * hpwp + 2 * Wp + 2      # largest tap offset (kd=kh=kw=2)
    slab = _round_up(ts + maxoff, 128)  # lane-dense, 128-aligned slab length
    shift = hpwp + Wp + 1               # (d,h,w) -> (d+1,h+1,w+1) flat offset
    return Hp, Wp, hpwp, ts, maxoff, slab, shift


def make_input_slab(x, dtype=jnp.bfloat16):
    """[N, C, D, H, W] -> [N, C, SLAB] zero-padded, flattened, bf16 conv input slab."""
    N, C, D, H, W = x.shape
    _, _, hpwp, _, _, slab, _ = _slab_geometry(D, H, W)
    xp = jnp.pad(x, ((0, 0), (0, 0), (1, 1), (1, 1), (1, 1)))     # [N, C, D+2, Hp, Wp]
    xf = xp.reshape(N, C, (D + 2) * hpwp)
    xf = jnp.pad(xf, ((0, 0), (0, 0), (0, slab - (D + 2) * hpwp)))
    return xf.astype(dtype)


def slab_to_volume(y_slab, dims):
    """[N, C, SLAB] slab-layout -> compact [N, C, D, H, W]."""
    D, H, W = dims
    Hp, Wp = H + 2, W + 2
    N, C, _ = y_slab.shape
    y = y_slab[:, :, :(D + 2) * Hp * Wp].reshape(N, C, D + 2, Hp, Wp)
    return y[:, :, 1:D + 1, 1:H + 1, 1:W + 1]


def _valid_mask(D, H, W):
    """[1, TS] f32 mask of valid (h < H, w < W) columns of the padded-frame layout."""
    _, Wp, hpwp, ts, _, _, _ = _slab_geometry(D, H, W)
    s = np.arange(ts)
    rem = s % hpwp
    ok = ((rem // Wp) < H) & ((rem % Wp) < W)
    return jnp.asarray(ok.astype(np.float32).reshape(1, ts))


def _conv_gn_lrelu_kernel(x_ref, w_ref, g_ref, b_ref, m_ref, o_ref, gat_ref, *,
                          taps, cin, ts, shift, inv_count):
    """One (sample, group) program.

    x_ref: [Cin, SLAB] bf16   whole-sample zero-padded slab (spatial on lanes)
    w_ref: [Cg, 27*Cin] bf16  this group's weights, tap-major contraction dim
    g_ref/b_ref: [Cg, 1] f32  GroupNorm affine
    m_ref: [1, TS] f32        validity mask (junk padded-layout columns -> 0)
    o_ref: [Cg, SLAB]         output, emitted in the NEXT conv's padded slab layout
    gat_ref: [27*Cin, TS] bf16 VMEM gather scratch (single MXU operand)
    """
    # 1) Gather the 27 shifted slices into one MXU operand (K = 27*Cin).
    for i, t in enumerate(taps):
        gat_ref[i * cin:(i + 1) * cin, :] = x_ref[:, t:t + ts]

    # 2) One matmul, f32 accumulation.
    y = jax.lax.dot_general(w_ref[...], gat_ref[...],
                            (((1,), (0,)), ((), ())),
                            preferred_element_type=jnp.float32)          # [Cg, TS]

    # 3) GroupNorm over (Cg, valid spatial) of this (sample, group), biased var.
    m = m_ref[...]                                                       # [1, TS]
    mean = jnp.sum(jnp.sum(y * m, axis=1, keepdims=True),
                   axis=0, keepdims=True) * inv_count                    # [1, 1]
    d = y - mean
    dv = d * m
    var = jnp.sum(jnp.sum(dv * dv, axis=1, keepdims=True),
                  axis=0, keepdims=True) * inv_count
    yn = d * jax.lax.rsqrt(var + GN_EPS) * g_ref[...] + b_ref[...]

    # 4) LeakyReLU(0.01), then zero junk columns so the slab stays zero-padded.
    yn = jnp.where(yn > 0, yn, NEG_SLOPE * yn) * m

    # 5) Emit directly into the next conv's padded layout: zeros + shifted valid region.
    o_ref[...] = jnp.zeros(o_ref.shape, o_ref.dtype)
    o_ref[:, shift:shift + ts] = yn.astype(o_ref.dtype)


def conv3d_gn_lrelu(x_slab, w, gamma, beta, *, dims, groups=GN_GROUPS,
                    out_dtype=jnp.bfloat16):
    """Fused conv3d(3x3x3, pad=1, bias=False) + GroupNorm(groups) + LeakyReLU(0.01).

    x_slab: [N, Cin, SLAB] bf16 slab (see make_input_slab).
    Returns [N, Cout, SLAB] in the same slab layout -> feeds the next call directly.
    """
    D, H, W = dims
    N, Cin, slab = x_slab.shape
    Cout = w.shape[0]
    G = groups
    assert Cout % G == 0
    Cg = Cout // G
    _, Wp, hpwp, ts, maxoff, slab_expected, shift = _slab_geometry(D, H, W)
    assert slab == slab_expected and slab >= ts + maxoff
    kc = 27 * Cin
    taps = tuple(kd * hpwp + kh * Wp + kw
                 for kd in range(3) for kh in range(3) for kw in range(3))

    # Weights: [Cout, Cin, 3,3,3] -> [G, Cg, 27*Cin] bf16, tap-major (matches gather order).
    w_flat = jnp.transpose(w, (0, 2, 3, 4, 1)).reshape(G, Cg, kc).astype(jnp.bfloat16)
    g3 = gamma.astype(jnp.float32).reshape(G, Cg, 1)
    b3 = beta.astype(jnp.float32).reshape(G, Cg, 1)
    mask = _valid_mask(D, H, W)

    kernel = functools.partial(
        _conv_gn_lrelu_kernel, taps=taps, cin=Cin, ts=ts, shift=shift,
        inv_count=1.0 / float(Cg * D * H * W))

    # VMEM-aware limit (double-buffered blocks + gather scratch), capped for v7x.
    out_bytes = jnp.dtype(out_dtype).itemsize
    vmem_est = (2 * Cin * slab * 2 + 2 * Cg * kc * 2 + 4 * Cg * 4 + 2 * ts * 4
                + 2 * Cg * slab * out_bytes + kc * ts * 2)
    vmem_limit = int(min(48 * 1024 * 1024, max(32 * 1024 * 1024, 2 * vmem_est)))

    y = pl.pallas_call(
        kernel,
        out_shape=jax.ShapeDtypeStruct((N, G, Cg, slab), out_dtype),
        grid=(N, G),
        in_specs=[
            pl.BlockSpec((None, Cin, slab), lambda n, g: (n, 0, 0)),   # slab: fetched once / sample
            pl.BlockSpec((None, Cg, kc), lambda n, g: (g, 0, 0)),      # group weights (resident tile)
            pl.BlockSpec((None, Cg, 1), lambda n, g: (g, 0, 0)),
            pl.BlockSpec((None, Cg, 1), lambda n, g: (g, 0, 0)),
            pl.BlockSpec((1, ts), lambda n, g: (0, 0)),                # validity mask (resident)
        ],
        out_specs=pl.BlockSpec((None, None, Cg, slab), lambda n, g: (n, g, 0, 0)),
        scratch_shapes=[pltpu.VMEM((kc, ts), jnp.bfloat16)],
        compiler_params=pltpu.CompilerParams(
            dimension_semantics=("parallel", "parallel"),
            vmem_limit_bytes=vmem_limit),
    )(x_slab, w_flat, g3, b3, mask)
    return y.reshape(N, Cout, slab)


# ---------------------------------------------------------------------------
# ConvD forward
# ---------------------------------------------------------------------------

def convd_forward(x, params, first=False):
    """Equivalent of ConvD.forward on NCDHW input x (dropout unused in forward)."""
    if not first:
        x = maxpool3d_2x2x2(x)
    N, Cin, D, H, W = x.shape
    dims = (D, H, W)

    x_slab = make_input_slab(x)                                          # bf16, once
    y1 = conv3d_gn_lrelu(x_slab, params["w1"], params["g1"], params["b1"],
                         dims=dims, out_dtype=jnp.bfloat16)              # slab -> slab, no glue
    y2 = conv3d_gn_lrelu(y1, params["w2"], params["g2"], params["b2"],
                         dims=dims, out_dtype=jnp.float32)
    return slab_to_volume(y2, dims)


# ---------------------------------------------------------------------------
# Main
# ---------------------------------------------------------------------------

if __name__ == "__main__":
    key = jax.random.PRNGKey(0)
    kx, kw1, kw2 = jax.random.split(key, 3)

    N, Cin, Cout = 2, 4, 8          # planes divisible by 4 (GroupNorm groups)
    D = H = W = 8                   # first=False -> maxpool halves to 4x4x4

    x = jax.random.normal(kx, (N, Cin, D, H, W), jnp.float32)

    params = {
        "w1": 0.1 * jax.random.normal(kw1, (Cout, Cin, 3, 3, 3), jnp.float32),
        "g1": jnp.ones((Cout,), jnp.float32),    # GroupNorm affine defaults
        "b1": jnp.zeros((Cout,), jnp.float32),
        "w2": 0.1 * jax.random.normal(kw2, (Cout, Cout, 3, 3, 3), jnp.float32),
        "g2": jnp.ones((Cout,), jnp.float32),
        "b2": jnp.zeros((Cout,), jnp.float32),
    }

    fwd = jax.jit(functools.partial(convd_forward, first=False))
    out = fwd(x, params)
    jax.block_until_ready(out)
    assert out.shape == (N, Cout, D // 2, H // 2, W // 2)
    assert bool(jnp.all(jnp.isfinite(out)))
    print("KERNEL_OK")
</pallas_src>

<mosaic_0001>
module attributes {stable_mosaic.version = 11 : i64} {
  func.func @_maxpool_kernel(%arg0: i32, %arg1: memref<8x2x4x2x4x2xf32, #tpu.memory_space<vmem>>, %arg2: memref<8x4x4xf32, #tpu.memory_space<vmem>>) attributes {dimension_semantics = [#tpu.dimension_semantics<parallel>], iteration_bounds = array<i64: 4>, scalar_prefetch = 0 : i64, scratch_operands = 0 : i64, tpu.core_type = #tpu.core_type<tc>, window_params = [{transform_indices = @transform_0, window_bounds = array<i64: 8, 2, 4, 2, 4, 2>}, {transform_indices = @transform_1, window_bounds = array<i64: 8, 4, 4>}]} {
    %c0 = arith.constant 0 : index
    %c0_0 = arith.constant 0 : index
    %c0_1 = arith.constant 0 : index
    %c0_2 = arith.constant 0 : index
    %c0_3 = arith.constant 0 : index
    %c0_4 = arith.constant 0 : index
    %0 = vector.load %arg1[%c0, %c0_0, %c0_1, %c0_2, %c0_3, %c0_4] : memref<8x2x4x2x4x2xf32, #tpu.memory_space<vmem>>, vector<8x2x4x2x4x2xf32>
    %cst = arith.constant dense<0xFF800000> : vector<8x2x4x2x4xf32>
    %1 = vector.multi_reduction <maximumf>, %0, %cst [5] : vector<8x2x4x2x4x2xf32> to vector<8x2x4x2x4xf32>
    %cst_5 = arith.constant dense<0xFF800000> : vector<8x2x4x4xf32>
    %2 = vector.multi_reduction <maximumf>, %1, %cst_5 [3] : vector<8x2x4x2x4xf32> to vector<8x2x4x4xf32>
    %cst_6 = arith.constant dense<0xFF800000> : vector<8x4x4xf32>
    %3 = vector.multi_reduction <maximumf>, %2, %cst_6 [1] : vector<8x2x4x4xf32> to vector<8x4x4xf32>
    %c0_7 = arith.constant 0 : index
    %c0_8 = arith.constant 0 : index
    %c0_9 = arith.constant 0 : index
    %4 = vector.load %arg2[%c0_7, %c0_8, %c0_9] : memref<8x4x4xf32, #tpu.memory_space<vmem>>, vector<8x4x4xf32>
    tpu.vector_store %arg2[%c0_7, %c0_8, %c0_9], %3 {strides = array<i32>} : memref<8x4x4xf32, #tpu.memory_space<vmem>>, vector<8x4x4xf32>,
    return
  }
  func.func @transform_0(%arg0: i32) -> (i32, i32, i32, i32, i32, i32) {
    %c0_i32 = arith.constant 0 : i32
    %c0_i32_0 = arith.constant 0 : i32
    %c0_i32_1 = arith.constant 0 : i32
    %c0_i32_2 = arith.constant 0 : i32
    %c0_i32_3 = arith.constant 0 : i32
    %c0_i32_4 = arith.constant 0 : i32
    return %arg0, %c0_i32, %c0_i32_0, %c0_i32_1, %c0_i32_2, %c0_i32_3 : i32, i32, i32, i32, i32, i32
  }
  func.func @transform_1(%arg0: i32) -> (i32, i32, i32) {
    %c0_i32 = arith.constant 0 : i32
    %c0_i32_0 = arith.constant 0 : i32
    %c0_i32_1 = arith.constant 0 : i32
    return %arg0, %c0_i32, %c0_i32_0 : i32, i32, i32
  }
}

module attributes {stable_mosaic.version = 11 : i64} {
  func.func @_conv_gn_lrelu_kernel(%arg0: i32, %arg1: i32, %arg2: memref<1x4x256xbf16, #tpu.memory_space<vmem>>, %arg3: memref<1x2x108xbf16, #tpu.memory_space<vmem>>, %arg4: memref<1x2x1xf32, #tpu.memory_space<vmem>>, %arg5: memref<1x2x1xf32, #tpu.memory_space<vmem>>, %arg6: memref<1x144xf32, #tpu.memory_space<vmem>>, %arg7: memref<1x1x2x256xbf16, #tpu.memory_space<vmem>>, %arg8: memref<108x144xbf16, #tpu.memory_space<vmem>>) attributes {dimension_semantics = [#tpu.dimension_semantics<parallel>, #tpu.dimension_semantics<parallel>], iteration_bounds = array<i64: 2, 4>, scalar_prefetch = 0 : i64, scratch_operands = 1 : i64, tpu.core_type = #tpu.core_type<tc>, window_params = [{transform_indices = @transform_0, window_bounds = array<i64: 1, 4, 256>}, {transform_indices = @transform_1, window_bounds = array<i64: 1, 2, 108>}, {transform_indices = @transform_2, window_bounds = array<i64: 1, 2, 1>}, {transform_indices = @transform_3, window_bounds = array<i64: 1, 2, 1>}, {pipeline_mode = #tpu.pipeline_mode<synchronous>, transform_indices = @transform_4, window_bounds = array<i64: 1, 144>}, {transform_indices = @transform_5, window_bounds = array<i64: 1, 1, 2, 256>}]} {
    %c0 = arith.constant 0 : index
    %c0_0 = arith.constant 0 : index
    %c0_1 = arith.constant 0 : index
    %0 = vector.load %arg2[%c0, %c0_0, %c0_1] : memref<1x4x256xbf16, #tpu.memory_space<vmem>>, vector<1x4x144xbf16>
    %1 = vector.shape_cast %0 : vector<1x4x144xbf16> to vector<4x144xbf16>
    %c0_2 = arith.constant 0 : index
    %c0_3 = arith.constant 0 : index
    %2 = vector.load %arg8[%c0_2, %c0_3] : memref<108x144xbf16, #tpu.memory_space<vmem>>, vector<4x144xbf16>
    tpu.vector_store %arg8[%c0_2, %c0_3], %1 {strides = array<i32>} : memref<108x144xbf16, #tpu.memory_space<vmem>>, vector<4x144xbf16>,
    %c0_4 = arith.constant 0 : index
    %c0_5 = arith.constant 0 : index
    %c1 = arith.constant 1 : index
    %3 = vector.load %arg2[%c0_4, %c0_5, %c1] : memref<1x4x256xbf16, #tpu.memory_space<vmem>>, vector<1x4x144xbf16>
    %4 = vector.shape_cast %3 : vector<1x4x144xbf16> to vector<4x144xbf16>
    %c4 = arith.constant 4 : index
    %c0_6 = arith.constant 0 : index
    %5 = vector.load %arg8[%c4, %c0_6] : memref<108x144xbf16, #tpu.memory_space<vmem>>, vector<4x144xbf16>
    tpu.vector_store %arg8[%c4, %c0_6], %4 {strides = array<i32>} : memref<108x144xbf16, #tpu.memory_space<vmem>>, vector<4x144xbf16>,
    %c0_7 = arith.constant 0 : index
    %c0_8 = arith.constant 0 : index
    %c2 = arith.constant 2 : index
    %6 = vector.load %arg2[%c0_7, %c0_8, %c2] : memref<1x4x256xbf16, #tpu.memory_space<vmem>>, vector<1x4x144xbf16>
    %7 = vector.shape_cast %6 : vector<1x4x144xbf16> to vector<4x144xbf16>
    %c8 = arith.constant 8 : index
    %c0_9 = arith.constant 0 : index
    %8 = vector.load %arg8[%c8, %c0_9] : memref<108x144xbf16, #tpu.memory_space<vmem>>, vector<4x144xbf16>
    tpu.vector_store %arg8[%c8, %c0_9], %7 {strides = array<i32>} : memref<108x144xbf16, #tpu.memory_space<vmem>>, vector<4x144xbf16>,
    %c0_10 = arith.constant 0 : index
    %c0_11 = arith.constant 0 : index
    %c6 = arith.constant 6 : index
    %9 = vector.load %arg2[%c0_10, %c0_11, %c6] : memref<1x4x256xbf16, #tpu.memory_space<vmem>>, vector<1x4x144xbf16>
    %10 = vector.shape_cast %9 : vector<1x4x144xbf16> to vector<4x144xbf16>
    %c12 = arith.constant 12 : index
    %c0_12 = arith.constant 0 : index
    %11 = vector.load %arg8[%c12, %c0_12] : memref<108x144xbf16, #tpu.memory_space<vmem>>, vector<4x144xbf16>
    tpu.vector_store %arg8[%c12, %c0_12], %10 {strides = array<i32>} : memref<108x144xbf16, #tpu.memory_space<vmem>>, vector<4x144xbf16>,
    %c0_13 = arith.constant 0 : index
    %c0_14 = arith.constant 0 : index
    %c7 = arith.constant 7 : index
    %12 = vector.load %arg2[%c0_13, %c0_14, %c7] : memref<1x4x256xbf16, #tpu.memory_space<vmem>>, vector<1x4x144xbf16>
    %13 = vector.shape_cast %12 : vector<1x4x144xbf16> to vector<4x144xbf16>
    %c16 = arith.constant 16 : index
    %c0_15 = arith.constant 0 : index
    %14 = vector.load %arg8[%c16, %c0_15] : memref<108x144xbf16, #tpu.memory_space<vmem>>, vector<4x144xbf16>
    tpu.vector_store %arg8[%c16, %c0_15], %13 {strides = array<i32>} : memref<108x144xbf16, #tpu.memory_space<vmem>>, vector<4x144xbf16>,
    %c0_16 = arith.constant 0 : index
    %c0_17 = arith.constant 0 : index
    %c8_18 = arith.constant 8 : index
    %15 = vector.load %arg2[%c0_16, %c0_17, %c8_18] : memref<1x4x256xbf16, #tpu.memory_space<vmem>>, vector<1x4x144xbf16>
    %16 = vector.shape_cast %15 : vector<1x4x144xbf16> to vector<4x144xbf16>
    %c20 = arith.constant 20 : index
    %c0_19 = arith.constant 0 : index
    %17 = vector.load %arg8[%c20, %c0_19] : memref<108x144xbf16, #tpu.memory_space<vmem>>, vector<4x144xbf16>
    tpu.vector_store %arg8[%c20, %c0_19], %16 {strides = array<i32>} : memref<108x144xbf16, #tpu.memory_space<vmem>>, vector<4x144xbf16>,
    %c0_20 = arith.constant 0 : index
    %c0_21 = arith.constant 0 : index
    %c12_22 = arith.constant 12 : index
    %18 = vector.load %arg2[%c0_20, %c0_21, %c12_22] : memref<1x4x256xbf16, #tpu.memory_space<vmem>>, vector<1x4x144xbf16>
    %19 = vector.shape_cast %18 : vector<1x4x144xbf16> to vector<4x144xbf16>
    %c24 = arith.constant 24 : index
    %c0_23 = arith.constant 0 : index
    %20 = vector.load %arg8[%c24, %c0_23] : memref<108x144xbf16, #tpu.memory_space<vmem>>, vector<4x144xbf16>
    tpu.vector_store %arg8[%c24, %c0_23], %19 {strides = array<i32>} : memref<108x144xbf16, #tpu.memory_space<vmem>>, vector<4x144xbf16>,
    %c0_24 = arith.constant 0 : index
    %c0_25 = arith.constant 0 : index
    %c13 = arith.constant 13 : index
    %21 = vector.load %arg2[%c0_24, %c0_25, %c13] : memref<1x4x256xbf16, #tpu.memory_space<vmem>>, vector<1x4x144xbf16>
    %22 = vector.shape_cast %21 : vector<1x4x144xbf16> to vector<4x144xbf16>
    %c28 = arith.constant 28 : index
    %c0_26 = arith.constant 0 : index
    %23 = vector.load %arg8[%c28, %c0_26] : memref<108x144xbf16, #tpu.memory_space<vmem>>, vector<4x144xbf16>
    tpu.vector_store %arg8[%c28, %c0_26], %22 {strides = array<i32>} : memref<108x144xbf16, #tpu.memory_space<vmem>>, vector<4x144xbf16>,
    %c0_27 = arith.constant 0 : index
    %c0_28 = arith.constant 0 : index
    %c14 = arith.constant 14 : index
    %24 = vector.load %arg2[%c0_27, %c0_28, %c14] : memref<1x4x256xbf16, #tpu.memory_space<vmem>>, vector<1x4x144xbf16>
    %25 = vector.shape_cast %24 : vector<1x4x144xbf16> to vector<4x144xbf16>
    %c32 = arith.constant 32 : index
    %c0_29 = arith.constant 0 : index
    %26 = vector.load %arg8[%c32, %c0_29] : memref<108x144xbf16, #tpu.memory_space<vmem>>, vector<4x144xbf16>
    tpu.vector_store %arg8[%c32, %c0_29], %25 {strides = array<i32>} : memref<108x144xbf16, #tpu.memory_space<vmem>>, vector<4x144xbf16>,
    %c0_30 = arith.constant 0 : index
    %c0_31 = arith.constant 0 : index
    %c36 = arith.constant 36 : index
    %27 = vector.load %arg2[%c0_30, %c0_31, %c36] : memref<1x4x256xbf16, #tpu.memory_space<vmem>>, vector<1x4x144xbf16>
    %28 = vector.shape_cast %27 : vector<1x4x144xbf16> to vector<4x144xbf16>
    %c36_32 = arith.constant 36 : index
    %c0_33 = arith.constant 0 : index
    %29 = vector.load %arg8[%c36_32, %c0_33] : memref<108x144xbf16, #tpu.memory_space<vmem>>, vector<4x144xbf16>
    tpu.vector_store %arg8[%c36_32, %c0_33], %28 {strides = array<i32>} : memref<108x144xbf16, #tpu.memory_space<vmem>>, vector<4x144xbf16>,
    %c0_34 = arith.constant 0 : index
    %c0_35 = arith.constant 0 : index
    %c37 = arith.constant 37 : index
    %30 = vector.load %arg2[%c0_34, %c0_35, %c37] : memref<1x4x256xbf16, #tpu.memory_space<vmem>>, vector<1x4x144xbf16>
    %31 = vector.shape_cast %30 : vector<1x4x144xbf16> to vector<4x144xbf16>
    %c40 = arith.constant 40 : index
    %c0_36 = arith.constant 0 : index
    %32 = vector.load %arg8[%c40, %c0_36] : memref<108x144xbf16, #tpu.memory_space<vmem>>, vector<4x144xbf16>
    tpu.vector_store %arg8[%c40, %c0_36], %31 {strides = array<i32>} : memref<108x144xbf16, #tpu.memory_space<vmem>>, vector<4x144xbf16>,
    %c0_37 = arith.constant 0 : index
    %c0_38 = arith.constant 0 : index
    %c38 = arith.constant 38 : index
    %33 = vector.load %arg2[%c0_37, %c0_38, %c38] : memref<1x4x256xbf16, #tpu.memory_space<vmem>>, vector<1x4x144xbf16>
    %34 = vector.shape_cast %33 : vector<1x4x144xbf16> to vector<4x144xbf16>
    %c44 = arith.constant 44 : index
    %c0_39 = arith.constant 0 : index
    %35 = vector.load %arg8[%c44, %c0_39] : memref<108x144xbf16, #tpu.memory_space<vmem>>, vector<4x144xbf16>
    tpu.vector_store %arg8[%c44, %c0_39], %34 {strides = array<i32>} : memref<108x144xbf16, #tpu.memory_space<vmem>>, vector<4x144xbf16>,
    %c0_40 = arith.constant 0 : index
    %c0_41 = arith.constant 0 : index
    %c42 = arith.constant 42 : index
    %36 = vector.load %arg2[%c0_40, %c0_41, %c42] : memref<1x4x256xbf16, #tpu.memory_space<vmem>>, vector<1x4x144xbf16>
    %37 = vector.shape_cast %36 : vector<1x4x144xbf16> to vector<4x144xbf16>
    %c48 = arith.constant 48 : index
    %c0_42 = arith.constant 0 : index
    %38 = vector.load %arg8[%c48, %c0_42] : memref<108x144xbf16, #tpu.memory_space<vmem>>, vector<4x144xbf16>
    tpu.vector_store %arg8[%c48, %c0_42], %37 {strides = array<i32>} : memref<108x144xbf16, #tpu.memory_space<vmem>>, vector<4x144xbf16>,
    %c0_43 = arith.constant 0 : index
    %c0_44 = arith.constant 0 : index
    %c43 = arith.constant 43 : index
    %39 = vector.load %arg2[%c0_43, %c0_44, %c43] : memref<1x4x256xbf16, #tpu.memory_space<vmem>>, vector<1x4x144xbf16>
    %40 = vector.shape_cast %39 : vector<1x4x144xbf16> to vector<4x144xbf16>
    %c52 = arith.constant 52 : index
    %c0_45 = arith.constant 0 : index
    %41 = vector.load %arg8[%c52, %c0_45] : memref<108x144xbf16, #tpu.memory_space<vmem>>, vector<4x144xbf16>
    tpu.vector_store %arg8[%c52, %c0_45], %40 {strides = array<i32>} : memref<108x144xbf16, #tpu.memory_space<vmem>>, vector<4x144xbf16>,
    %c0_46 = arith.constant 0 : index
    %c0_47 = arith.constant 0 : index
    %c44_48 = arith.constant 44 : index
    %42 = vector.load %arg2[%c0_46, %c0_47, %c44_48] : memref<1x4x256xbf16, #tpu.memory_space<vmem>>, vector<1x4x144xbf16>
    %43 = vector.shape_cast %42 : vector<1x4x144xbf16> to vector<4x144xbf16>
    %c56 = arith.constant 56 : index
    %c0_49 = arith.constant 0 : index
    %44 = vector.load %arg8[%c56, %c0_49] : memref<108x144xbf16, #tpu.memory_space<vmem>>, vector<4x144xbf16>
    tpu.vector_store %arg8[%c56, %c0_49], %43 {strides = array<i32>} : memref<108x144xbf16, #tpu.memory_space<vmem>>, vector<4x144xbf16>,
    %c0_50 = arith.constant 0 : index
    %c0_51 = arith.constant 0 : index
    %c48_52 = arith.constant 48 : index
    %45 = vector.load %arg2[%c0_50, %c0_51, %c48_52] : memref<1x4x256xbf16, #tpu.memory_space<vmem>>, vector<1x4x144xbf16>
    %46 = vector.shape_cast %45 : vector<1x4x144xbf16> to vector<4x144xbf16>
    %c60 = arith.constant 60 : index
    %c0_53 = arith.constant 0 : index
    %47 = vector.load %arg8[%c60, %c0_53] : memref<108x144xbf16, #tpu.memory_space<vmem>>, vector<4x144xbf16>
    tpu.vector_store %arg8[%c60, %c0_53], %46 {strides = array<i32>} : memref<108x144xbf16, #tpu.memory_space<vmem>>, vector<4x144xbf16>,
    %c0_54 = arith.constant 0 : index
    %c0_55 = arith.constant 0 : index
    %c49 = arith.constant 49 : index
    %48 = vector.load %arg2[%c0_54, %c0_55, %c49] : memref<1x4x256xbf16, #tpu.memory_space<vmem>>, vector<1x4x144xbf16>
    %49 = vector.shape_cast %48 : vector<1x4x144xbf16> to vector<4x144xbf16>
    %c64 = arith.constant 64 : index
    %c0_56 = arith.constant 0 : index
    %50 = vector.load %arg8[%c64, %c0_56] : memref<108x144xbf16, #tpu.memory_space<vmem>>, vector<4x144xbf16>
    tpu.vector_store %arg8[%c64, %c0_56], %49 {strides = array<i32>} : memref<108x144xbf16, #tpu.memory_space<vmem>>, vector<4x144xbf16>,
    %c0_57 = arith.constant 0 : index
    %c0_58 = arith.constant 0 : index
    %c50 = arith.constant 50 : index
    %51 = vector.load %arg2[%c0_57, %c0_58, %c50] : memref<1x4x256xbf16, #tpu.memory_space<vmem>>, vector<1x4x144xbf16>
    %52 = vector.shape_cast %51 : vector<1x4x144xbf16> to vector<4x144xbf16>
    %c68 = arith.constant 68 : index
    %c0_59 = arith.constant 0 : index
    %53 = vector.load %arg8[%c68, %c0_59] : memref<108x144xbf16, #tpu.memory_space<vmem>>, vector<4x144xbf16>
    tpu.vector_store %arg8[%c68, %c0_59], %52 {strides = array<i32>} : memref<108x144xbf16, #tpu.memory_space<vmem>>, vector<4x144xbf16>,
    %c0_60 = arith.constant 0 : index
    %c0_61 = arith.constant 0 : index
    %c72 = arith.constant 72 : index
    %54 = vector.load %arg2[%c0_60, %c0_61, %c72] : memref<1x4x256xbf16, #tpu.memory_space<vmem>>, vector<1x4x144xbf16>
    %55 = vector.shape_cast %54 : vector<1x4x144xbf16> to vector<4x144xbf16>
    %c72_62 = arith.constant 72 : index
    %c0_63 = arith.constant 0 : index
    %56 = vector.load %arg8[%c72_62, %c0_63] : memref<108x144xbf16, #tpu.memory_space<vmem>>, vector<4x144xbf16>
    tpu.vector_store %arg8[%c72_62, %c0_63], %55 {strides = array<i32>} : memref<108x144xbf16, #tpu.memory_space<vmem>>, vector<4x144xbf16>,
    %c0_64 = arith.constant 0 : index
    %c0_65 = arith.constant 0 : index
    %c73 = arith.constant 73 : index
    %57 = vector.load %arg2[%c0_64, %c0_65, %c73] : memref<1x4x256xbf16, #tpu.memory_space<vmem>>, vector<1x4x144xbf16>
    %58 = vector.shape_cast %57 : vector<1x4x144xbf16> to vector<4x144xbf16>
    %c76 = arith.constant 76 : index
    %c0_66 = arith.constant 0 : index
    %59 = vector.load %arg8[%c76, %c0_66] : memref<108x144xbf16, #tpu.memory_space<vmem>>, vector<4x144xbf16>
    tpu.vector_store %arg8[%c76, %c0_66], %58 {strides = array<i32>} : memref<108x144xbf16, #tpu.memory_space<vmem>>, vector<4x144xbf16>,
    %c0_67 = arith.constant 0 : index
    %c0_68 = arith.constant 0 : index
    %c74 = arith.constant 74 : index
    %60 = vector.load %arg2[%c0_67, %c0_68, %c74] : memref<1x4x256xbf16, #tpu.memory_space<vmem>>, vector<1x4x144xbf16>
    %61 = vector.shape_cast %60 : vector<1x4x144xbf16> to vector<4x144xbf16>
    %c80 = arith.constant 80 : index
    %c0_69 = arith.constant 0 : index
    %62 = vector.load %arg8[%c80, %c0_69] : memref<108x144xbf16, #tpu.memory_space<vmem>>, vector<4x144xbf16>
    tpu.vector_store %arg8[%c80, %c0_69], %61 {strides = array<i32>} : memref<108x144xbf16, #tpu.memory_space<vmem>>, vector<4x144xbf16>,
    %c0_70 = arith.constant 0 : index
    %c0_71 = arith.constant 0 : index
    %c78 = arith.constant 78 : index
    %63 = vector.load %arg2[%c0_70, %c0_71, %c78] : memref<1x4x256xbf16, #tpu.memory_space<vmem>>, vector<1x4x144xbf16>
    %64 = vector.shape_cast %63 : vector<1x4x144xbf16> to vector<4x144xbf16>
    %c84 = arith.constant 84 : index
    %c0_72 = arith.constant 0 : index
    %65 = vector.load %arg8[%c84, %c0_72] : memref<108x144xbf16, #tpu.memory_space<vmem>>, vector<4x144xbf16>
    tpu.vector_store %arg8[%c84, %c0_72], %64 {strides = array<i32>} : memref<108x144xbf16, #tpu.memory_space<vmem>>, vector<4x144xbf16>,
    %c0_73 = arith.constant 0 : index
    %c0_74 = arith.constant 0 : index
    %c79 = arith.constant 79 : index
    %66 = vector.load %arg2[%c0_73, %c0_74, %c79] : memref<1x4x256xbf16, #tpu.memory_space<vmem>>, vector<1x4x144xbf16>
    %67 = vector.shape_cast %66 : vector<1x4x144xbf16> to vector<4x144xbf16>
    %c88 = arith.constant 88 : index
    %c0_75 = arith.constant 0 : index
    %68 = vector.load %arg8[%c88, %c0_75] : memref<108x144xbf16, #tpu.memory_space<vmem>>, vector<4x144xbf16>
    tpu.vector_store %arg8[%c88, %c0_75], %67 {strides = array<i32>} : memref<108x144xbf16, #tpu.memory_space<vmem>>, vector<4x144xbf16>,
    %c0_76 = arith.constant 0 : index
    %c0_77 = arith.constant 0 : index
    %c80_78 = arith.constant 80 : index
    %69 = vector.load %arg2[%c0_76, %c0_77, %c80_78] : memref<1x4x256xbf16, #tpu.memory_space<vmem>>, vector<1x4x144xbf16>
    %70 = vector.shape_cast %69 : vector<1x4x144xbf16> to vector<4x144xbf16>
    %c92 = arith.constant 92 : index
    %c0_79 = arith.constant 0 : index
    %71 = vector.load %arg8[%c92, %c0_79] : memref<108x144xbf16, #tpu.memory_space<vmem>>, vector<4x144xbf16>
    tpu.vector_store %arg8[%c92, %c0_79], %70 {strides = array<i32>} : memref<108x144xbf16, #tpu.memory_space<vmem>>, vector<4x144xbf16>,
    %c0_80 = arith.constant 0 : index
    %c0_81 = arith.constant 0 : index
    %c84_82 = arith.constant 84 : index
    %72 = vector.load %arg2[%c0_80, %c0_81, %c84_82] : memref<1x4x256xbf16, #tpu.memory_space<vmem>>, vector<1x4x144xbf16>
    %73 = vector.shape_cast %72 : vector<1x4x144xbf16> to vector<4x144xbf16>
    %c96 = arith.constant 96 : index
    %c0_83 = arith.constant 0 : index
    %74 = vector.load %arg8[%c96, %c0_83] : memref<108x144xbf16, #tpu.memory_space<vmem>>, vector<4x144xbf16>
    tpu.vector_store %arg8[%c96, %c0_83], %73 {strides = array<i32>} : memref<108x144xbf16, #tpu.memory_space<vmem>>, vector<4x144xbf16>,
    %c0_84 = arith.constant 0 : index
    %c0_85 = arith.constant 0 : index
    %c85 = arith.constant 85 : index
    %75 = vector.load %arg2[%c0_84, %c0_85, %c85] : memref<1x4x256xbf16, #tpu.memory_space<vmem>>, vector<1x4x144xbf16>
    %76 = vector.shape_cast %75 : vector<1x4x144xbf16> to vector<4x144xbf16>
    %c100 = arith.constant 100 : index
    %c0_86 = arith.constant 0 : index
    %77 = vector.load %arg8[%c100, %c0_86] : memref<108x144xbf16, #tpu.memory_space<vmem>>, vector<4x144xbf16>
    tpu.vector_store %arg8[%c100, %c0_86], %76 {strides = array<i32>} : memref<108x144xbf16, #tpu.memory_space<vmem>>, vector<4x144xbf16>,
    %c0_87 = arith.constant 0 : index
    %c0_88 = arith.constant 0 : index
    %c86 = arith.constant 86 : index
    %78 = vector.load %arg2[%c0_87, %c0_88, %c86] : memref<1x4x256xbf16, #tpu.memory_space<vmem>>, vector<1x4x144xbf16>
    %79 = vector.shape_cast %78 : vector<1x4x144xbf16> to vector<4x144xbf16>
    %c104 = arith.constant 104 : index
    %c0_89 = arith.constant 0 : index
    %80 = vector.load %arg8[%c104, %c0_89] : memref<108x144xbf16, #tpu.memory_space<vmem>>, vector<4x144xbf16>
    tpu.vector_store %arg8[%c104, %c0_89], %79 {strides = array<i32>} : memref<108x144xbf16, #tpu.memory_space<vmem>>, vector<4x144xbf16>,
    %c0_90 = arith.constant 0 : index
    %c0_91 = arith.constant 0 : index
    %c0_92 = arith.constant 0 : index
    %81 = vector.load %arg3[%c0_90, %c0_91, %c0_92] : memref<1x2x108xbf16, #tpu.memory_space<vmem>>, vector<1x2x108xbf16>
    %82 = vector.shape_cast %81 : vector<1x2x108xbf16> to vector<2x108xbf16>
    %c0_93 = arith.constant 0 : index
    %c0_94 = arith.constant 0 : index
    %83 = vector.load %arg8[%c0_93, %c0_94] : memref<108x144xbf16, #tpu.memory_space<vmem>>, vector<108x144xbf16>
    %cst = arith.constant dense<0.000000e+00> : vector<2x144xf32>
    %84 = tpu.matmul %82, %83, %cst {dimension_numbers = #tpu.dot_dimension_numbers<[1], [0], [0], [1], [0, 0, 1, 1], [], []>} : vector<2x108xbf16>, vector<108x144xbf16>, vector<2x144xf32> -> vector<2x144xf32>
    %c0_95 = arith.constant 0 : index
    %c0_96 = arith.constant 0 : index
    %85 = vector.load %arg6[%c0_95, %c0_96] : memref<1x144xf32, #tpu.memory_space<vmem>>, vector<1x144xf32>
    %86 = vector.broadcast %85 : vector<1x144xf32> to vector<2x144xf32>
    %87 = arith.mulf %84, %86 : vector<2x144xf32>
    %cst_97 = arith.constant dense<0.000000e+00> : vector<2xf32>
    %88 = vector.multi_reduction <add>, %87, %cst_97 [1] : vector<2x144xf32> to vector<2xf32>
    %89 = vector.shape_cast %88 : vector<2xf32> to vector<2x1xf32>
    %cst_98 = arith.constant dense<0.000000e+00> : vector<1xf32>
    %90 = vector.multi_reduction <add>, %89, %cst_98 [0] : vector<2x1xf32> to vector<1xf32>
    %91 = vector.shape_cast %90 : vector<1xf32> to vector<1x1xf32>
    %cst_99 = arith.constant 7.812500e-03 : f32
    %92 = vector.broadcast %cst_99 : f32 to vector<1x1xf32>
    %93 = arith.mulf %91, %92 : vector<1x1xf32>
    %94 = vector.broadcast %93 : vector<1x1xf32> to vector<2x144xf32>
    %95 = arith.subf %84, %94 : vector<2x144xf32>
    %96 = vector.broadcast %85 : vector<1x144xf32> to vector<2x144xf32>
    %97 = arith.mulf %95, %96 : vector<2x144xf32>
    %98 = arith.mulf %97, %97 : vector<2x144xf32>
    %cst_100 = arith.constant dense<0.000000e+00> : vector<2xf32>
    %99 = vector.multi_reduction <add>, %98, %cst_100 [1] : vector<2x144xf32> to vector<2xf32>
    %100 = vector.shape_cast %99 : vector<2xf32> to vector<2x1xf32>
    %cst_101 = arith.constant dense<0.000000e+00> : vector<1xf32>
    %101 = vector.multi_reduction <add>, %100, %cst_101 [0] : vector<2x1xf32> to vector<1xf32>
    %102 = vector.shape_cast %101 : vector<1xf32> to vector<1x1xf32>
    %cst_102 = arith.constant 7.812500e-03 : f32
    %103 = vector.broadcast %cst_102 : f32 to vector<1x1xf32>
    %104 = arith.mulf %102, %103 : vector<1x1xf32>
    %cst_103 = arith.constant 9.99999974E-6 : f32
    %105 = vector.broadcast %cst_103 : f32 to vector<1x1xf32>
    %106 = arith.addf %104, %105 : vector<1x1xf32>
    %107 = math.rsqrt %106 : vector<1x1xf32>
    %108 = vector.broadcast %107 : vector<1x1xf32> to vector<2x144xf32>
    %109 = arith.mulf %95, %108 : vector<2x144xf32>
    %c0_104 = arith.constant 0 : index
    %c0_105 = arith.constant 0 : index
    %c0_106 = arith.constant 0 : index
    %110 = vector.load %arg4[%c0_104, %c0_105, %c0_106] : memref<1x2x1xf32, #tpu.memory_space<vmem>>, vector<1x2x1xf32>
    %111 = vector.shape_cast %110 : vector<1x2x1xf32> to vector<2x1xf32>
    %112 = vector.broadcast %111 : vector<2x1xf32> to vector<2x144xf32>
    %113 = arith.mulf %109, %112 : vector<2x144xf32>
    %c0_107 = arith.constant 0 : index
    %c0_108 = arith.constant 0 : index
    %c0_109 = arith.constant 0 : index
    %114 = vector.load %arg5[%c0_107, %c0_108, %c0_109] : memref<1x2x1xf32, #tpu.memory_space<vmem>>, vector<1x2x1xf32>
    %115 = vector.shape_cast %114 : vector<1x2x1xf32> to vector<2x1xf32>
    %116 = vector.broadcast %115 : vector<2x1xf32> to vector<2x144xf32>
    %117 = arith.addf %113, %116 : vector<2x144xf32>
    %cst_110 = arith.constant 0.000000e+00 : f32
    %118 = vector.broadcast %cst_110 : f32 to vector<2x144xf32>
    %119 = arith.cmpf ogt, %117, %118 : vector<2x144xf32>
    %cst_111 = arith.constant 0.00999999977 : f32
    %120 = vector.broadcast %cst_111 : f32 to vector<2x144xf32>
    %121 = arith.mulf %120, %117 : vector<2x144xf32>
    %122 = arith.select %119, %117, %121 : vector<2x144xi1>, vector<2x144xf32>
    %123 = vector.broadcast %85 : vector<1x144xf32> to vector<2x144xf32>
    %124 = arith.mulf %122, %123 : vector<2x144xf32>
    %cst_112 = arith.constant 0.000000e+00 : bf16
    %125 = vector.broadcast %cst_112 : bf16 to vector<2x256xbf16>
    %c0_113 = arith.constant 0 : index
    %c0_114 = arith.constant 0 : index
    %c0_115 = arith.constant 0 : index
    %c0_116 = arith.constant 0 : index
    %126 = vector.load %arg7[%c0_113, %c0_114, %c0_115, %c0_116] : memref<1x1x2x256xbf16, #tpu.memory_space<vmem>>, vector<1x1x2x256xbf16>
    %127 = vector.shape_cast %126 : vector<1x1x2x256xbf16> to vector<2x256xbf16>
    %128 = vector.shape_cast %125 : vector<2x256xbf16> to vector<1x1x2x256xbf16>
    tpu.vector_store %arg7[%c0_113, %c0_114, %c0_115, %c0_116], %128 {strides = array<i32>} : memref<1x1x2x256xbf16, #tpu.memory_space<vmem>>, vector<1x1x2x256xbf16>,
    %129 = arith.truncf %124 : vector<2x144xf32> to vector<2x144xbf16>
    %c0_117 = arith.constant 0 : index
    %c0_118 = arith.constant 0 : index
    %c0_119 = arith.constant 0 : index
    %c43_120 = arith.constant 43 : index
    %130 = vector.load %arg7[%c0_117, %c0_118, %c0_119, %c43_120] : memref<1x1x2x256xbf16, #tpu.memory_space<vmem>>, vector<1x1x2x144xbf16>
    %131 = vector.shape_cast %130 : vector<1x1x2x144xbf16> to vector<2x144xbf16>
    %132 = vector.shape_cast %129 : vector<2x144xbf16> to vector<1x1x2x144xbf16>
    tpu.vector_store %arg7[%c0_117, %c0_118, %c0_119, %c43_120], %132 {strides = array<i32>} : memref<1x1x2x256xbf16, #tpu.memory_space<vmem>>, vector<1x1x2x144xbf16>,
    return
  }
  func.func @transform_0(%arg0: i32, %arg1: i32) -> (i32, i32, i32) {
    %c0_i32 = arith.constant 0 : i32
    %c0_i32_0 = arith.constant 0 : i32
    %c0_i32_1 = arith.constant 0 : i32
    return %arg0, %c0_i32, %c0_i32_0 : i32, i32, i32
  }
  func.func @transform_1(%arg0: i32, %arg1: i32) -> (i32, i32, i32) {
    %c0_i32 = arith.constant 0 : i32
    %c0_i32_0 = arith.constant 0 : i32
    %c0_i32_1 = arith.constant 0 : i32
    return %arg1, %c0_i32, %c0_i32_0 : i32, i32, i32
  }
  func.func @transform_2(%arg0: i32, %arg1: i32) -> (i32, i32, i32) {
    %c0_i32 = arith.constant 0 : i32
    %c0_i32_0 = arith.constant 0 : i32
    %c0_i32_1 = arith.constant 0 : i32
    return %arg1, %c0_i32, %c0_i32_0 : i32, i32, i32
  }
  func.func @transform_3(%arg0: i32, %arg1: i32) -> (i32, i32, i32) {
    %c0_i32 = arith.constant 0 : i32
    %c0_i32_0 = arith.constant 0 : i32
    %c0_i32_1 = arith.constant 0 : i32
    return %arg1, %c0_i32, %c0_i32_0 : i32, i32, i32
  }
  func.func @transform_4(%arg0: i32, %arg1: i32) -> (i32, i32) {
    %c0_i32 = arith.constant 0 : i32
    %c0_i32_0 = arith.constant 0 : i32
    %c0_i32_1 = arith.constant 0 : i32
    return %c0_i32, %c0_i32_0 : i32, i32
  }
  func.func @transform_5(%arg0: i32, %arg1: i32) -> (i32, i32, i32, i32) {
    %c0_i32 = arith.constant 0 : i32
    %c0_i32_0 = arith.constant 0 : i32
    %c0_i32_1 = arith.constant 0 : i32
    return %arg0, %arg1, %c0_i32, %c0_i32_0 : i32, i32, i32, i32
  }
}

module attributes {stable_mosaic.version = 11 : i64} {
  func.func @_conv_gn_lrelu_kernel(%arg0: i32, %arg1: i32, %arg2: memref<1x8x256xbf16, #tpu.memory_space<vmem>>, %arg3: memref<1x2x216xbf16, #tpu.memory_space<vmem>>, %arg4: memref<1x2x1xf32, #tpu.memory_space<vmem>>, %arg5: memref<1x2x1xf32, #tpu.memory_space<vmem>>, %arg6: memref<1x144xf32, #tpu.memory_space<vmem>>, %arg7: memref<1x1x2x256xf32, #tpu.memory_space<vmem>>, %arg8: memref<216x144xbf16, #tpu.memory_space<vmem>>) attributes {dimension_semantics = [#tpu.dimension_semantics<parallel>, #tpu.dimension_semantics<parallel>], iteration_bounds = array<i64: 2, 4>, scalar_prefetch = 0 : i64, scratch_operands = 1 : i64, tpu.core_type = #tpu.core_type<tc>, window_params = [{transform_indices = @transform_0, window_bounds = array<i64: 1, 8, 256>}, {transform_indices = @transform_1, window_bounds = array<i64: 1, 2, 216>}, {transform_indices = @transform_2, window_bounds = array<i64: 1, 2, 1>}, {transform_indices = @transform_3, window_bounds = array<i64: 1, 2, 1>}, {pipeline_mode = #tpu.pipeline_mode<synchronous>, transform_indices = @transform_4, window_bounds = array<i64: 1, 144>}, {transform_indices = @transform_5, window_bounds = array<i64: 1, 1, 2, 256>}]} {
    %c0 = arith.constant 0 : index
    %c0_0 = arith.constant 0 : index
    %c0_1 = arith.constant 0 : index
    %0 = vector.load %arg2[%c0, %c0_0, %c0_1] : memref<1x8x256xbf16, #tpu.memory_space<vmem>>, vector<1x8x144xbf16>
    %1 = vector.shape_cast %0 : vector<1x8x144xbf16> to vector<8x144xbf16>
    %c0_2 = arith.constant 0 : index
    %c0_3 = arith.constant 0 : index
    %2 = vector.load %arg8[%c0_2, %c0_3] : memref<216x144xbf16, #tpu.memory_space<vmem>>, vector<8x144xbf16>
    tpu.vector_store %arg8[%c0_2, %c0_3], %1 {strides = array<i32>} : memref<216x144xbf16, #tpu.memory_space<vmem>>, vector<8x144xbf16>,
    %c0_4 = arith.constant 0 : index
    %c0_5 = arith.constant 0 : index
    %c1 = arith.constant 1 : index
    %3 = vector.load %arg2[%c0_4, %c0_5, %c1] : memref<1x8x256xbf16, #tpu.memory_space<vmem>>, vector<1x8x144xbf16>
    %4 = vector.shape_cast %3 : vector<1x8x144xbf16> to vector<8x144xbf16>
    %c8 = arith.constant 8 : index
    %c0_6 = arith.constant 0 : index
    %5 = vector.load %arg8[%c8, %c0_6] : memref<216x144xbf16, #tpu.memory_space<vmem>>, vector<8x144xbf16>
    tpu.vector_store %arg8[%c8, %c0_6], %4 {strides = array<i32>} : memref<216x144xbf16, #tpu.memory_space<vmem>>, vector<8x144xbf16>,
    %c0_7 = arith.constant 0 : index
    %c0_8 = arith.constant 0 : index
    %c2 = arith.constant 2 : index
    %6 = vector.load %arg2[%c0_7, %c0_8, %c2] : memref<1x8x256xbf16, #tpu.memory_space<vmem>>, vector<1x8x144xbf16>
    %7 = vector.shape_cast %6 : vector<1x8x144xbf16> to vector<8x144xbf16>
    %c16 = arith.constant 16 : index
    %c0_9 = arith.constant 0 : index
    %8 = vector.load %arg8[%c16, %c0_9] : memref<216x144xbf16, #tpu.memory_space<vmem>>, vector<8x144xbf16>
    tpu.vector_store %arg8[%c16, %c0_9], %7 {strides = array<i32>} : memref<216x144xbf16, #tpu.memory_space<vmem>>, vector<8x144xbf16>,
    %c0_10 = arith.constant 0 : index
    %c0_11 = arith.constant 0 : index
    %c6 = arith.constant 6 : index
    %9 = vector.load %arg2[%c0_10, %c0_11, %c6] : memref<1x8x256xbf16, #tpu.memory_space<vmem>>, vector<1x8x144xbf16>
    %10 = vector.shape_cast %9 : vector<1x8x144xbf16> to vector<8x144xbf16>
    %c24 = arith.constant 24 : index
    %c0_12 = arith.constant 0 : index
    %11 = vector.load %arg8[%c24, %c0_12] : memref<216x144xbf16, #tpu.memory_space<vmem>>, vector<8x144xbf16>
    tpu.vector_store %arg8[%c24, %c0_12], %10 {strides = array<i32>} : memref<216x144xbf16, #tpu.memory_space<vmem>>, vector<8x144xbf16>,
    %c0_13 = arith.constant 0 : index
    %c0_14 = arith.constant 0 : index
    %c7 = arith.constant 7 : index
    %12 = vector.load %arg2[%c0_13, %c0_14, %c7] : memref<1x8x256xbf16, #tpu.memory_space<vmem>>, vector<1x8x144xbf16>
    %13 = vector.shape_cast %12 : vector<1x8x144xbf16> to vector<8x144xbf16>
    %c32 = arith.constant 32 : index
    %c0_15 = arith.constant 0 : index
    %14 = vector.load %arg8[%c32, %c0_15] : memref<216x144xbf16, #tpu.memory_space<vmem>>, vector<8x144xbf16>
    tpu.vector_store %arg8[%c32, %c0_15], %13 {strides = array<i32>} : memref<216x144xbf16, #tpu.memory_space<vmem>>, vector<8x144xbf16>,
    %c0_16 = arith.constant 0 : index
    %c0_17 = arith.constant 0 : index
    %c8_18 = arith.constant 8 : index
    %15 = vector.load %arg2[%c0_16, %c0_17, %c8_18] : memref<1x8x256xbf16, #tpu.memory_space<vmem>>, vector<1x8x144xbf16>
    %16 = vector.shape_cast %15 : vector<1x8x144xbf16> to vector<8x144xbf16>
    %c40 = arith.constant 40 : index
    %c0_19 = arith.constant 0 : index
    %17 = vector.load %arg8[%c40, %c0_19] : memref<216x144xbf16, #tpu.memory_space<vmem>>, vector<8x144xbf16>
    tpu.vector_store %arg8[%c40, %c0_19], %16 {strides = array<i32>} : memref<216x144xbf16, #tpu.memory_space<vmem>>, vector<8x144xbf16>,
    %c0_20 = arith.constant 0 : index
    %c0_21 = arith.constant 0 : index
    %c12 = arith.constant 12 : index
    %18 = vector.load %arg2[%c0_20, %c0_21, %c12] : memref<1x8x256xbf16, #tpu.memory_space<vmem>>, vector<1x8x144xbf16>
    %19 = vector.shape_cast %18 : vector<1x8x144xbf16> to vector<8x144xbf16>
    %c48 = arith.constant 48 : index
    %c0_22 = arith.constant 0 : index
    %20 = vector.load %arg8[%c48, %c0_22] : memref<216x144xbf16, #tpu.memory_space<vmem>>, vector<8x144xbf16>
    tpu.vector_store %arg8[%c48, %c0_22], %19 {strides = array<i32>} : memref<216x144xbf16, #tpu.memory_space<vmem>>, vector<8x144xbf16>,
    %c0_23 = arith.constant 0 : index
    %c0_24 = arith.constant 0 : index
    %c13 = arith.constant 13 : index
    %21 = vector.load %arg2[%c0_23, %c0_24, %c13] : memref<1x8x256xbf16, #tpu.memory_space<vmem>>, vector<1x8x144xbf16>
    %22 = vector.shape_cast %21 : vector<1x8x144xbf16> to vector<8x144xbf16>
    %c56 = arith.constant 56 : index
    %c0_25 = arith.constant 0 : index
    %23 = vector.load %arg8[%c56, %c0_25] : memref<216x144xbf16, #tpu.memory_space<vmem>>, vector<8x144xbf16>
    tpu.vector_store %arg8[%c56, %c0_25], %22 {strides = array<i32>} : memref<216x144xbf16, #tpu.memory_space<vmem>>, vector<8x144xbf16>,
    %c0_26 = arith.constant 0 : index
    %c0_27 = arith.constant 0 : index
    %c14 = arith.constant 14 : index
    %24 = vector.load %arg2[%c0_26, %c0_27, %c14] : memref<1x8x256xbf16, #tpu.memory_space<vmem>>, vector<1x8x144xbf16>
    %25 = vector.shape_cast %24 : vector<1x8x144xbf16> to vector<8x144xbf16>
    %c64 = arith.constant 64 : index
    %c0_28 = arith.constant 0 : index
    %26 = vector.load %arg8[%c64, %c0_28] : memref<216x144xbf16, #tpu.memory_space<vmem>>, vector<8x144xbf16>
    tpu.vector_store %arg8[%c64, %c0_28], %25 {strides = array<i32>} : memref<216x144xbf16, #tpu.memory_space<vmem>>, vector<8x144xbf16>,
    %c0_29 = arith.constant 0 : index
    %c0_30 = arith.constant 0 : index
    %c36 = arith.constant 36 : index
    %27 = vector.load %arg2[%c0_29, %c0_30, %c36] : memref<1x8x256xbf16, #tpu.memory_space<vmem>>, vector<1x8x144xbf16>
    %28 = vector.shape_cast %27 : vector<1x8x144xbf16> to vector<8x144xbf16>
    %c72 = arith.constant 72 : index
    %c0_31 = arith.constant 0 : index
    %29 = vector.load %arg8[%c72, %c0_31] : memref<216x144xbf16, #tpu.memory_space<vmem>>, vector<8x144xbf16>
    tpu.vector_store %arg8[%c72, %c0_31], %28 {strides = array<i32>} : memref<216x144xbf16, #tpu.memory_space<vmem>>, vector<8x144xbf16>,
    %c0_32 = arith.constant 0 : index
    %c0_33 = arith.constant 0 : index
    %c37 = arith.constant 37 : index
    %30 = vector.load %arg2[%c0_32, %c0_33, %c37] : memref<1x8x256xbf16, #tpu.memory_space<vmem>>, vector<1x8x144xbf16>
    %31 = vector.shape_cast %30 : vector<1x8x144xbf16> to vector<8x144xbf16>
    %c80 = arith.constant 80 : index
    %c0_34 = arith.constant 0 : index
    %32 = vector.load %arg8[%c80, %c0_34] : memref<216x144xbf16, #tpu.memory_space<vmem>>, vector<8x144xbf16>
    tpu.vector_store %arg8[%c80, %c0_34], %31 {strides = array<i32>} : memref<216x144xbf16, #tpu.memory_space<vmem>>, vector<8x144xbf16>,
    %c0_35 = arith.constant 0 : index
    %c0_36 = arith.constant 0 : index
    %c38 = arith.constant 38 : index
    %33 = vector.load %arg2[%c0_35, %c0_36, %c38] : memref<1x8x256xbf16, #tpu.memory_space<vmem>>, vector<1x8x144xbf16>
    %34 = vector.shape_cast %33 : vector<1x8x144xbf16> to vector<8x144xbf16>
    %c88 = arith.constant 88 : index
    %c0_37 = arith.constant 0 : index
    %35 = vector.load %arg8[%c88, %c0_37] : memref<216x144xbf16, #tpu.memory_space<vmem>>, vector<8x144xbf16>
    tpu.vector_store %arg8[%c88, %c0_37], %34 {strides = array<i32>} : memref<216x144xbf16, #tpu.memory_space<vmem>>, vector<8x144xbf16>,
    %c0_38 = arith.constant 0 : index
    %c0_39 = arith.constant 0 : index
    %c42 = arith.constant 42 : index
    %36 = vector.load %arg2[%c0_38, %c0_39, %c42] : memref<1x8x256xbf16, #tpu.memory_space<vmem>>, vector<1x8x144xbf16>
    %37 = vector.shape_cast %36 : vector<1x8x144xbf16> to vector<8x144xbf16>
    %c96 = arith.constant 96 : index
    %c0_40 = arith.constant 0 : index
    %38 = vector.load %arg8[%c96, %c0_40] : memref<216x144xbf16, #tpu.memory_space<vmem>>, vector<8x144xbf16>
    tpu.vector_store %arg8[%c96, %c0_40], %37 {strides = array<i32>} : memref<216x144xbf16, #tpu.memory_space<vmem>>, vector<8x144xbf16>,
    %c0_41 = arith.constant 0 : index
    %c0_42 = arith.constant 0 : index
    %c43 = arith.constant 43 : index
    %39 = vector.load %arg2[%c0_41, %c0_42, %c43] : memref<1x8x256xbf16, #tpu.memory_space<vmem>>, vector<1x8x144xbf16>
    %40 = vector.shape_cast %39 : vector<1x8x144xbf16> to vector<8x144xbf16>
    %c104 = arith.constant 104 : index
    %c0_43 = arith.constant 0 : index
    %41 = vector.load %arg8[%c104, %c0_43] : memref<216x144xbf16, #tpu.memory_space<vmem>>, vector<8x144xbf16>
    tpu.vector_store %arg8[%c104, %c0_43], %40 {strides = array<i32>} : memref<216x144xbf16, #tpu.memory_space<vmem>>, vector<8x144xbf16>,
    %c0_44 = arith.constant 0 : index
    %c0_45 = arith.constant 0 : index
    %c44 = arith.constant 44 : index
    %42 = vector.load %arg2[%c0_44, %c0_45, %c44] : memref<1x8x256xbf16, #tpu.memory_space<vmem>>, vector<1x8x144xbf16>
    %43 = vector.shape_cast %42 : vector<1x8x144xbf16> to vector<8x144xbf16>
    %c112 = arith.constant 112 : index
    %c0_46 = arith.constant 0 : index
    %44 = vector.load %arg8[%c112, %c0_46] : memref<216x144xbf16, #tpu.memory_space<vmem>>, vector<8x144xbf16>
    tpu.vector_store %arg8[%c112, %c0_46], %43 {strides = array<i32>} : memref<216x144xbf16, #tpu.memory_space<vmem>>, vector<8x144xbf16>,
    %c0_47 = arith.constant 0 : index
    %c0_48 = arith.constant 0 : index
    %c48_49 = arith.constant 48 : index
    %45 = vector.load %arg2[%c0_47, %c0_48, %c48_49] : memref<1x8x256xbf16, #tpu.memory_space<vmem>>, vector<1x8x144xbf16>
    %46 = vector.shape_cast %45 : vector<1x8x144xbf16> to vector<8x144xbf16>
    %c120 = arith.constant 120 : index
    %c0_50 = arith.constant 0 : index
    %47 = vector.load %arg8[%c120, %c0_50] : memref<216x144xbf16, #tpu.memory_space<vmem>>, vector<8x144xbf16>
    tpu.vector_store %arg8[%c120, %c0_50], %46 {strides = array<i32>} : memref<216x144xbf16, #tpu.memory_space<vmem>>, vector<8x144xbf16>,
    %c0_51 = arith.constant 0 : index
    %c0_52 = arith.constant 0 : index
    %c49 = arith.constant 49 : index
    %48 = vector.load %arg2[%c0_51, %c0_52, %c49] : memref<1x8x256xbf16, #tpu.memory_space<vmem>>, vector<1x8x144xbf16>
    %49 = vector.shape_cast %48 : vector<1x8x144xbf16> to vector<8x144xbf16>
    %c128 = arith.constant 128 : index
    %c0_53 = arith.constant 0 : index
    %50 = vector.load %arg8[%c128, %c0_53] : memref<216x144xbf16, #tpu.memory_space<vmem>>, vector<8x144xbf16>
    tpu.vector_store %arg8[%c128, %c0_53], %49 {strides = array<i32>} : memref<216x144xbf16, #tpu.memory_space<vmem>>, vector<8x144xbf16>,
    %c0_54 = arith.constant 0 : index
    %c0_55 = arith.constant 0 : index
    %c50 = arith.constant 50 : index
    %51 = vector.load %arg2[%c0_54, %c0_55, %c50] : memref<1x8x256xbf16, #tpu.memory_space<vmem>>, vector<1x8x144xbf16>
    %52 = vector.shape_cast %51 : vector<1x8x144xbf16> to vector<8x144xbf16>
    %c136 = arith.constant 136 : index
    %c0_56 = arith.constant 0 : index
    %53 = vector.load %arg8[%c136, %c0_56] : memref<216x144xbf16, #tpu.memory_space<vmem>>, vector<8x144xbf16>
    tpu.vector_store %arg8[%c136, %c0_56], %52 {strides = array<i32>} : memref<216x144xbf16, #tpu.memory_space<vmem>>, vector<8x144xbf16>,
    %c0_57 = arith.constant 0 : index
    %c0_58 = arith.constant 0 : index
    %c72_59 = arith.constant 72 : index
    %54 = vector.load %arg2[%c0_57, %c0_58, %c72_59] : memref<1x8x256xbf16, #tpu.memory_space<vmem>>, vector<1x8x144xbf16>
    %55 = vector.shape_cast %54 : vector<1x8x144xbf16> to vector<8x144xbf16>
    %c144 = arith.constant 144 : index
    %c0_60 = arith.constant 0 : index
    %56 = vector.load %arg8[%c144, %c0_60] : memref<216x144xbf16, #tpu.memory_space<vmem>>, vector<8x144xbf16>
    tpu.vector_store %arg8[%c144, %c0_60], %55 {strides = array<i32>} : memref<216x144xbf16, #tpu.memory_space<vmem>>, vector<8x144xbf16>,
    %c0_61 = arith.constant 0 : index
    %c0_62 = arith.constant 0 : index
    %c73 = arith.constant 73 : index
    %57 = vector.load %arg2[%c0_61, %c0_62, %c73] : memref<1x8x256xbf16, #tpu.memory_space<vmem>>, vector<1x8x144xbf16>
    %58 = vector.shape_cast %57 : vector<1x8x144xbf16> to vector<8x144xbf16>
    %c152 = arith.constant 152 : index
    %c0_63 = arith.constant 0 : index
    %59 = vector.load %arg8[%c152, %c0_63] : memref<216x144xbf16, #tpu.memory_space<vmem>>, vector<8x144xbf16>
    tpu.vector_store %arg8[%c152, %c0_63], %58 {strides = array<i32>} : memref<216x144xbf16, #tpu.memory_space<vmem>>, vector<8x144xbf16>,
    %c0_64 = arith.constant 0 : index
    %c0_65 = arith.constant 0 : index
    %c74 = arith.constant 74 : index
    %60 = vector.load %arg2[%c0_64, %c0_65, %c74] : memref<1x8x256xbf16, #tpu.memory_space<vmem>>, vector<1x8x144xbf16>
    %61 = vector.shape_cast %60 : vector<1x8x144xbf16> to vector<8x144xbf16>
    %c160 = arith.constant 160 : index
    %c0_66 = arith.constant 0 : index
    %62 = vector.load %arg8[%c160, %c0_66] : memref<216x144xbf16, #tpu.memory_space<vmem>>, vector<8x144xbf16>
    tpu.vector_store %arg8[%c160, %c0_66], %61 {strides = array<i32>} : memref<216x144xbf16, #tpu.memory_space<vmem>>, vector<8x144xbf16>,
    %c0_67 = arith.constant 0 : index
    %c0_68 = arith.constant 0 : index
    %c78 = arith.constant 78 : index
    %63 = vector.load %arg2[%c0_67, %c0_68, %c78] : memref<1x8x256xbf16, #tpu.memory_space<vmem>>, vector<1x8x144xbf16>
    %64 = vector.shape_cast %63 : vector<1x8x144xbf16> to vector<8x144xbf16>
    %c168 = arith.constant 168 : index
    %c0_69 = arith.constant 0 : index
    %65 = vector.load %arg8[%c168, %c0_69] : memref<216x144xbf16, #tpu.memory_space<vmem>>, vector<8x144xbf16>
    tpu.vector_store %arg8[%c168, %c0_69], %64 {strides = array<i32>} : memref<216x144xbf16, #tpu.memory_space<vmem>>, vector<8x144xbf16>,
    %c0_70 = arith.constant 0 : index
    %c0_71 = arith.constant 0 : index
    %c79 = arith.constant 79 : index
    %66 = vector.load %arg2[%c0_70, %c0_71, %c79] : memref<1x8x256xbf16, #tpu.memory_space<vmem>>, vector<1x8x144xbf16>
    %67 = vector.shape_cast %66 : vector<1x8x144xbf16> to vector<8x144xbf16>
    %c176 = arith.constant 176 : index
    %c0_72 = arith.constant 0 : index
    %68 = vector.load %arg8[%c176, %c0_72] : memref<216x144xbf16, #tpu.memory_space<vmem>>, vector<8x144xbf16>
    tpu.vector_store %arg8[%c176, %c0_72], %67 {strides = array<i32>} : memref<216x144xbf16, #tpu.memory_space<vmem>>, vector<8x144xbf16>,
    %c0_73 = arith.constant 0 : index
    %c0_74 = arith.constant 0 : index
    %c80_75 = arith.constant 80 : index
    %69 = vector.load %arg2[%c0_73, %c0_74, %c80_75] : memref<1x8x256xbf16, #tpu.memory_space<vmem>>, vector<1x8x144xbf16>
    %70 = vector.shape_cast %69 : vector<1x8x144xbf16> to vector<8x144xbf16>
    %c184 = arith.constant 184 : index
    %c0_76 = arith.constant 0 : index
    %71 = vector.load %arg8[%c184, %c0_76] : memref<216x144xbf16, #tpu.memory_space<vmem>>, vector<8x144xbf16>
    tpu.vector_store %arg8[%c184, %c0_76], %70 {strides = array<i32>} : memref<216x144xbf16, #tpu.memory_space<vmem>>, vector<8x144xbf16>,
    %c0_77 = arith.constant 0 : index
    %c0_78 = arith.constant 0 : index
    %c84 = arith.constant 84 : index
    %72 = vector.load %arg2[%c0_77, %c0_78, %c84] : memref<1x8x256xbf16, #tpu.memory_space<vmem>>, vector<1x8x144xbf16>
    %73 = vector.shape_cast %72 : vector<1x8x144xbf16> to vector<8x144xbf16>
    %c192 = arith.constant 192 : index
    %c0_79 = arith.constant 0 : index
    %74 = vector.load %arg8[%c192, %c0_79] : memref<216x144xbf16, #tpu.memory_space<vmem>>, vector<8x144xbf16>
    tpu.vector_store %arg8[%c192, %c0_79], %73 {strides = array<i32>} : memref<216x144xbf16, #tpu.memory_space<vmem>>, vector<8x144xbf16>,
    %c0_80 = arith.constant 0 : index
    %c0_81 = arith.constant 0 : index
    %c85 = arith.constant 85 : index
    %75 = vector.load %arg2[%c0_80, %c0_81, %c85] : memref<1x8x256xbf16, #tpu.memory_space<vmem>>, vector<1x8x144xbf16>
    %76 = vector.shape_cast %75 : vector<1x8x144xbf16> to vector<8x144xbf16>
    %c200 = arith.constant 200 : index
    %c0_82 = arith.constant 0 : index
    %77 = vector.load %arg8[%c200, %c0_82] : memref<216x144xbf16, #tpu.memory_space<vmem>>, vector<8x144xbf16>
    tpu.vector_store %arg8[%c200, %c0_82], %76 {strides = array<i32>} : memref<216x144xbf16, #tpu.memory_space<vmem>>, vector<8x144xbf16>,
    %c0_83 = arith.constant 0 : index
    %c0_84 = arith.constant 0 : index
    %c86 = arith.constant 86 : index
    %78 = vector.load %arg2[%c0_83, %c0_84, %c86] : memref<1x8x256xbf16, #tpu.memory_space<vmem>>, vector<1x8x144xbf16>
    %79 = vector.shape_cast %78 : vector<1x8x144xbf16> to vector<8x144xbf16>
    %c208 = arith.constant 208 : index
    %c0_85 = arith.constant 0 : index
    %80 = vector.load %arg8[%c208, %c0_85] : memref<216x144xbf16, #tpu.memory_space<vmem>>, vector<8x144xbf16>
    tpu.vector_store %arg8[%c208, %c0_85], %79 {strides = array<i32>} : memref<216x144xbf16, #tpu.memory_space<vmem>>, vector<8x144xbf16>,
    %c0_86 = arith.constant 0 : index
    %c0_87 = arith.constant 0 : index
    %c0_88 = arith.constant 0 : index
    %81 = vector.load %arg3[%c0_86, %c0_87, %c0_88] : memref<1x2x216xbf16, #tpu.memory_space<vmem>>, vector<1x2x216xbf16>
    %82 = vector.shape_cast %81 : vector<1x2x216xbf16> to vector<2x216xbf16>
    %c0_89 = arith.constant 0 : index
    %c0_90 = arith.constant 0 : index
    %83 = vector.load %arg8[%c0_89, %c0_90] : memref<216x144xbf16, #tpu.memory_space<vmem>>, vector<216x144xbf16>
    %cst = arith.constant dense<0.000000e+00> : vector<2x144xf32>
    %84 = tpu.matmul %82, %83, %cst {dimension_numbers = #tpu.dot_dimension_numbers<[1], [0], [0], [1], [0, 0, 1, 1], [], []>} : vector<2x216xbf16>, vector<216x144xbf16>, vector<2x144xf32> -> vector<2x144xf32>
    %c0_91 = arith.constant 0 : index
    %c0_92 = arith.constant 0 : index
    %85 = vector.load %arg6[%c0_91, %c0_92] : memref<1x144xf32, #tpu.memory_space<vmem>>, vector<1x144xf32>
    %86 = vector.broadcast %85 : vector<1x144xf32> to vector<2x144xf32>
    %87 = arith.mulf %84, %86 : vector<2x144xf32>
    %cst_93 = arith.constant dense<0.000000e+00> : vector<2xf32>
    %88 = vector.multi_reduction <add>, %87, %cst_93 [1] : vector<2x144xf32> to vector<2xf32>
    %89 = vector.shape_cast %88 : vector<2xf32> to vector<2x1xf32>
    %cst_94 = arith.constant dense<0.000000e+00> : vector<1xf32>
    %90 = vector.multi_reduction <add>, %89, %cst_94 [0] : vector<2x1xf32> to vector<1xf32>
    %91 = vector.shape_cast %90 : vector<1xf32> to vector<1x1xf32>
    %cst_95 = arith.constant 7.812500e-03 : f32
    %92 = vector.broadcast %cst_95 : f32 to vector<1x1xf32>
    %93 = arith.mulf %91, %92 : vector<1x1xf32>
    %94 = vector.broadcast %93 : vector<1x1xf32> to vector<2x144xf32>
    %95 = arith.subf %84, %94 : vector<2x144xf32>
    %96 = vector.broadcast %85 : vector<1x144xf32> to vector<2x144xf32>
    %97 = arith.mulf %95, %96 : vector<2x144xf32>
    %98 = arith.mulf %97, %97 : vector<2x144xf32>
    %cst_96 = arith.constant dense<0.000000e+00> : vector<2xf32>
    %99 = vector.multi_reduction <add>, %98, %cst_96 [1] : vector<2x144xf32> to vector<2xf32>
    %100 = vector.shape_cast %99 : vector<2xf32> to vector<2x1xf32>
    %cst_97 = arith.constant dense<0.000000e+00> : vector<1xf32>
    %101 = vector.multi_reduction <add>, %100, %cst_97 [0] : vector<2x1xf32> to vector<1xf32>
    %102 = vector.shape_cast %101 : vector<1xf32> to vector<1x1xf32>
    %cst_98 = arith.constant 7.812500e-03 : f32
    %103 = vector.broadcast %cst_98 : f32 to vector<1x1xf32>
    %104 = arith.mulf %102, %103 : vector<1x1xf32>
    %cst_99 = arith.constant 9.99999974E-6 : f32
    %105 = vector.broadcast %cst_99 : f32 to vector<1x1xf32>
    %106 = arith.addf %104, %105 : vector<1x1xf32>
    %107 = math.rsqrt %106 : vector<1x1xf32>
    %108 = vector.broadcast %107 : vector<1x1xf32> to vector<2x144xf32>
    %109 = arith.mulf %95, %108 : vector<2x144xf32>
    %c0_100 = arith.constant 0 : index
    %c0_101 = arith.constant 0 : index
    %c0_102 = arith.constant 0 : index
    %110 = vector.load %arg4[%c0_100, %c0_101, %c0_102] : memref<1x2x1xf32, #tpu.memory_space<vmem>>, vector<1x2x1xf32>
    %111 = vector.shape_cast %110 : vector<1x2x1xf32> to vector<2x1xf32>
    %112 = vector.broadcast %111 : vector<2x1xf32> to vector<2x144xf32>
    %113 = arith.mulf %109, %112 : vector<2x144xf32>
    %c0_103 = arith.constant 0 : index
    %c0_104 = arith.constant 0 : index
    %c0_105 = arith.constant 0 : index
    %114 = vector.load %arg5[%c0_103, %c0_104, %c0_105] : memref<1x2x1xf32, #tpu.memory_space<vmem>>, vector<1x2x1xf32>
    %115 = vector.shape_cast %114 : vector<1x2x1xf32> to vector<2x1xf32>
    %116 = vector.broadcast %115 : vector<2x1xf32> to vector<2x144xf32>
    %117 = arith.addf %113, %116 : vector<2x144xf32>
    %cst_106 = arith.constant 0.000000e+00 : f32
    %118 = vector.broadcast %cst_106 : f32 to vector<2x144xf32>
    %119 = arith.cmpf ogt, %117, %118 : vector<2x144xf32>
    %cst_107 = arith.constant 0.00999999977 : f32
    %120 = vector.broadcast %cst_107 : f32 to vector<2x144xf32>
    %121 = arith.mulf %120, %117 : vector<2x144xf32>
    %122 = arith.select %119, %117, %121 : vector<2x144xi1>, vector<2x144xf32>
    %123 = vector.broadcast %85 : vector<1x144xf32> to vector<2x144xf32>
    %124 = arith.mulf %122, %123 : vector<2x144xf32>
    %cst_108 = arith.constant 0.000000e+00 : f32
    %125 = vector.broadcast %cst_108 : f32 to vector<2x256xf32>
    %c0_109 = arith.constant 0 : index
    %c0_110 = arith.constant 0 : index
    %c0_111 = arith.constant 0 : index
    %c0_112 = arith.constant 0 : index
    %126 = vector.load %arg7[%c0_109, %c0_110, %c0_111, %c0_112] : memref<1x1x2x256xf32, #tpu.memory_space<vmem>>, vector<1x1x2x256xf32>
    %127 = vector.shape_cast %126 : vector<1x1x2x256xf32> to vector<2x256xf32>
    %128 = vector.shape_cast %125 : vector<2x256xf32> to vector<1x1x2x256xf32>
    tpu.vector_store %arg7[%c0_109, %c0_110, %c0_111, %c0_112], %128 {strides = array<i32>} : memref<1x1x2x256xf32, #tpu.memory_space<vmem>>, vector<1x1x2x256xf32>,
    %c0_113 = arith.constant 0 : index
    %c0_114 = arith.constant 0 : index
    %c0_115 = arith.constant 0 : index
    %c43_116 = arith.constant 43 : index
    %129 = vector.load %arg7[%c0_113, %c0_114, %c0_115, %c43_116] : memref<1x1x2x256xf32, #tpu.memory_space<vmem>>, vector<1x1x2x144xf32>
    %130 = vector.shape_cast %129 : vector<1x1x2x144xf32> to vector<2x144xf32>
    %131 = vector.shape_cast %124 : vector<2x144xf32> to vector<1x1x2x144xf32>
    tpu.vector_store %arg7[%c0_113, %c0_114, %c0_115, %c43_116], %131 {strides = array<i32>} : memref<1x1x2x256xf32, #tpu.memory_space<vmem>>, vector<1x1x2x144xf32>,
    return
  }
  func.func @transform_0(%arg0: i32, %arg1: i32) -> (i32, i32, i32) {
    %c0_i32 = arith.constant 0 : i32
    %c0_i32_0 = arith.constant 0 : i32
    %c0_i32_1 = arith.constant 0 : i32
    return %arg0, %c0_i32, %c0_i32_0 : i32, i32, i32
  }
  func.func @transform_1(%arg0: i32, %arg1: i32) -> (i32, i32, i32) {
    %c0_i32 = arith.constant 0 : i32
    %c0_i32_0 = arith.constant 0 : i32
    %c0_i32_1 = arith.constant 0 : i32
    return %arg1, %c0_i32, %c0_i32_0 : i32, i32, i32
  }
  func.func @transform_2(%arg0: i32, %arg1: i32) -> (i32, i32, i32) {
    %c0_i32 = arith.constant 0 : i32
    %c0_i32_0 = arith.constant 0 : i32
    %c0_i32_1 = arith.constant 0 : i32
    return %arg1, %c0_i32, %c0_i32_0 : i32, i32, i32
  }
  func.func @transform_3(%arg0: i32, %arg1: i32) -> (i32, i32, i32) {
    %c0_i32 = arith.constant 0 : i32
    %c0_i32_0 = arith.constant 0 : i32
    %c0_i32_1 = arith.constant 0 : i32
    return %arg1, %c0_i32, %c0_i32_0 : i32, i32, i32
  }
  func.func @transform_4(%arg0: i32, %arg1: i32) -> (i32, i32) {
    %c0_i32 = arith.constant 0 : i32
    %c0_i32_0 = arith.constant 0 : i32
    %c0_i32_1 = arith.constant 0 : i32
    return %c0_i32, %c0_i32_0 : i32, i32
  }
  func.func @transform_5(%arg0: i32, %arg1: i32) -> (i32, i32, i32, i32) {
    %c0_i32 = arith.constant 0 : i32
    %c0_i32_0 = arith.constant 0 : i32
    %c0_i32_1 = arith.constant 0 : i32
    return %arg0, %arg1, %c0_i32, %c0_i32_0 : i32, i32, i32, i32
  }
}

</mosaic_0001>

<bundles_post_ra>
// kernel: convd_forward.3
= control target key start
LH: loop header
LB: loop body
LE: loop exit
PB: predicated region body
PF: predicated region fallthrough
CT: control target
= control target key end

     0   :  { %s1226_s6 = smov 0   ;;  %s1794_s0 = inlined_call_operand.vmem [shape: f32[32,2,4,2,4,2], index: 0, kind: input, shape index: {}]   ;;  %s1795_s1 = inlined_call_operand.vmem [shape: f32[32,4,4], index: 1, kind: output, shape index: {}]  }
   0x1 LB: > { %s1187_s7 = sadd.s32 4294967295, %s1214_s6   ;;  %p1191_p0 = scmp.ge.s32.totalorder %s1214_s6, 1  ;;  %s1214_s6 = sphi %s1226_s6, %s11_s6  }
   0x2   : > { %p89_p1 = scmp.lt.s32.totalorder %s1214_s6, 5 }
   0x4   : > { %p90_p2 = pnand %p1191_p0, %p89_p1 }
   0x5   : > { %s1192_s8 = sshll.u32 (!%p90_p2), %s1187_s7, 3  ;;  %vm251_vm0 = vcmask (!%p90_p2), 11264   ;;  %vm636_vm1 = vcmask (!%p90_p2), 1043456   ;;  %vm1087_vm2 = vcmask (!%p90_p2), 1041409   ;;  %vm1089_vm3 = vcmask (!%p90_p2), 1042434  }
   0x6   : > { %93 = sbr.rel (%p90_p2) target bundleno = 422 (0x1a6), region = 24  ;;  %p111_p3 = scmp.lt.s32.totalorder (!%p90_p2), %s1192_s8, 31  ;;  %vm1091_vm4 = vcmask (!%p90_p2), 1043459   ;;  %vm1122_vm5 = vcmask (!%p90_p2), 27648  }
   0xd   : > { %s1797_s8 = smov (!%p111_p3, %s1192_s8), 31 }
   0xe   : > { %s1199_s9 = sshll.u32 %s1797_s8, 6  ;;  %s1196_s13 = sshll.u32 %s1797_s8, 2 }
   0xf   : > { %s1240_s12 = scalar_lea.vmem %s1794_s0, %s1199_s9  ;;  %s1458_s16 = scalar_lea.vmem %s1795_s1, %s1196_s13 }
  0x10   : > { %v125_v0 = vld [vmem:[%s1240_s12 + $0x8] sm:$0xf]  ;;  %v123_v1 = vld [vmem:[%s1240_s12] sm:$0xf]  ;;  %v126_v2 = vld [vmem:[%s1240_s12 + $0xc] sm:$0xf] }
  0x11   : > { %v258_v3 = vsel %vm251_vm0, %v125_v0, -inf  ;;  %v252_v4 = vsel %vm251_vm0, %v123_v1, -inf  ;;  %v124_v5 = vld [vmem:[%s1240_s12 + $0x4] sm:$0xf]  ;;  %v261_v6 = vsel %vm251_vm0, %v126_v2, -inf }
  0x12   : > { %259 = vmax.xlane.f32.xlu1 %v258_v3  ;;  %253 = vmax.xlane.f32.xlu0 %v252_v4  ;;  %v255_v7 = vsel %vm251_vm0, %v124_v5, -inf  ;;  %v128_v8 = vld [vmem:[%s1240_s12 + $0x14] sm:$0xf]  ;;  %v127_v9 = vld [vmem:[%s1240_s12 + $0x10] sm:$0xf] }
  0x13   : > { %v267_v10 = vsel %vm251_vm0, %v128_v8, -inf  ;;  %v264_v11 = vsel %vm251_vm0, %v127_v9, -inf  ;;  %v130_v12 = vld [vmem:[%s1240_s12 + $0x1c] sm:$0xf]  ;;  %v129_v13 = vld [vmem:[%s1240_s12 + $0x18] sm:$0xf] }
  0x14   : > { %v273_v14 = vsel %vm251_vm0, %v130_v12, -inf  ;;  %v270_v15 = vsel %vm251_vm0, %v129_v13, -inf  ;;  %v132_v16 = vld [vmem:[%s1240_s12 + $0x24] sm:$0xf]  ;;  %v131_v17 = vld [vmem:[%s1240_s12 + $0x20] sm:$0xf] }
  0x15   : > { %v279_v18 = vsel %vm251_vm0, %v132_v16, -inf  ;;  %v276_v19 = vsel %vm251_vm0, %v131_v17, -inf  ;;  %v134_v20 = vld [vmem:[%s1240_s12 + $0x2c] sm:$0xf]  ;;  %v133_v21 = vld [vmem:[%s1240_s12 + $0x28] sm:$0xf] }
  0x16   : > { %262 = vmax.xlane.f32.xlu1 %v261_v6  ;;  %256 = vmax.xlane.f32.xlu0 %v255_v7  ;;  %v285_v22 = vsel %vm251_vm0, %v134_v20, -inf  ;;  %v282_v23 = vsel %vm251_vm0, %v133_v21, -inf  ;;  %v136_v24 = vld [vmem:[%s1240_s12 + $0x34] sm:$0xf]  ;;  %v135_v25 = vld [vmem:[%s1240_s12 + $0x30] sm:$0xf] }
  0x17   : > { %v291_v26 = vsel %vm251_vm0, %v136_v24, -inf  ;;  %v288_v27 = vsel %vm251_vm0, %v135_v25, -inf  ;;  %v138_v28 = vld [vmem:[%s1240_s12 + $0x3c] sm:$0xf]  ;;  %v137_v29 = vld [vmem:[%s1240_s12 + $0x38] sm:$0xf] }
  0x18   : > { %v297_v30 = vsel %vm251_vm0, %v138_v28, -inf  ;;  %v294_v31 = vsel %vm251_vm0, %v137_v29, -inf  ;;  %v140_v32 = vld [vmem:[%s1240_s12 + $0x44] sm:$0xf]  ;;  %v139_v33 = vld [vmem:[%s1240_s12 + $0x40] sm:$0xf] }
  0x19   : > { %v303_v34 = vsel %vm251_vm0, %v140_v32, -inf  ;;  %v300_v35 = vsel %vm251_vm0, %v139_v33, -inf  ;;  %v142_v36 = vld [vmem:[%s1240_s12 + $0x4c] sm:$0xf]  ;;  %v141_v37 = vld [vmem:[%s1240_s12 + $0x48] sm:$0xf] }
  0x1a   : > { %268 = vmax.xlane.f32.xlu1 %v267_v10  ;;  %265 = vmax.xlane.f32.xlu0 %v264_v11  ;;  %v309_v38 = vsel %vm251_vm0, %v142_v36, -inf  ;;  %v306_v39 = vsel %vm251_vm0, %v141_v37, -inf  ;;  %v144_v40 = vld [vmem:[%s1240_s12 + $0x54] sm:$0xf]  ;;  %v143_v41 = vld [vmem:[%s1240_s12 + $0x50] sm:$0xf] }
  0x1b   : > { %v315_v42 = vsel %vm251_vm0, %v144_v40, -inf  ;;  %v312_v43 = vsel %vm251_vm0, %v143_v41, -inf  ;;  %v146_v44 = vld [vmem:[%s1240_s12 + $0x5c] sm:$0xf]  ;;  %v145_v45 = vld [vmem:[%s1240_s12 + $0x58] sm:$0xf] }
  0x1c   : > { %v321_v46 = vsel %vm251_vm0, %v146_v44, -inf  ;;  %v318_v47 = vsel %vm251_vm0, %v145_v45, -inf  ;;  %v148_v48 = vld [vmem:[%s1240_s12 + $0x64] sm:$0xf]  ;;  %v147_v49 = vld [vmem:[%s1240_s12 + $0x60] sm:$0xf] }
  0x1d   : > { %v327_v50 = vsel %vm251_vm0, %v148_v48, -inf  ;;  %v324_v51 = vsel %vm251_vm0, %v147_v49, -inf  ;;  %v150_v52 = vld [vmem:[%s1240_s12 + $0x6c] sm:$0xf]  ;;  %v149_v53 = vld [vmem:[%s1240_s12 + $0x68] sm:$0xf] }
  0x1e   : > { %274 = vmax.xlane.f32.xlu1 %v273_v14  ;;  %271 = vmax.xlane.f32.xlu0 %v270_v15  ;;  %v333_v54 = vsel %vm251_vm0, %v150_v52, -inf  ;;  %v330_v55 = vsel %vm251_vm0, %v149_v53, -inf  ;;  %v152_v56 = vld [vmem:[%s1240_s12 + $0x74] sm:$0xf]  ;;  %v151_v57 = vld [vmem:[%s1240_s12 + $0x70] sm:$0xf] }
  0x1f   : > { %v339_v58 = vsel %vm251_vm0, %v152_v56, -inf  ;;  %v336_v59 = vsel %vm251_vm0, %v151_v57, -inf  ;;  %v154_v60 = vld [vmem:[%s1240_s12 + $0x7c] sm:$0xf]  ;;  %v153_v61 = vld [vmem:[%s1240_s12 + $0x78] sm:$0xf] }
  0x20   : > { %v345_v62 = vsel %vm251_vm0, %v154_v60, -inf  ;;  %v342_v63 = vsel %vm251_vm0, %v153_v61, -inf  ;;  %v156_v0 = vld [vmem:[%s1240_s12 + $0x84] sm:$0xf]  ;;  %v155_v1 = vld [vmem:[%s1240_s12 + $0x80] sm:$0xf] }
  0x21   : > { %v351_v2 = vsel %vm251_vm0, %v156_v0, -inf  ;;  %v348_v3 = vsel %vm251_vm0, %v155_v1, -inf  ;;  %v158_v4 = vld [vmem:[%s1240_s12 + $0x8c] sm:$0xf]  ;;  %v157_v5 = vld [vmem:[%s1240_s12 + $0x88] sm:$0xf] }
  0x22   : > { %280 = vmax.xlane.f32.xlu1 %v279_v18  ;;  %277 = vmax.xlane.f32.xlu0 %v276_v19  ;;  %v357_v6 = vsel %vm251_vm0, %v158_v4, -inf  ;;  %v354_v7 = vsel %vm251_vm0, %v157_v5, -inf  ;;  %v160_v8 = vld [vmem:[%s1240_s12 + $0x94] sm:$0xf]  ;;  %v159_v9 = vld [vmem:[%s1240_s12 + $0x90] sm:$0xf] }
  0x23   : > { %v363_v10 = vsel %vm251_vm0, %v160_v8, -inf  ;;  %v360_v11 = vsel %vm251_vm0, %v159_v9, -inf  ;;  %v162_v12 = vld [vmem:[%s1240_s12 + $0x9c] sm:$0xf]  ;;  %v161_v13 = vld [vmem:[%s1240_s12 + $0x98] sm:$0xf] }
  0x24   : > { %v369_v14 = vsel %vm251_vm0, %v162_v12, -inf  ;;  %v366_v15 = vsel %vm251_vm0, %v161_v13, -inf  ;;  %v164_v16 = vld [vmem:[%s1240_s12 + $0xa4] sm:$0xf]  ;;  %v163_v17 = vld [vmem:[%s1240_s12 + $0xa0] sm:$0xf] }
  0x25   : > { %v375_v18 = vsel %vm251_vm0, %v164_v16, -inf  ;;  %v372_v19 = vsel %vm251_vm0, %v163_v17, -inf  ;;  %v166_v20 = vld [vmem:[%s1240_s12 + $0xac] sm:$0xf]  ;;  %v165_v21 = vld [vmem:[%s1240_s12 + $0xa8] sm:$0xf] }
  0x26   : > { %286 = vmax.xlane.f32.xlu1 %v285_v22  ;;  %283 = vmax.xlane.f32.xlu0 %v282_v23  ;;  %v381_v22 = vsel %vm251_vm0, %v166_v20, -inf  ;;  %v378_v23 = vsel %vm251_vm0, %v165_v21, -inf  ;;  %v168_v24 = vld [vmem:[%s1240_s12 + $0xb4] sm:$0xf]  ;;  %v167_v25 = vld [vmem:[%s1240_s12 + $0xb0] sm:$0xf] }
  0x27   : > { %v170_v28 = vld [vmem:[%s1240_s12 + $0xbc] sm:$0xf]  ;;  %v169_v29 = vld [vmem:[%s1240_s12 + $0xb8] sm:$0xf]  ;;  %v172_v32 = vld [vmem:[%s1240_s12 + $0xc4] sm:$0xf] }
  0x28   : > { %v171_v33 = vld [vmem:[%s1240_s12 + $0xc0] sm:$0xf]  ;;  %v174_v36 = vld [vmem:[%s1240_s12 + $0xcc] sm:$0xf]  ;;  %v173_v37 = vld [vmem:[%s1240_s12 + $0xc8] sm:$0xf] }
  0x29   : > { %v176_v40 = vld [vmem:[%s1240_s12 + $0xd4] sm:$0xf]  ;;  %v175_v41 = vld [vmem:[%s1240_s12 + $0xd0] sm:$0xf]  ;;  %v178_v44 = vld [vmem:[%s1240_s12 + $0xdc] sm:$0xf] }
  0x2a   : > { %292 = vmax.xlane.f32.xlu1 %v291_v26  ;;  %289 = vmax.xlane.f32.xlu0 %v288_v27  ;;  %v387_v26 = vsel %vm251_vm0, %v168_v24, -inf  ;;  %v384_v27 = vsel %vm251_vm0, %v167_v25, -inf  ;;  %v177_v45 = vld [vmem:[%s1240_s12 + $0xd8] sm:$0xf]  ;;  %v180_v48 = vld [vmem:[%s1240_s12 + $0xe4] sm:$0xf] }
  0x2b   : > { %v179_v49 = vld [vmem:[%s1240_s12 + $0xe0] sm:$0xf]  ;;  %v182_v52 = vld [vmem:[%s1240_s12 + $0xec] sm:$0xf]  ;;  %v181_v53 = vld [vmem:[%s1240_s12 + $0xe8] sm:$0xf] }
  0x2c   : > { %v184_v56 = vld [vmem:[%s1240_s12 + $0xf4] sm:$0xf]  ;;  %v183_v57 = vld [vmem:[%s1240_s12 + $0xf0] sm:$0xf]  ;;  %v186_v60 = vld [vmem:[%s1240_s12 + $0xfc] sm:$0xf] }
  0x2d   : > { %v185_v61 = vld [vmem:[%s1240_s12 + $0xf8] sm:$0xf]  ;;  %v188_v0 = vld [vmem:[%s1240_s12 + $0x104] sm:$0xf]  ;;  %v187_v1 = vld [vmem:[%s1240_s12 + $0x100] sm:$0xf] }
  0x2e   : > { %298 = vmax.xlane.f32.xlu1 %v297_v30  ;;  %295 = vmax.xlane.f32.xlu0 %v294_v31  ;;  %v393_v30 = vsel %vm251_vm0, %v170_v28, -inf  ;;  %v390_v31 = vsel %vm251_vm0, %v169_v29, -inf  ;;  %v190_v4 = vld [vmem:[%s1240_s12 + $0x10c] sm:$0xf]  ;;  %v189_v5 = vld [vmem:[%s1240_s12 + $0x108] sm:$0xf] }
  0x2f   : > { %v192_v8 = vld [vmem:[%s1240_s12 + $0x114] sm:$0xf]  ;;  %v191_v9 = vld [vmem:[%s1240_s12 + $0x110] sm:$0xf]  ;;  %v194_v12 = vld [vmem:[%s1240_s12 + $0x11c] sm:$0xf] }
  0x30   : > { %v193_v13 = vld [vmem:[%s1240_s12 + $0x118] sm:$0xf]  ;;  %v196_v16 = vld [vmem:[%s1240_s12 + $0x124] sm:$0xf]  ;;  %v195_v17 = vld [vmem:[%s1240_s12 + $0x120] sm:$0xf] }
  0x31   : > { %v471_v20 = vsel %vm251_vm0, %v196_v16, -inf  ;;  %v468_v21 = vsel %vm251_vm0, %v195_v17, -inf  ;;  %v200_v28 = vld [vmem:[%s1240_s12 + $0x134] sm:$0xf]  ;;  %v199_v29 = vld [vmem:[%s1240_s12 + $0x130] sm:$0xf] }
  0x32   : > { %304 = vmax.xlane.f32.xlu1 %v303_v34  ;;  %301 = vmax.xlane.f32.xlu0 %v300_v35  ;;  %v399_v34 = vsel %vm251_vm0, %v172_v32, -inf  ;;  %v396_v35 = vsel %vm251_vm0, %v171_v33, -inf  ;;  %v483_v32 = vsel %vm251_vm0, %v200_v28, -inf  ;;  %v480_v33 = vsel %vm251_vm0, %v199_v29, -inf }
  0x36   : > { %310 = vmax.xlane.f32.xlu1 %v309_v38  ;;  %307 = vmax.xlane.f32.xlu0 %v306_v39  ;;  %v405_v38 = vsel %vm251_vm0, %v174_v36, -inf  ;;  %v402_v39 = vsel %vm251_vm0, %v173_v37, -inf }
  0x3a   : > { %316 = vmax.xlane.f32.xlu1 %v315_v42  ;;  %313 = vmax.xlane.f32.xlu0 %v312_v43  ;;  %v411_v42 = vsel %vm251_vm0, %v176_v40, -inf  ;;  %v408_v43 = vsel %vm251_vm0, %v175_v41, -inf  ;;  %v204_v40 = vld [vmem:[%s1240_s12 + $0x144] sm:$0xf]  ;;  %v203_v41 = vld [vmem:[%s1240_s12 + $0x140] sm:$0xf] }
  0x3e   : > { %322 = vmax.xlane.f32.xlu1 %v321_v46  ;;  %319 = vmax.xlane.f32.xlu0 %v318_v47  ;;  %v417_v46 = vsel %vm251_vm0, %v178_v44, -inf  ;;  %v414_v47 = vsel %vm251_vm0, %v177_v45, -inf  ;;  %v495_v44 = vsel %vm251_vm0, %v204_v40, -inf  ;;  %v492_v45 = vsel %vm251_vm0, %v203_v41, -inf }
  0x42   : > { %328 = vmax.xlane.f32.xlu1 %v327_v50  ;;  %325 = vmax.xlane.f32.xlu0 %v324_v51  ;;  %v423_v50 = vsel %vm251_vm0, %v180_v48, -inf  ;;  %v420_v51 = vsel %vm251_vm0, %v179_v49, -inf }
  0x46   : > { %334 = vmax.xlane.f32.xlu1 %v333_v54  ;;  %331 = vmax.xlane.f32.xlu0 %v330_v55  ;;  %v429_v54 = vsel %vm251_vm0, %v182_v52, -inf  ;;  %v426_v55 = vsel %vm251_vm0, %v181_v53, -inf }
  0x4a   : > { %340 = vmax.xlane.f32.xlu1 %v339_v58  ;;  %337 = vmax.xlane.f32.xlu0 %v336_v59  ;;  %v435_v58 = vsel %vm251_vm0, %v184_v56, -inf  ;;  %v432_v59 = vsel %vm251_vm0, %v183_v57, -inf }
  0x4e   : > { %346 = vmax.xlane.f32.xlu1 %v345_v62  ;;  %343 = vmax.xlane.f32.xlu0 %v342_v63  ;;  %v441_v62 = vsel %vm251_vm0, %v186_v60, -inf  ;;  %v438_v63 = vsel %vm251_vm0, %v185_v61, -inf }
  0x52   : > { %352 = vmax.xlane.f32.xlu1 %v351_v2  ;;  %349 = vmax.xlane.f32.xlu0 %v348_v3  ;;  %v447_v2 = vsel %vm251_vm0, %v188_v0, -inf  ;;  %v444_v3 = vsel %vm251_vm0, %v187_v1, -inf }
  0x56   : > { %358 = vmax.xlane.f32.xlu1 %v357_v6  ;;  %355 = vmax.xlane.f32.xlu0 %v354_v7  ;;  %v453_v6 = vsel %vm251_vm0, %v190_v4, -inf  ;;  %v450_v7 = vsel %vm251_vm0, %v189_v5, -inf }
  0x5a   : > { %364 = vmax.xlane.f32.xlu1 %v363_v10  ;;  %361 = vmax.xlane.f32.xlu0 %v360_v11  ;;  %v459_v10 = vsel %vm251_vm0, %v192_v8, -inf  ;;  %v456_v11 = vsel %vm251_vm0, %v191_v9, -inf }
  0x5e   : > { %370 = vmax.xlane.f32.xlu1 %v369_v14  ;;  %367 = vmax.xlane.f32.xlu0 %v366_v15  ;;  %v465_v14 = vsel %vm251_vm0, %v194_v12, -inf  ;;  %v462_v15 = vsel %vm251_vm0, %v193_v13, -inf  ;;  %v211_v13 = vld [vmem:[%s1240_s12 + $0x160] sm:$0xf] }
  0x62   : > { %376 = vmax.xlane.f32.xlu1 %v375_v18  ;;  %373 = vmax.xlane.f32.xlu0 %v372_v19 }
  0x66   : > { %382 = vmax.xlane.f32.xlu1 %v381_v22  ;;  %379 = vmax.xlane.f32.xlu0 %v378_v23  ;;  %v198_v22 = vld [vmem:[%s1240_s12 + $0x12c] sm:$0xf]  ;;  %v197_v23 = vld [vmem:[%s1240_s12 + $0x128] sm:$0xf] }
  0x6a   : > { %388 = vmax.xlane.f32.xlu1 %v387_v26  ;;  %385 = vmax.xlane.f32.xlu0 %v384_v27  ;;  %v477_v26 = vsel %vm251_vm0, %v198_v22, -inf  ;;  %v474_v27 = vsel %vm251_vm0, %v197_v23, -inf }
  0x6e   : > { %394 = vmax.xlane.f32.xlu1 %v393_v30  ;;  %391 = vmax.xlane.f32.xlu0 %v390_v31 }
  0x72   : > { %400 = vmax.xlane.f32.xlu1 %v399_v34  ;;  %397 = vmax.xlane.f32.xlu0 %v396_v35  ;;  %v202_v34 = vld [vmem:[%s1240_s12 + $0x13c] sm:$0xf]  ;;  %v201_v35 = vld [vmem:[%s1240_s12 + $0x138] sm:$0xf] }
  0x76   : > { %406 = vmax.xlane.f32.xlu1 %v405_v38  ;;  %403 = vmax.xlane.f32.xlu0 %v402_v39  ;;  %v489_v38 = vsel %vm251_vm0, %v202_v34, -inf  ;;  %v486_v39 = vsel %vm251_vm0, %v201_v35, -inf }
  0x7a   : > { %412 = vmax.xlane.f32.xlu1 %v411_v42  ;;  %409 = vmax.xlane.f32.xlu0 %v408_v43 }
  0x7e   : > { %418 = vmax.xlane.f32.xlu1 %v417_v46  ;;  %415 = vmax.xlane.f32.xlu0 %v414_v47  ;;  %v206_v46 = vld [vmem:[%s1240_s12 + $0x14c] sm:$0xf]  ;;  %v205_v47 = vld [vmem:[%s1240_s12 + $0x148] sm:$0xf] }
  0x7f   : > { %v501_v56 = vsel %vm251_vm0, %v206_v46, -inf  ;;  %v498_v57 = vsel %vm251_vm0, %v205_v47, -inf }
  0x82   : > { %424 = vmax.xlane.f32.xlu1 %v423_v50  ;;  %421 = vmax.xlane.f32.xlu0 %v420_v51  ;;  %v957_v50 = vlaneseq }
  0x84   : > { %v958_v4 = vand.u32 127, %v957_v50  ;;  %v960_v5 = vshrl.u32 %v957_v50, 7  ;;  %v214_v50 = vld [vmem:[%s1240_s12 + $0x16c] sm:$0xf] }
  0x86   : > { %430 = vmax.xlane.f32.xlu1 %v429_v54  ;;  %427 = vmax.xlane.f32.xlu0 %v426_v55  ;;  %v1433_v22 = vsub.s32 %v958_v4, %v960_v5 }
  0x8a   : > { %436 = vmax.xlane.f32.xlu1 %v435_v58  ;;  %433 = vmax.xlane.f32.xlu0 %v432_v59  ;;  %v208_v58 = vld [vmem:[%s1240_s12 + $0x154] sm:$0xf] }
  0x8e   : > { %442 = vmax.xlane.f32.xlu1 %v441_v62  ;;  %439 = vmax.xlane.f32.xlu0 %v438_v63  ;;  %v207_v63 = vld [vmem:[%s1240_s12 + $0x150] sm:$0xf] }
  0x8f   : > { %v504_v12 = vsel %vm251_vm0, %v207_v63, -inf }
  0x92   : > { %448 = vmax.xlane.f32.xlu1 %v447_v2  ;;  %445 = vmax.xlane.f32.xlu0 %v444_v3 }
  0x96   : > { %454 = vmax.xlane.f32.xlu1 %v453_v6  ;;  %451 = vmax.xlane.f32.xlu0 %v450_v7  ;;  %v507_v6 = vsel %vm251_vm0, %v208_v58, -inf }
  0x9a   : > { %460 = vmax.xlane.f32.xlu1 %v459_v10  ;;  %457 = vmax.xlane.f32.xlu0 %v456_v11 }
  0x9e   : > { %466 = vmax.xlane.f32.xlu1 %v465_v14  ;;  %463 = vmax.xlane.f32.xlu0 %v462_v15  ;;  %v209_v14 = vld [vmem:[%s1240_s12 + $0x158] sm:$0xf] }
  0x9f   : > { %v260_v18 = vpop.xlane.xlu1 %259  ;;  %v254_v19 = vpop.xlane.xlu0 %253 }
  0xa0   : > { %v640_v52 = vsel %vm636_vm1, %v260_v18, -inf  ;;  %v637_v3 = vsel %vm636_vm1, %v254_v19, -inf }
  0xa2   : > { %472 = vmax.xlane.f32.xlu1 %v471_v20  ;;  %469 = vmax.xlane.f32.xlu0 %v468_v21 }
  0xa3   : > { %v263_v24 = vpop.xlane.xlu1 %262  ;;  %v257_v25 = vpop.xlane.xlu0 %256 }
  0xa4   : > { %v641_v48 = vsel %vm636_vm1, %v263_v24, -inf  ;;  %v638_v53 = vsel %vm636_vm1, %v257_v25, -inf  ;;  %v516_v24 = vsel %vm251_vm0, %v211_v13, -inf  ;;  %v510_v25 = vsel %vm251_vm0, %v209_v14, -inf  ;;  %v235_v13 = vld [vmem:[%s1240_s12 + $0x1c0] sm:$0xf] }
  0xa5   : > { %v642_v0 = vmax.f32 %v640_v52, %v641_v48  ;;  %v639_v7 = vmax.f32 %v637_v3, %v638_v53  ;;  %v230_v14 = vld [vmem:[%s1240_s12 + $0x1ac] sm:$0xf] }
  0xa6   : > { %478 = vmax.xlane.f32.xlu1 %v477_v26  ;;  %475 = vmax.xlane.f32.xlu0 %v474_v27 }
  0xa7   : > { %v269_v30 = vpop.xlane.xlu1 %268  ;;  %v266_v31 = vpop.xlane.xlu0 %265  ;;  %v832_v19 = vsel %vm636_vm1, %v642_v0, -inf  ;;  %v829_v26 = vsel %vm636_vm1, %v639_v7, -inf  ;;  %v229_v7 = vld [vmem:[%s1240_s12 + $0x1a8] sm:$0xf] }
  0xa8   : > { %v644_v59 = vsel %vm636_vm1, %v269_v30, -inf  ;;  %v643_v60 = vsel %vm636_vm1, %v266_v31, -inf }
  0xa9   : > { %v645_v8 = vmax.f32 %v643_v60, %v644_v59  ;;  %v221_v59 = vld [vmem:[%s1240_s12 + $0x188] sm:$0xf]  ;;  %v220_v60 = vld [vmem:[%s1240_s12 + $0x184] sm:$0xf] }
  0xaa   : > { %484 = vmax.xlane.f32.xlu1 %v483_v32  ;;  %481 = vmax.xlane.f32.xlu0 %v480_v33  ;;  %v213_v32 = vld [vmem:[%s1240_s12 + $0x168] sm:$0xf]  ;;  %v546_v63 = vsel %vm251_vm0, %v221_v59, -inf  ;;  %v543_v0 = vsel %vm251_vm0, %v220_v60, -inf }
  0xab   : > { %v275_v36 = vpop.xlane.xlu1 %274  ;;  %v272_v37 = vpop.xlane.xlu0 %271  ;;  %v835_v27 = vsel %vm636_vm1, %v645_v8, -inf  ;;  %v522_v40 = vsel %vm251_vm0, %v213_v32, -inf  ;;  %v228_v8 = vld [vmem:[%s1240_s12 + $0x1a4] sm:$0xf]  ;;  %v245_v60 = vld [vmem:[%s1240_s12 + $0x1e8] sm:$0xf] }
  0xac   : > { %v647_v15 = vsel %vm636_vm1, %v275_v36, -inf  ;;  %v646_v16 = vsel %vm636_vm1, %v272_v37, -inf  ;;  %v212_v37 = vld [vmem:[%s1240_s12 + $0x164] sm:$0xf] }
  0xad   : > { %v648_v28 = vmax.f32 %v646_v16, %v647_v15  ;;  %v519_v46 = vsel %vm251_vm0, %v212_v37, -inf }
  0xae   : > { %490 = vmax.xlane.f32.xlu1 %v489_v38  ;;  %487 = vmax.xlane.f32.xlu0 %v486_v39 }
  0xaf   : > { %v281_v42 = vpop.xlane.xlu1 %280  ;;  %v278_v43 = vpop.xlane.xlu0 %277  ;;  %v838_v41 = vsel %vm636_vm1, %v648_v28, -inf }
  0xb0   : > { %v650_v49 = vsel %vm636_vm1, %v281_v42, -inf  ;;  %v649_v51 = vsel %vm636_vm1, %v278_v43, -inf }
  0xb1   : > { %v651_v1 = vmax.f32 %v649_v51, %v650_v49  ;;  %v219_v49 = vld [vmem:[%s1240_s12 + $0x180] sm:$0xf] }
  0xb2   : > { %496 = vmax.xlane.f32.xlu1 %v495_v44  ;;  %493 = vmax.xlane.f32.xlu0 %v492_v45 }
  0xb3   : > { %v287_v54 = vpop.xlane.xlu1 %286  ;;  %v284_v55 = vpop.xlane.xlu0 %283  ;;  %v830_v20 = vsel %vm636_vm1, %v651_v1, -inf  ;;  %v227_v1 = vld [vmem:[%s1240_s12 + $0x1a0] sm:$0xf] }
  0xb4   : > { %v653_v61 = vsel %vm636_vm1, %v287_v54, -inf  ;;  %v652_v62 = vsel %vm636_vm1, %v284_v55, -inf  ;;  %v831_v33 = vmax.f32 %v829_v26, %v830_v20  ;;  %v564_v5 = vsel %vm251_vm0, %v227_v1, -inf  ;;  %v237_v26 = vld [vmem:[%s1240_s12 + $0x1c8] sm:$0xf] }
  0xb5   : > { %v654_v2 = vmax.f32 %v652_v62, %v653_v61  ;;  %v244_v1 = vld [vmem:[%s1240_s12 + $0x1e4] sm:$0xf] }
  0xb6   : > { %502 = vmax.xlane.f32.xlu1 %v501_v56  ;;  %499 = vmax.xlane.f32.xlu0 %v498_v57  ;;  %v962_v47 = vrot.slane %v831_v33, %v1433_v22  ;;  %v540_v56 = vsel %vm251_vm0, %v219_v49, -inf  ;;  %v525_v57 = vsel %vm251_vm0, %v214_v50, -inf }
  0xb7   : > { %v833_v9 = vsel %vm636_vm1, %v654_v2, -inf  ;;  %v293_v10 = vpop.xlane.xlu1 %292  ;;  %v290_v11 = vpop.xlane.xlu0 %289  ;;  %v222_v2 = vld [vmem:[%s1240_s12 + $0x18c] sm:$0xf] }
  0xb8   : > { %v656_v17 = vsel %vm636_vm1, %v293_v10, -inf  ;;  %v655_v18 = vsel %vm636_vm1, %v290_v11, -inf  ;;  %v834_v23 = vmax.f32 %v832_v19, %v833_v9  ;;  %v570_v11 = vsel %vm251_vm0, %v229_v7, -inf }
  0xb9   : > { %v657_v21 = vmax.f32 %v655_v18, %v656_v17 }
  0xba   : > { %508 = vmax.xlane.f32.xlu1 %v507_v6  ;;  %505 = vmax.xlane.f32.xlu0 %v504_v12  ;;  %v966_v39 = vrot.slane %v834_v23, %v1433_v22  ;;  %v549_v6 = vsel %vm251_vm0, %v222_v2, -inf  ;;  %v567_v12 = vsel %vm251_vm0, %v228_v8, -inf }
  0xbb   : > { %v836_v29 = vsel %vm636_vm1, %v657_v21, -inf  ;;  %v299_v30 = vpop.xlane.xlu1 %298  ;;  %v296_v31 = vpop.xlane.xlu0 %295 }
  0xbc   : > { %v837_v34 = vmax.f32 %v835_v27, %v836_v29  ;;  %v659_v35 = vsel %vm636_vm1, %v299_v30, -inf  ;;  %v658_v36 = vsel %vm636_vm1, %v296_v31, -inf  ;;  %v1088_v51 = vsel %vm1087_vm2, %v966_v39, %v962_v47  ;;  %v236_v31 = vld [vmem:[%s1240_s12 + $0x1c4] sm:$0xf] }
  0xbd   : > { %v660_v38 = vmax.f32 %v658_v36, %v659_v35  ;;  %v594_v35 = vsel %vm251_vm0, %v237_v26, -inf }
  0xbe   : > { %517 = vmax.xlane.f32.xlu1 %v516_v24  ;;  %511 = vmax.xlane.f32.xlu0 %v510_v25  ;;  %v970_v42 = vrot.slane %v837_v34, %v1433_v22  ;;  %v588_v24 = vsel %vm251_vm0, %v235_v13, -inf  ;;  %v573_v25 = vsel %vm251_vm0, %v230_v14, -inf  ;;  %v215_v13 = vld [vmem:[%s1240_s12 + $0x170] sm:$0xf]  ;;  %v246_v14 = vld [vmem:[%s1240_s12 + $0x1ec] sm:$0xf] }
  0xbf   : > { %v839_v43 = vsel %vm636_vm1, %v660_v38, -inf  ;;  %v305_v44 = vpop.xlane.xlu1 %304  ;;  %v302_v45 = vpop.xlane.xlu0 %301 }
  0xc0   : > { %v840_v48 = vmax.f32 %v838_v41, %v839_v43  ;;  %v1090_v53 = vsel %vm1089_vm3, %v970_v42, %v1088_v51  ;;  %v662_v19 = vsel %vm636_vm1, %v305_v44, -inf  ;;  %v661_v20 = vsel %vm636_vm1, %v302_v45, -inf  ;;  %v243_v42 = vld [vmem:[%s1240_s12 + $0x1e0] sm:$0xf]  ;;  %v238_v43 = vld [vmem:[%s1240_s12 + $0x1cc] sm:$0xf] }
  0xc1   : > { %v663_v36 = vmax.f32 %v661_v20, %v662_v19  ;;  %v591_v41 = vsel %vm251_vm0, %v236_v31, -inf  ;;  %v528_v20 = vsel %vm251_vm0, %v215_v13, -inf  ;;  %v224_v31 = vld [vmem:[%s1240_s12 + $0x194] sm:$0xf] }
  0xc2   : > { %v974_v52 = vrot.slane %v840_v48, %v1433_v22  ;;  %523 = vmax.xlane.f32.xlu1 %v522_v40  ;;  %520 = vmax.xlane.f32.xlu0 %v519_v46 }
  0xc3   : > { %v311_v54 = vpop.xlane.xlu1 %310  ;;  %v308_v55 = vpop.xlane.xlu0 %307 }
  0xc4   : > { %v1092_v58 = vsel %vm1091_vm4, %v974_v52, %v1090_v53  ;;  %v665_v15 = vsel %vm636_vm1, %v311_v54, -inf  ;;  %v664_v16 = vsel %vm636_vm1, %v308_v55, -inf  ;;  %v612_v52 = vsel %vm251_vm0, %v243_v42, -inf  ;;  %v247_v42 = vld [vmem:[%s1240_s12 + $0x1f0] sm:$0xf] }
  0xc5   : > { %1123 = vst.msk [vmem:[%s1458_s16] sm:$0xf] %vm1122_vm5, %v1092_v58  ;;  %v666_v32 = vmax.f32 %v664_v16, %v665_v15  ;;  %v597_v53 = vsel %vm251_vm0, %v238_v43, -inf  ;;  %v841_v54 = vsel %vm636_vm1, %v663_v36, -inf  ;;  %v239_v36 = vld [vmem:[%s1240_s12 + $0x1d0] sm:$0xf] }
  0xc6   : > { %541 = vmax.xlane.f32.xlu1 %v540_v56  ;;  %526 = vmax.xlane.f32.xlu0 %v525_v57  ;;  %v240_v43 = vld [vmem:[%s1240_s12 + $0x1d4] sm:$0xf] }
  0xc7   : > { %v317_v61 = vpop.xlane.xlu1 %316  ;;  %v314_v62 = vpop.xlane.xlu0 %313  ;;  %v844_v48 = vsel %vm636_vm1, %v666_v32, -inf }
  0xc8   : > { %v668_v27 = vsel %vm636_vm1, %v317_v61, -inf  ;;  %v667_v28 = vsel %vm636_vm1, %v314_v62, -inf }
  0xc9   : > { %v669_v37 = vmax.f32 %v667_v28, %v668_v27 }
  0xca   : > { %547 = vmax.xlane.f32.xlu1 %v546_v63  ;;  %544 = vmax.xlane.f32.xlu0 %v543_v0 }
  0xcb   : > { %v323_v3 = vpop.xlane.xlu1 %322  ;;  %v320_v4 = vpop.xlane.xlu0 %319  ;;  %v847_v55 = vsel %vm636_vm1, %v669_v37, -inf  ;;  %v232_v37 = vld [vmem:[%s1240_s12 + $0x1b4] sm:$0xf] }
  0xcc   : > { %v671_v44 = vsel %vm636_vm1, %v323_v3, -inf  ;;  %v670_v45 = vsel %vm636_vm1, %v320_v4, -inf  ;;  %v618_v4 = vsel %vm251_vm0, %v245_v60, -inf }
  0xcd   : > { %v672_v56 = vmax.f32 %v670_v45, %v671_v44 }
  0xce   : > { %565 = vmax.xlane.f32.xlu1 %v564_v5  ;;  %550 = vmax.xlane.f32.xlu0 %v549_v6 }
  0xcf   : > { %v329_v9 = vpop.xlane.xlu1 %328  ;;  %v326_v10 = vpop.xlane.xlu0 %325  ;;  %v850_v5 = vsel %vm636_vm1, %v672_v56, -inf }
  0xd0   : > { %v674_v17 = vsel %vm636_vm1, %v329_v9, -inf  ;;  %v673_v18 = vsel %vm636_vm1, %v326_v10, -inf  ;;  %v615_v10 = vsel %vm251_vm0, %v244_v1, -inf }
  0xd1   : > { %v675_v33 = vmax.f32 %v673_v18, %v674_v17 }
  0xd2   : > { %571 = vmax.xlane.f32.xlu1 %v570_v11  ;;  %568 = vmax.xlane.f32.xlu0 %v567_v12 }
  0xd3   : > { %v335_v21 = vpop.xlane.xlu1 %334  ;;  %v332_v23 = vpop.xlane.xlu0 %331  ;;  %v842_v49 = vsel %vm636_vm1, %v675_v33, -inf }
  0xd4   : > { %v677_v29 = vsel %vm636_vm1, %v335_v21, -inf  ;;  %v676_v30 = vsel %vm636_vm1, %v332_v23, -inf  ;;  %v843_v61 = vmax.f32 %v841_v54, %v842_v49  ;;  %v621_v21 = vsel %vm251_vm0, %v246_v14, -inf  ;;  %v210_v54 = vld [vmem:[%s1240_s12 + $0x15c] sm:$0xf] }
  0xd5   : > { %v678_v34 = vmax.f32 %v676_v30, %v677_v29  ;;  %v231_v30 = vld [vmem:[%s1240_s12 + $0x1b0] sm:$0xf] }
  0xd6   : > { %589 = vmax.xlane.f32.xlu1 %v588_v24  ;;  %574 = vmax.xlane.f32.xlu0 %v573_v25  ;;  %v978_v11 = vrot.slane %v843_v61, %v1433_v22  ;;  %v223_v24 = vld [vmem:[%s1240_s12 + $0x190] sm:$0xf]  ;;  %v216_v25 = vld [vmem:[%s1240_s12 + $0x174] sm:$0xf] }
  0xd7   : > { %v845_v38 = vsel %vm636_vm1, %v678_v34, -inf  ;;  %v341_v39 = vpop.xlane.xlu1 %340  ;;  %v338_v40 = vpop.xlane.xlu0 %337  ;;  %v552_v28 = vsel %vm251_vm0, %v223_v24, -inf  ;;  %v531_v29 = vsel %vm251_vm0, %v216_v25, -inf  ;;  %v576_v34 = vsel %vm251_vm0, %v231_v30, -inf  ;;  %v226_v25 = vld [vmem:[%s1240_s12 + $0x19c] sm:$0xf] }
  0xd8   : > { %v680_v46 = vsel %vm636_vm1, %v341_v39, -inf  ;;  %v679_v47 = vsel %vm636_vm1, %v338_v40, -inf  ;;  %v846_v51 = vmax.f32 %v844_v48, %v845_v38  ;;  %v600_v40 = vsel %vm251_vm0, %v239_v36, -inf  ;;  %v225_v30 = vld [vmem:[%s1240_s12 + $0x198] sm:$0xf] }
  0xd9   : > { %v681_v50 = vmax.f32 %v679_v47, %v680_v46 }
  0xda   : > { %595 = vmax.xlane.f32.xlu1 %v594_v35  ;;  %592 = vmax.xlane.f32.xlu0 %v591_v41  ;;  %v982_v3 = vrot.slane %v846_v51, %v1433_v22  ;;  %v555_v35 = vsel %vm251_vm0, %v224_v31, -inf  ;;  %v579_v41 = vsel %vm251_vm0, %v232_v37, -inf }
  0xdb   : > { %v848_v57 = vsel %vm636_vm1, %v681_v50, -inf  ;;  %v347_v58 = vpop.xlane.xlu1 %346  ;;  %v344_v59 = vpop.xlane.xlu0 %343 }
  0xdc   : > { %v849_v62 = vmax.f32 %v847_v55, %v848_v57  ;;  %v683_v63 = vsel %vm636_vm1, %v347_v58, -inf  ;;  %v682_v0 = vsel %vm636_vm1, %v344_v59, -inf  ;;  %v1093_v15 = vsel %vm1087_vm2, %v982_v3, %v978_v11  ;;  %v248_v59 = vld [vmem:[%s1240_s12 + $0x1f4] sm:$0xf] }
  0xdd   : > { %v684_v2 = vmax.f32 %v682_v0, %v683_v63  ;;  %v513_v63 = vsel %vm251_vm0, %v210_v54, -inf }
  0xde   : > { %613 = vmax.xlane.f32.xlu1 %v612_v52  ;;  %598 = vmax.xlane.f32.xlu0 %v597_v53  ;;  %v986_v6 = vrot.slane %v849_v62, %v1433_v22  ;;  %v624_v52 = vsel %vm251_vm0, %v247_v42, -inf  ;;  %v603_v53 = vsel %vm251_vm0, %v240_v43, -inf  ;;  %v234_v42 = vld [vmem:[%s1240_s12 + $0x1bc] sm:$0xf]  ;;  %v233_v43 = vld [vmem:[%s1240_s12 + $0x1b8] sm:$0xf] }
  0xdf   : > { %v851_v7 = vsel %vm636_vm1, %v684_v2, -inf  ;;  %v353_v8 = vpop.xlane.xlu1 %352  ;;  %v350_v9 = vpop.xlane.xlu0 %349 }
  0xe0   : > { %v852_v12 = vmax.f32 %v850_v5, %v851_v7  ;;  %v1094_v17 = vsel %vm1089_vm3, %v986_v6, %v1093_v15  ;;  %v686_v48 = vsel %vm636_vm1, %v353_v8, -inf  ;;  %v685_v49 = vsel %vm636_vm1, %v350_v9, -inf  ;;  %v218_v6 = vld [vmem:[%s1240_s12 + $0x17c] sm:$0xf]  ;;  %v217_v7 = vld [vmem:[%s1240_s12 + $0x178] sm:$0xf] }
  0xe1   : > { %v687_v0 = vmax.f32 %v685_v49, %v686_v48  ;;  %v627_v5 = vsel %vm251_vm0, %v248_v59, -inf  ;;  %v585_v49 = vsel %vm251_vm0, %v234_v42, -inf  ;;  %v249_v59 = vld [vmem:[%s1240_s12 + $0x1f8] sm:$0xf] }
  0xe2   : > { %v990_v16 = vrot.slane %v852_v12, %v1433_v22  ;;  %619 = vmax.xlane.f32.xlu1 %v618_v4  ;;  %616 = vmax.xlane.f32.xlu0 %v615_v10 }
  0xe3   : > { %v359_v18 = vpop.xlane.xlu1 %358  ;;  %v356_v19 = vpop.xlane.xlu0 %355 }
  0xe4   : > { %v1095_v23 = vsel %vm1091_vm4, %v990_v16, %v1094_v17  ;;  %v689_v44 = vsel %vm636_vm1, %v359_v18, -inf  ;;  %v688_v45 = vsel %vm636_vm1, %v356_v19, -inf  ;;  %v537_v16 = vsel %vm251_vm0, %v218_v6, -inf }
  0xe5   : > { %1124 = vst.msk [vmem:[%s1458_s16 + $0x4] sm:$0xf] %vm1122_vm5, %v1095_v23  ;;  %v690_v60 = vmax.f32 %v688_v45, %v689_v44  ;;  %v534_v17 = vsel %vm251_vm0, %v217_v7, -inf  ;;  %v853_v18 = vsel %vm636_vm1, %v687_v0, -inf }
  0xe6   : > { %529 = vmax.xlane.f32.xlu1 %v528_v20  ;;  %622 = vmax.xlane.f32.xlu0 %v621_v21 }
  0xe7   : > { %v365_v26 = vpop.xlane.xlu1 %364  ;;  %v362_v27 = vpop.xlane.xlu0 %361  ;;  %v856_v12 = vsel %vm636_vm1, %v690_v60, -inf }
  0xe8   : > { %v692_v55 = vsel %vm636_vm1, %v365_v26, -inf  ;;  %v691_v56 = vsel %vm636_vm1, %v362_v27, -inf }
  0xe9   : > { %v693_v1 = vmax.f32 %v691_v56, %v692_v55 }
  0xea   : > { %553 = vmax.xlane.f32.xlu1 %v552_v28  ;;  %532 = vmax.xlane.f32.xlu0 %v531_v29 }
  0xeb   : > { %v371_v32 = vpop.xlane.xlu1 %370  ;;  %v368_v33 = vpop.xlane.xlu0 %367  ;;  %v859_v19 = vsel %vm636_vm1, %v693_v1, -inf }
  0xec   : > { %v695_v8 = vsel %vm636_vm1, %v371_v32, -inf  ;;  %v694_v9 = vsel %vm636_vm1, %v368_v33, -inf  ;;  %v561_v33 = vsel %vm251_vm0, %v226_v25, -inf }
  0xed   : > { %v696_v20 = vmax.f32 %v694_v9, %v695_v8 }
  0xee   : > { %577 = vmax.xlane.f32.xlu1 %v576_v34  ;;  %556 = vmax.xlane.f32.xlu0 %v555_v35 }
  0xef   : > { %v377_v38 = vpop.xlane.xlu1 %376  ;;  %v374_v39 = vpop.xlane.xlu0 %373  ;;  %v862_v34 = vsel %vm636_vm1, %v696_v20, -inf }
  0xf0   : > { %v698_v46 = vsel %vm636_vm1, %v377_v38, -inf  ;;  %v697_v47 = vsel %vm636_vm1, %v374_v39, -inf  ;;  %v558_v39 = vsel %vm251_vm0, %v225_v30, -inf }
  0xf1   : > { %v699_v61 = vmax.f32 %v697_v47, %v698_v46 }
  0xf2   : > { %601 = vmax.xlane.f32.xlu1 %v600_v40  ;;  %580 = vmax.xlane.f32.xlu0 %v579_v41 }
  0xf3   : > { %v383_v50 = vpop.xlane.xlu1 %382  ;;  %v380_v51 = vpop.xlane.xlu0 %379  ;;  %v854_v13 = vsel %vm636_vm1, %v699_v61, -inf }
  0xf4   : > { %v701_v57 = vsel %vm636_vm1, %v383_v50, -inf  ;;  %v700_v58 = vsel %vm636_vm1, %v380_v51, -inf  ;;  %v855_v26 = vmax.f32 %v853_v18, %v854_v13  ;;  %v582_v50 = vsel %vm251_vm0, %v233_v43, -inf }
  0xf5   : > { %v702_v62 = vmax.f32 %v700_v58, %v701_v57  ;;  %v250_v58 = vld [vmem:[%s1240_s12 + $0x1fc] sm:$0xf] }
  0xf6   : > { %625 = vmax.xlane.f32.xlu1 %v624_v52  ;;  %604 = vmax.xlane.f32.xlu0 %v603_v53  ;;  %v994_v40 = vrot.slane %v855_v26, %v1433_v22  ;;  %v242_v52 = vld [vmem:[%s1240_s12 + $0x1dc] sm:$0xf]  ;;  %v241_v53 = vld [vmem:[%s1240_s12 + $0x1d8] sm:$0xf] }
  0xf7   : > { %v857_v2 = vsel %vm636_vm1, %v702_v62, -inf  ;;  %v389_v3 = vpop.xlane.xlu1 %388  ;;  %v386_v4 = vpop.xlane.xlu0 %385  ;;  %v609_v56 = vsel %vm251_vm0, %v242_v52, -inf  ;;  %v606_v57 = vsel %vm251_vm0, %v241_v53, -inf  ;;  %v633_v62 = vsel %vm251_vm0, %v250_v58, -inf }
  0xf8   : > { %v704_v10 = vsel %vm636_vm1, %v389_v3, -inf  ;;  %v703_v11 = vsel %vm636_vm1, %v386_v4, -inf  ;;  %v858_v15 = vmax.f32 %v856_v12, %v857_v2 }
  0xf9   : > { %v705_v14 = vmax.f32 %v703_v11, %v704_v10 }
  0xfa   : > { %514 = vmax.xlane.f32.xlu1 %v513_v63  ;;  %628 = vmax.xlane.f32.xlu0 %v627_v5  ;;  %v998_v32 = vrot.slane %v858_v15, %v1433_v22  ;;  %v630_v63 = vsel %vm251_vm0, %v249_v59, -inf }
  0xfb   : > { %v860_v21 = vsel %vm636_vm1, %v705_v14, -inf  ;;  %v395_v23 = vpop.xlane.xlu1 %394  ;;  %v392_v24 = vpop.xlane.xlu0 %391 }
  0xfc   : > { %v861_v27 = vmax.f32 %v859_v19, %v860_v21  ;;  %v707_v28 = vsel %vm636_vm1, %v395_v23, -inf  ;;  %v706_v29 = vsel %vm636_vm1, %v392_v24, -inf  ;;  %v1096_v44 = vsel %vm1087_vm2, %v998_v32, %v994_v40 }
  0xfd   : > { %v708_v31 = vmax.f32 %v706_v29, %v707_v28 }
  0xfe   : > { %538 = vmax.xlane.f32.xlu1 %v537_v16  ;;  %535 = vmax.xlane.f32.xlu0 %v534_v17  ;;  %v1002_v35 = vrot.slane %v861_v27, %v1433_v22 }
  0xff   : > { %v863_v36 = vsel %vm636_vm1, %v708_v31, -inf  ;;  %v401_v37 = vpop.xlane.xlu1 %400  ;;  %v398_v38 = vpop.xlane.xlu0 %397 }
 0x100   : > { %v864_v41 = vmax.f32 %v862_v34, %v863_v36  ;;  %v1097_v46 = vsel %vm1089_vm3, %v1002_v35, %v1096_v44  ;;  %v710_v6 = vsel %vm636_vm1, %v401_v37, -inf  ;;  %v709_v7 = vsel %vm636_vm1, %v398_v38, -inf }
 0x101   : > { %v711_v17 = vmax.f32 %v709_v7, %v710_v6 }
 0x102   : > { %v1006_v45 = vrot.slane %v864_v41, %v1433_v22  ;;  %562 = vmax.xlane.f32.xlu1 %v561_v33  ;;  %559 = vmax.xlane.f32.xlu0 %v558_v39 }
 0x103   : > { %v407_v47 = vpop.xlane.xlu1 %406  ;;  %v404_v48 = vpop.xlane.xlu0 %403  ;;  %v865_v31 = vsel %vm636_vm1, %v711_v17, -inf }
 0x104   : > { %v1098_v51 = vsel %vm1091_vm4, %v1006_v45, %v1097_v46  ;;  %v713_v2 = vsel %vm636_vm1, %v407_v47, -inf  ;;  %v712_v3 = vsel %vm636_vm1, %v404_v48, -inf }
 0x105   : > { %1125 = vst.msk [vmem:[%s1458_s16 + $0x8] sm:$0xf] %vm1122_vm5, %v1098_v51  ;;  %v714_v14 = vmax.f32 %v712_v3, %v713_v2 }
 0x106   : > { %586 = vmax.xlane.f32.xlu1 %v585_v49  ;;  %583 = vmax.xlane.f32.xlu0 %v582_v50 }
 0x107   : > { %v413_v54 = vpop.xlane.xlu1 %412  ;;  %v410_v55 = vpop.xlane.xlu0 %409  ;;  %v868_v27 = vsel %vm636_vm1, %v714_v14, -inf }
 0x108   : > { %v716_v10 = vsel %vm636_vm1, %v413_v54, -inf  ;;  %v715_v11 = vsel %vm636_vm1, %v410_v55, -inf }
 0x109   : > { %v717_v18 = vmax.f32 %v715_v11, %v716_v10 }
 0x10a   : > { %610 = vmax.xlane.f32.xlu1 %v609_v56  ;;  %607 = vmax.xlane.f32.xlu0 %v606_v57 }
 0x10b   : > { %v419_v60 = vpop.xlane.xlu1 %418  ;;  %v416_v61 = vpop.xlane.xlu0 %415  ;;  %v871_v32 = vsel %vm636_vm1, %v717_v18, -inf }
 0x10c   : > { %v719_v23 = vsel %vm636_vm1, %v419_v60, -inf  ;;  %v718_v24 = vsel %vm636_vm1, %v416_v61, -inf }
 0x10d   : > { %v720_v33 = vmax.f32 %v718_v24, %v719_v23 }
 0x10e   : > { %634 = vmax.xlane.f32.xlu1 %v633_v62  ;;  %631 = vmax.xlane.f32.xlu0 %v630_v63 }
 0x10f   : > { %v425_v0 = vpop.xlane.xlu1 %424  ;;  %v422_v1 = vpop.xlane.xlu0 %421  ;;  %v874_v43 = vsel %vm636_vm1, %v720_v33, -inf }
 0x110   : > { %v722_v4 = vsel %vm636_vm1, %v425_v0, -inf  ;;  %v721_v5 = vsel %vm636_vm1, %v422_v1, -inf }
 0x111   : > { %v723_v15 = vmax.f32 %v721_v5, %v722_v4 }
 0x113   : > { %v431_v8 = vpop.xlane.xlu1 %430  ;;  %v428_v9 = vpop.xlane.xlu0 %427  ;;  %v866_v28 = vsel %vm636_vm1, %v723_v15, -inf }
 0x114   : > { %v725_v12 = vsel %vm636_vm1, %v431_v8, -inf  ;;  %v724_v13 = vsel %vm636_vm1, %v428_v9, -inf  ;;  %v867_v37 = vmax.f32 %v865_v31, %v866_v28 }
 0x115   : > { %v726_v16 = vmax.f32 %v724_v13, %v725_v12 }
 0x116   : > { %v1010_v48 = vrot.slane %v867_v37, %v1433_v22 }
 0x117   : > { %v869_v19 = vsel %vm636_vm1, %v726_v16, -inf  ;;  %v437_v20 = vpop.xlane.xlu1 %436  ;;  %v434_v21 = vpop.xlane.xlu0 %433 }
 0x118   : > { %v728_v25 = vsel %vm636_vm1, %v437_v20, -inf  ;;  %v727_v26 = vsel %vm636_vm1, %v434_v21, -inf  ;;  %v870_v30 = vmax.f32 %v868_v27, %v869_v19 }
 0x119   : > { %v729_v29 = vmax.f32 %v727_v26, %v728_v25 }
 0x11a   : > { %v1014_v42 = vrot.slane %v870_v30, %v1433_v22 }
 0x11b   : > { %v872_v34 = vsel %vm636_vm1, %v729_v29, -inf  ;;  %v443_v35 = vpop.xlane.xlu1 %442  ;;  %v440_v36 = vpop.xlane.xlu0 %439 }
 0x11c   : > { %v873_v38 = vmax.f32 %v871_v32, %v872_v34  ;;  %v731_v39 = vsel %vm636_vm1, %v443_v35, -inf  ;;  %v730_v40 = vsel %vm636_vm1, %v440_v36, -inf  ;;  %v1099_v50 = vsel %vm1087_vm2, %v1014_v42, %v1010_v48 }
 0x11d   : > { %v732_v41 = vmax.f32 %v730_v40, %v731_v39 }
 0x11e   : > { %v1018_v44 = vrot.slane %v873_v38, %v1433_v22 }
 0x11f   : > { %v875_v45 = vsel %vm636_vm1, %v732_v41, -inf  ;;  %v449_v46 = vpop.xlane.xlu1 %448  ;;  %v446_v47 = vpop.xlane.xlu0 %445 }
 0x120   : > { %v876_v49 = vmax.f32 %v874_v43, %v875_v45  ;;  %v1100_v52 = vsel %vm1089_vm3, %v1018_v44, %v1099_v50  ;;  %v734_v2 = vsel %vm636_vm1, %v449_v46, -inf  ;;  %v733_v3 = vsel %vm636_vm1, %v446_v47, -inf }
 0x121   : > { %v735_v13 = vmax.f32 %v733_v3, %v734_v2 }
 0x122   : > { %v1022_v51 = vrot.slane %v876_v49, %v1433_v22 }
 0x123   : > { %v455_v53 = vpop.xlane.xlu1 %454  ;;  %v452_v54 = vpop.xlane.xlu0 %451  ;;  %v877_v27 = vsel %vm636_vm1, %v735_v13, -inf }
 0x124   : > { %v1101_v55 = vsel %vm1091_vm4, %v1022_v51, %v1100_v52  ;;  %v737_v62 = vsel %vm636_vm1, %v455_v53, -inf  ;;  %v736_v63 = vsel %vm636_vm1, %v452_v54, -inf }
 0x125   : > { %1126 = vst.msk [vmem:[%s1458_s16 + $0xc] sm:$0xf] %vm1122_vm5, %v1101_v55  ;;  %v738_v10 = vmax.f32 %v736_v63, %v737_v62 }
 0x127   : > { %v461_v56 = vpop.xlane.xlu1 %460  ;;  %v458_v57 = vpop.xlane.xlu0 %457  ;;  %v880_v23 = vsel %vm636_vm1, %v738_v10, -inf }
 0x128   : > { %v740_v6 = vsel %vm636_vm1, %v461_v56, -inf  ;;  %v739_v7 = vsel %vm636_vm1, %v458_v57, -inf }
 0x129   : > { %v741_v14 = vmax.f32 %v739_v7, %v740_v6 }
 0x12b   : > { %v467_v58 = vpop.xlane.xlu1 %466  ;;  %v464_v59 = vpop.xlane.xlu0 %463  ;;  %v883_v28 = vsel %vm636_vm1, %v741_v14, -inf }
 0x12c   : > { %v743_v18 = vsel %vm636_vm1, %v467_v58, -inf  ;;  %v742_v19 = vsel %vm636_vm1, %v464_v59, -inf }
 0x12d   : > { %v744_v29 = vmax.f32 %v742_v19, %v743_v18 }
 0x12f   : > { %v473_v60 = vpop.xlane.xlu1 %472  ;;  %v470_v61 = vpop.xlane.xlu0 %469  ;;  %v886_v39 = vsel %vm636_vm1, %v744_v29, -inf }
 0x130   : > { %v746_v0 = vsel %vm636_vm1, %v473_v60, -inf  ;;  %v745_v1 = vsel %vm636_vm1, %v470_v61, -inf }
 0x131   : > { %v747_v11 = vmax.f32 %v745_v1, %v746_v0 }
 0x133   : > { %v479_v4 = vpop.xlane.xlu1 %478  ;;  %v476_v5 = vpop.xlane.xlu0 %475  ;;  %v878_v24 = vsel %vm636_vm1, %v747_v11, -inf }
 0x134   : > { %v749_v8 = vsel %vm636_vm1, %v479_v4, -inf  ;;  %v748_v9 = vsel %vm636_vm1, %v476_v5, -inf  ;;  %v879_v33 = vmax.f32 %v877_v27, %v878_v24 }
 0x135   : > { %v750_v12 = vmax.f32 %v748_v9, %v749_v8 }
 0x136   : > { %v1026_v44 = vrot.slane %v879_v33, %v1433_v22 }
 0x137   : > { %v881_v15 = vsel %vm636_vm1, %v750_v12, -inf  ;;  %v485_v16 = vpop.xlane.xlu1 %484  ;;  %v482_v17 = vpop.xlane.xlu0 %481 }
 0x138   : > { %v752_v20 = vsel %vm636_vm1, %v485_v16, -inf  ;;  %v751_v21 = vsel %vm636_vm1, %v482_v17, -inf  ;;  %v882_v26 = vmax.f32 %v880_v23, %v881_v15 }
 0x139   : > { %v753_v25 = vmax.f32 %v751_v21, %v752_v20 }
 0x13a   : > { %v1030_v38 = vrot.slane %v882_v26, %v1433_v22 }
 0x13b   : > { %v884_v30 = vsel %vm636_vm1, %v753_v25, -inf  ;;  %v491_v31 = vpop.xlane.xlu1 %490  ;;  %v488_v32 = vpop.xlane.xlu0 %487 }
 0x13c   : > { %v885_v34 = vmax.f32 %v883_v28, %v884_v30  ;;  %v755_v35 = vsel %vm636_vm1, %v491_v31, -inf  ;;  %v754_v36 = vsel %vm636_vm1, %v488_v32, -inf  ;;  %v1102_v49 = vsel %vm1087_vm2, %v1030_v38, %v1026_v44 }
 0x13d   : > { %v756_v37 = vmax.f32 %v754_v36, %v755_v35 }
 0x13e   : > { %v1034_v40 = vrot.slane %v885_v34, %v1433_v22 }
 0x13f   : > { %v887_v41 = vsel %vm636_vm1, %v756_v37, -inf  ;;  %v497_v42 = vpop.xlane.xlu1 %496  ;;  %v494_v43 = vpop.xlane.xlu0 %493 }
 0x140   : > { %v888_v45 = vmax.f32 %v886_v39, %v887_v41  ;;  %v758_v46 = vsel %vm636_vm1, %v497_v42, -inf  ;;  %v757_v47 = vsel %vm636_vm1, %v494_v43, -inf  ;;  %v1103_v51 = vsel %vm1089_vm3, %v1034_v40, %v1102_v49 }
 0x141   : > { %v759_v48 = vmax.f32 %v757_v47, %v758_v46 }
 0x142   : > { %v1038_v50 = vrot.slane %v888_v45, %v1433_v22 }
 0x143   : > { %v503_v52 = vpop.xlane.xlu1 %502  ;;  %v500_v53 = vpop.xlane.xlu0 %499  ;;  %v889_v11 = vsel %vm636_vm1, %v759_v48, -inf }
 0x144   : > { %v1104_v54 = vsel %vm1091_vm4, %v1038_v50, %v1103_v51  ;;  %v761_v55 = vsel %vm636_vm1, %v503_v52, -inf  ;;  %v760_v56 = vsel %vm636_vm1, %v500_v53, -inf }
 0x145   : > { %1127 = vst.msk [vmem:[%s1458_s16 + $0x10] sm:$0xf] %vm1122_vm5, %v1104_v54  ;;  %v762_v57 = vmax.f32 %v760_v56, %v761_v55 }
 0x147   : > { %v509_v58 = vpop.xlane.xlu1 %508  ;;  %v506_v59 = vpop.xlane.xlu0 %505  ;;  %v892_v14 = vsel %vm636_vm1, %v762_v57, -inf }
 0x148   : > { %v764_v60 = vsel %vm636_vm1, %v509_v58, -inf  ;;  %v763_v61 = vsel %vm636_vm1, %v506_v59, -inf }
 0x149   : > { %v765_v62 = vmax.f32 %v763_v61, %v764_v60 }
 0x14b   : > { %v518_v63 = vpop.xlane.xlu1 %517  ;;  %v1677_v0 = vpop.xlane.xlu0 %511  ;;  %v895_v42 = vsel %vm636_vm1, %v765_v62, -inf }
 0x14c   : > { %v769_v3 = vsel %vm636_vm1, %v518_v63, -inf }
 0x14f   : > { %v524_v1 = vpop.xlane.xlu1 %523  ;;  %v521_v2 = vpop.xlane.xlu0 %520 }
 0x150   : > { %v770_v4 = vsel %vm636_vm1, %v521_v2, -inf  ;;  %v772_v9 = vsel %vm636_vm1, %v524_v1, -inf }
 0x151   : > { %v771_v5 = vmax.f32 %v769_v3, %v770_v4 }
 0x153   : > { %v890_v6 = vsel %vm636_vm1, %v771_v5, -inf  ;;  %v542_v7 = vpop.xlane.xlu1 %541  ;;  %v527_v8 = vpop.xlane.xlu0 %526 }
 0x154   : > { %v773_v10 = vsel %vm636_vm1, %v527_v8, -inf  ;;  %v891_v13 = vmax.f32 %v889_v11, %v890_v6  ;;  %v781_v60 = vsel %vm636_vm1, %v542_v7, -inf  ;;  %v766_v6 = vsel %vm636_vm1, %v1677_v0, -inf }
 0x155   : > { %v774_v12 = vmax.f32 %v772_v9, %v773_v10 }
 0x156   : > { %v1042_v19 = vrot.slane %v891_v13, %v1433_v22 }
 0x157   : > { %v893_v15 = vsel %vm636_vm1, %v774_v12, -inf  ;;  %v548_v16 = vpop.xlane.xlu1 %547  ;;  %v545_v17 = vpop.xlane.xlu0 %544 }
 0x158   : > { %v894_v18 = vmax.f32 %v892_v14, %v893_v15  ;;  %v782_v55 = vsel %vm636_vm1, %v545_v17, -inf  ;;  %v784_v1 = vsel %vm636_vm1, %v548_v16, -inf }
 0x159   : > { %v783_v2 = vmax.f32 %v781_v60, %v782_v55 }
 0x15a   : > { %v1046_v20 = vrot.slane %v894_v18, %v1433_v22 }
 0x15b   : > { %v566_v21 = vpop.xlane.xlu1 %565  ;;  %v551_v23 = vpop.xlane.xlu0 %550  ;;  %v901_v14 = vsel %vm636_vm1, %v783_v2, -inf }
 0x15c   : > { %v1105_v24 = vsel %vm1087_vm2, %v1046_v20, %v1042_v19  ;;  %v793_v56 = vsel %vm636_vm1, %v566_v21, -inf  ;;  %v785_v57 = vsel %vm636_vm1, %v551_v23, -inf }
 0x15d   : > { %v786_v4 = vmax.f32 %v784_v1, %v785_v57 }
 0x15f   : > { %v572_v25 = vpop.xlane.xlu1 %571  ;;  %v569_v26 = vpop.xlane.xlu0 %568  ;;  %v904_v0 = vsel %vm636_vm1, %v786_v4, -inf }
 0x160   : > { %v794_v51 = vsel %vm636_vm1, %v569_v26, -inf  ;;  %v796_v58 = vsel %vm636_vm1, %v572_v25, -inf }
 0x161   : > { %v795_v59 = vmax.f32 %v793_v56, %v794_v51 }
 0x163   : > { %v590_v27 = vpop.xlane.xlu1 %589  ;;  %v575_v28 = vpop.xlane.xlu0 %574  ;;  %v902_v8 = vsel %vm636_vm1, %v795_v59, -inf }
 0x164   : > { %v797_v54 = vsel %vm636_vm1, %v575_v28, -inf  ;;  %v903_v18 = vmax.f32 %v901_v14, %v902_v8  ;;  %v805_v21 = vsel %vm636_vm1, %v590_v27, -inf }
 0x165   : > { %v798_v61 = vmax.f32 %v796_v58, %v797_v54 }
 0x167   : > { %v596_v29 = vpop.xlane.xlu1 %595  ;;  %v593_v30 = vpop.xlane.xlu0 %592  ;;  %v905_v9 = vsel %vm636_vm1, %v798_v61, -inf }
 0x168   : > { %v906_v23 = vmax.f32 %v904_v0, %v905_v9  ;;  %v806_v26 = vsel %vm636_vm1, %v593_v30, -inf }
 0x16a   : > { %v1062_v61 = vrot.slane %v906_v23, %v1433_v22 }
 0x16b   : > { %v1690_v31 = vpop.xlane.xlu1 %613  ;;  %v1692_v32 = vpop.xlane.xlu0 %598 }
 0x16c   : > { %v809_v30 = vsel %vm636_vm1, %v1692_v32, -inf }
 0x16f   : > { %v1694_v33 = vpop.xlane.xlu1 %619  ;;  %v1696_v34 = vpop.xlane.xlu0 %616 }
 0x173   : > { %v530_v35 = vpop.xlane.xlu1 %529  ;;  %v623_v36 = vpop.xlane.xlu0 %622 }
 0x174   : > { %v775_v39 = vsel %vm636_vm1, %v530_v35, -inf  ;;  %v821_v28 = vsel %vm636_vm1, %v623_v36, -inf  ;;  %v820_v36 = vsel %vm636_vm1, %v1694_v33, -inf }
 0x177   : > { %v554_v37 = vpop.xlane.xlu1 %553  ;;  %v533_v38 = vpop.xlane.xlu0 %532 }
 0x178   : > { %v776_v40 = vsel %vm636_vm1, %v533_v38, -inf  ;;  %v787_v19 = vsel %vm636_vm1, %v554_v37, -inf }
 0x179   : > { %v777_v41 = vmax.f32 %v775_v39, %v776_v40 }
 0x17b   : > { %v896_v43 = vsel %vm636_vm1, %v777_v41, -inf  ;;  %v578_v44 = vpop.xlane.xlu1 %577  ;;  %v557_v45 = vpop.xlane.xlu0 %556 }
 0x17c   : > { %v897_v46 = vmax.f32 %v895_v42, %v896_v43  ;;  %v799_v7 = vsel %vm636_vm1, %v578_v44, -inf  ;;  %v788_v10 = vsel %vm636_vm1, %v557_v45, -inf  ;;  %v818_v44 = vsel %vm636_vm1, %v1696_v34, -inf }
 0x17d   : > { %v789_v25 = vmax.f32 %v787_v19, %v788_v10  ;;  %v822_v45 = vmax.f32 %v820_v36, %v821_v28 }
 0x17e   : > { %v1050_v47 = vrot.slane %v897_v46, %v1433_v22 }
 0x17f   : > { %v1703_v48 = vpop.xlane.xlu1 %601  ;;  %v581_v49 = vpop.xlane.xlu0 %580  ;;  %v907_v46 = vsel %vm636_vm1, %v789_v25, -inf }
 0x180   : > { %v1706_v50 = vsel %vm1089_vm3, %v1050_v47, %v1105_v24  ;;  %v800_v5 = vsel %vm636_vm1, %v581_v49, -inf  ;;  %v808_v24 = vsel %vm636_vm1, %v596_v29, -inf  ;;  %v817_v29 = vsel %vm636_vm1, %v1690_v31, -inf }
 0x181   : > { %v801_v15 = vmax.f32 %v799_v7, %v800_v5  ;;  %v810_v58 = vmax.f32 %v808_v24, %v809_v30  ;;  %v819_v59 = vmax.f32 %v817_v29, %v818_v44  ;;  %v811_v60 = vsel %vm636_vm1, %v1703_v48, -inf }
 0x183   : > { %v626_v52 = vpop.xlane.xlu1 %625  ;;  %v605_v53 = vpop.xlane.xlu0 %604  ;;  %v908_v41 = vsel %vm636_vm1, %v801_v15, -inf  ;;  %v916_v7 = vsel %vm636_vm1, %v810_v58, -inf  ;;  %v914_v10 = vsel %vm636_vm1, %v819_v59, -inf }
 0x184   : > { %v909_v49 = vmax.f32 %v907_v46, %v908_v41  ;;  %v823_v31 = vsel %vm636_vm1, %v626_v52, -inf  ;;  %v812_v51 = vsel %vm636_vm1, %v605_v53, -inf  ;;  %v1058_v53 = vrot.slane %v903_v18, %v1433_v22 }
 0x186   : > { %v1066_v1 = vrot.slane %v909_v49, %v1433_v22 }
 0x187   : > { %v515_v62 = vpop.xlane.xlu1 %514  ;;  %v629_v63 = vpop.xlane.xlu0 %628 }
 0x188   : > { %v767_v3 = vsel %vm636_vm1, %v515_v62, -inf  ;;  %v824_v43 = vsel %vm636_vm1, %v629_v63, -inf  ;;  %v807_v62 = vmax.f32 %v805_v21, %v806_v26  ;;  %v813_v63 = vmax.f32 %v811_v60, %v812_v51 }
 0x189   : > { %v768_v11 = vmax.f32 %v766_v6, %v767_v3  ;;  %v825_v33 = vmax.f32 %v823_v31, %v824_v43 }
 0x18a   : > { %v913_v15 = vsel %vm636_vm1, %v807_v62, -inf }
 0x18b   : > { %v539_v12 = vpop.xlane.xlu1 %538  ;;  %v536_v13 = vpop.xlane.xlu0 %535  ;;  %v898_v35 = vsel %vm636_vm1, %v768_v11, -inf  ;;  %v920_v48 = vsel %vm636_vm1, %v825_v33, -inf  ;;  %v1108_v11 = vsel %vm1087_vm2, %v1062_v61, %v1058_v53 }
 0x18c   : > { %v779_v16 = vsel %vm636_vm1, %v539_v12, -inf  ;;  %v778_v17 = vsel %vm636_vm1, %v536_v13, -inf  ;;  %v919_v13 = vsel %vm636_vm1, %v813_v63, -inf }
 0x18d   : > { %v780_v20 = vmax.f32 %v778_v17, %v779_v16  ;;  %v1109_v16 = vsel %vm1089_vm3, %v1066_v1, %v1108_v11  ;;  %v921_v17 = vmax.f32 %v919_v13, %v920_v48 }
 0x18f   : > { %v899_v38 = vsel %vm636_vm1, %v780_v20, -inf  ;;  %v563_v39 = vpop.xlane.xlu1 %562  ;;  %v560_v40 = vpop.xlane.xlu0 %559  ;;  %v915_v20 = vmax.f32 %v913_v15, %v914_v10  ;;  %v1082_v28 = vrot.slane %v921_v17, %v1433_v22 }
 0x190   : > { %v900_v37 = vmax.f32 %v898_v35, %v899_v38  ;;  %v791_v42 = vsel %vm636_vm1, %v563_v39, -inf  ;;  %v790_v27 = vsel %vm636_vm1, %v560_v40, -inf }
 0x191   : > { %v792_v32 = vmax.f32 %v790_v27, %v791_v42  ;;  %v1074_v39 = vrot.slane %v915_v20, %v1433_v22 }
 0x192   : > { %v1054_v47 = vrot.slane %v900_v37, %v1433_v22 }
 0x193   : > { %v587_v54 = vpop.xlane.xlu1 %586  ;;  %v584_v55 = vpop.xlane.xlu0 %583  ;;  %v910_v2 = vsel %vm636_vm1, %v792_v32, -inf }
 0x194   : > { %v1107_v56 = vsel %vm1091_vm4, %v1054_v47, %v1706_v50  ;;  %v803_v34 = vsel %vm636_vm1, %v587_v54, -inf  ;;  %v802_v57 = vsel %vm636_vm1, %v584_v55, -inf  ;;  %v917_v50 = vsel %vm636_vm1, %v822_v45, -inf }
 0x195   : > { %1128 = vst.msk [vmem:[%s1458_s16 + $0x14] sm:$0xf] %vm1122_vm5, %v1107_v56  ;;  %v804_v52 = vmax.f32 %v802_v57, %v803_v34  ;;  %v918_v12 = vmax.f32 %v916_v7, %v917_v50 }
 0x197   : > { %v911_v3 = vsel %vm636_vm1, %v804_v52, -inf  ;;  %v611_v4 = vpop.xlane.xlu1 %610  ;;  %v608_v5 = vpop.xlane.xlu0 %607  ;;  %v1078_v26 = vrot.slane %v918_v12, %v1433_v22 }
 0x198   : > { %v912_v6 = vmax.f32 %v910_v2, %v911_v3  ;;  %v815_v8 = vsel %vm636_vm1, %v611_v4, -inf  ;;  %v814_v9 = vsel %vm636_vm1, %v608_v5, -inf }
 0x199   : > { %v816_v0 = vmax.f32 %v814_v9, %v815_v8  ;;  %v1111_v41 = vsel %vm1087_vm2, %v1078_v26, %v1074_v39 }
 0x19a   : > { %v1070_v14 = vrot.slane %v912_v6, %v1433_v22  ;;  %v1112_v42 = vsel %vm1089_vm3, %v1082_v28, %v1111_v41 }
 0x19b   : > { %v635_v18 = vpop.xlane.xlu1 %634  ;;  %v632_v19 = vpop.xlane.xlu0 %631  ;;  %v922_v35 = vsel %vm636_vm1, %v816_v0, -inf }
 0x19c   : > { %v1110_v21 = vsel %vm1091_vm4, %v1070_v14, %v1109_v16  ;;  %v827_v23 = vsel %vm636_vm1, %v635_v18, -inf  ;;  %v826_v24 = vsel %vm636_vm1, %v632_v19, -inf }
 0x19d   : > { %1129 = vst.msk [vmem:[%s1458_s16 + $0x18] sm:$0xf] %vm1122_vm5, %v1110_v21  ;;  %v828_v25 = vmax.f32 %v826_v24, %v827_v23 }
 0x19f   : > { %v923_v38 = vsel %vm636_vm1, %v828_v25, -inf }
 0x1a0   : > { %v924_v40 = vmax.f32 %v922_v35, %v923_v38 }
 0x1a2   : > { %v1086_v37 = vrot.slane %v924_v40, %v1433_v22 }
 0x1a4   : > { %v1113_v27 = vsel %vm1091_vm4, %v1086_v37, %v1112_v42 }
 0x1a5   : > { %1130 = vst.msk [vmem:[%s1458_s16 + $0x1c] sm:$0xf] %vm1122_vm5, %v1113_v27 }
 0x1a6 PF: > { %s11_s6 = sadd.s32 1, %s1214_s6  }
 0x1a7   : > { %p8_p4 = scmp.ge.s32.totalorder %s11_s6, 6  }
 0x1a9   :  { %10 = sbr.rel (!%p8_p4) target bundleno = 1 (0x1), region = 54 }

// kernel: convd_forward.4
= control target key start
LH: loop header
LB: loop body
LE: loop exit
PB: predicated region body
PF: predicated region fallthrough
CT: control target
= control target key end

     0   :  { %s1343_s18 = smov 0   ;;  %s1345_s19 = smov 0   ;;  %s1558_s0 = inlined_call_operand.vmem [shape: bf16[2,4,256], index: 0, kind: input, shape index: {}]   ;;  %s1559_s1 = inlined_call_operand.vmem [shape: bf16[4,2,108], index: 1, kind: input, shape index: {}]   ;;  %s1560_s2 = inlined_call_operand.vmem [shape: f32[4,2,1], index: 2, kind: input, shape index: {}]   ;;  %s1561_s3 = inlined_call_operand.vmem [shape: f32[4,2,1], index: 3, kind: input, shape index: {}]   ;;  %s1562_s4 = inlined_call_operand.vmem [shape: f32[1,144], index: 4, kind: input, shape index: {}]   ;;  %s1563_s5 = inlined_call_operand.vmem [shape: bf16[2,4,2,256], index: 5, kind: output, shape index: {}]  }
   0x1   :  { %s1347_s20 = smov 0   ;;  %s1349_s21 = smov 0  }
   0x2   :  { %s1351_s22 = smov 0  }
   0x3 LB: > { %s24_s23 = sadd.s32 1, %s1274_s20  ;;  %s27_s24 = sadd.s32 1, %s1278_s21  ;;  %s1282_s22 = sphi %s1351_s22, %s15_s22   ;;  %s1278_s21 = sphi %s1349_s21, %s1571_s21   ;;  %s1274_s20 = sphi %s1347_s20, %s1570_s20   ;;  %s1270_s19 = sphi %s1345_s19, %s1569_s19   ;;  %s1266_s18 = sphi %s1343_s18, %s1568_s18  }
   0x4   : > { %p25_p0 = scmp.ge.s32.totalorder %s24_s23, 4  ;;  %p1096_p1 = scmp.ge.s32.totalorder %s1282_s22, 1 }
   0x5   : > { %p227_p2 = scmp.lt.s32.totalorder %s1282_s22, 9 }
   0x6   : > { %s1573_s23 = smov (%p25_p0, %s24_s23), 0  ;;  %s1575_s24 = smov (!%p25_p0, %s27_s24), %s1278_s21 }
   0x7   : > { %p228_p3 = pnand %p1096_p1, %p227_p2  ;;  %p29_p4 = scmp.ge.s32.totalorder %s1575_s24, 2 }
   0x8   : > { %p269_p5 = scmp.lt.s32.totalorder (!%p228_p3), %s1270_s19, 1  ;;  %v314_v0 = vlaneseq (!%p228_p3)  ;;  %v1284_v1 = vmov (!%p228_p3), 1983009808   ;;  %vm304_vm0 = vcmask (!%p228_p3), 1041408   ;;  %vm305_vm1 = vcmask (!%p228_p3), 128004   ;;  %s1285_s29 = smov (!%p228_p3), 121  }
   0x9   : > { %s1577_s24 = smov (%p29_p4, %s1575_s24), 0  ;;  %231 = sbr.rel (%p228_p3) target bundleno = 889 (0x379), region = 40 }
   0xa   : > { %v312_v2 = vunpack.c.l.s4 (!%p228_p3), %v1284_v1  ;;  %v1377_v3 = vshrl.u32 (!%p228_p3), %v314_v0, 7  ;;  %vm1392_vm2 = vmor (!%p228_p3), %vm305_vm1, %vm304_vm0  ;;  %s1286_s30 = smov (!%p228_p3), 126   ;;  %s1287_s6 = smov (!%p228_p3), 116   ;;  %v1311_v34 = vmov (!%p228_p3), 0   ;;  %vm373_vm3 = vcmask (!%p228_p3), 990208  }
   0xb   : > { %s1288_s7 = smov (!%p228_p3), 127   ;;  %s1289_s8 = smov (!%p228_p3), 122   ;;  %866 = vmatprep.mubr.bf16.mxu0 (!%p228_p3), %v1311_v34  ;;  %1206 = vset.pattern.permute.xlu0 (!%p228_p3), %v1311_v34  ;;  %vm340_vm4 = vcmask (!%p228_p3), 1031168   ;;  %vm324_vm5 = vcmask (!%p228_p3), 1043458   ;;  %vm325_vm6 = vcmask (!%p228_p3), 130054   ;;  %vm406_vm7 = vcmask (!%p228_p3), 949248  }
   0xc   : > { %v313_v4 = vunpack.c.0.s8 (!%p228_p3), %v312_v2  ;;  %s1290_s9 = smov (!%p228_p3), 120   ;;  %s1291_s10 = smov (!%p228_p3), 114   ;;  %1207 = vset.pattern.permute.xlu1 (!%p228_p3), %v1311_v34  ;;  %vm321_vm8 = vcmask (!%p228_p3), 1039360   ;;  %vm1446_vm9 = vmor (!%p228_p3), %vm325_vm6, %vm324_vm5  ;;  %vm357_vm10 = vcmask (!%p228_p3), 998400   ;;  %vm390_vm11 = vcmask (!%p228_p3), 982016  }
   0xd   : > { %s1292_s11 = smov (!%p228_p3), 115   ;;  %s1293_s12 = smov (!%p228_p3), 91   ;;  %vm439_vm12 = vcmask (!%p228_p3), 932864   ;;  %vm423_vm13 = vcmask (!%p228_p3), 941056   ;;  %vm472_vm14 = vcmask (!%p228_p3), 744448   ;;  %vm456_vm15 = vcmask (!%p228_p3), 752640  }
   0xe   : > { %v1386_v5 = vsub.s32 (!%p228_p3), %v313_v4, %v1377_v3  ;;  %s1294_s13 = smov (!%p228_p3), 92   ;;  %s1295_s14 = smov (!%p228_p3), 86   ;;  %vm505_vm1 = vcmask (!%p228_p3), 703488   ;;  %vm522_vm5 = vcmask (!%p228_p3), 695296   ;;  %vm571_vm6 = vcmask (!%p228_p3), 646144  }
   0xf   : > { %s1296_s15 = smov (!%p228_p3), 90   ;;  %s1297_s16 = smov (!%p228_p3), 84   ;;  %v879_v44 = vsub.s32 (!%p228_p3), 0, %v1377_v3 }
  0x10   : > { %s1579_s19 = smov (!%p269_p5, %s1270_s19), 1  ;;  %s1298_s17 = smov 85  }
  0x11   : > { %s1136_s25 = sshll.u32 %s1579_s19, 2  ;;  %s1300_s26 = smov 80  }
  0x12   : > { %s1383_s28 = scalar_lea.vmem %s1558_s0, %s1136_s25  ;;  %s1299_s25 = smov 79  }
  0x13   : > { %v1389_v6 = vld.sshfl [vmem:[%s1383_s28] sm:$0x33 pattern:$0x76325410]  ;;  %s1301_s27 = smov 56   ;;  %p274_p6 = scmp.lt.s32.totalorder %s1266_s18, 3 }
  0x14   : > { %370 = vrot.lane.b32.xlu1 %v1389_v6, %s1285_s29  ;;  %337 = vrot.lane.b32.xlu0 %v1389_v6, %s1286_s30  ;;  %v1208_v8 = vld [vmem:[%s1383_s28] ss:$0 sps:$4 sm:$0xff]   ;;  %307 = vst.msk [vmem:[#allocation2] sm:$0x33] %vm1392_vm2, %v1389_v6  ;;  %s1302_s29 = smov 78   ;;  %s1303_s30 = smov 54  }
  0x15   : > { %v1209_v9 = vld [vmem:[%s1383_s28] ss:$0 sps:$4 sm:$0xff]   ;;  %v317_v11 = vrot.slane %v1208_v8, %v1386_v5  ;;  %s1581_s18 = smov (!%p274_p6, %s1266_s18), 3 }
  0x16   : > { %v1210_v10 = vld [vmem:[%s1383_s28] ss:$0 sps:$4 sm:$0xff]   ;;  %v353_v12 = vrot.slane %v1209_v9, %v1386_v5 }
  0x17   : > { %v386_v13 = vrot.slane %v1210_v10, %v1386_v5  ;;  %v1211_v14 = vld [vmem:[%s1383_s28] ss:$0 sps:$4 sm:$0xff]  }
  0x18   : > { %403 = vrot.lane.b32.xlu1 %v1389_v6, %s1287_s6  ;;  %318 = vrot.lane.b32.xlu0 %v317_v11, %s1288_s7  ;;  %v419_v15 = vrot.slane %v1211_v14, %v1386_v5  ;;  %v1212_v16 = vld [vmem:[%s1383_s28] ss:$0 sps:$4 sm:$0xff]   ;;  %s1304_s6 = smov 55   ;;  %s1305_s7 = smov 49  }
  0x19   : > { %v452_v17 = vrot.slane %v1212_v16, %v1386_v5  ;;  %v1213_v18 = vld [vmem:[%s1383_s28] ss:$0 sps:$4 sm:$0xff]  }
  0x1a   : > { %v485_v19 = vrot.slane %v1213_v18, %v1386_v5  ;;  %v1214_v20 = vld [vmem:[%s1383_s28] ss:$0 sps:$4 sm:$0xff]  }
  0x1b   : > { %v518_v21 = vrot.slane %v1214_v20, %v1386_v5  ;;  %v1215_v22 = vld [vmem:[%s1383_s28] ss:$0 sps:$4 sm:$0xff]  }
  0x1c   : > { %354 = vrot.lane.b32.xlu1 %v353_v12, %s1289_s8  ;;  %387 = vrot.lane.b32.xlu0 %v386_v13, %s1290_s9  ;;  %v551_v23 = vrot.slane %v1215_v22, %v1386_v5  ;;  %v1216_v24 = vld [vmem:[%s1383_s28] ss:$0 sps:$4 sm:$0xff]   ;;  %s1306_s8 = smov 50   ;;  %s1307_s9 = smov 44  }
  0x1d   : > { %v584_v25 = vrot.slane %v1216_v24, %v1386_v5  ;;  %v1217_v26 = vld [vmem:[%s1383_s28] ss:$0 sps:$4 sm:$0xff]  }
  0x1e   : > { %v617_v27 = vrot.slane %v1217_v26, %v1386_v5  ;;  %v1218_v28 = vld [vmem:[%s1383_s28] ss:$0 sps:$4 sm:$0xff]  }
  0x1f   : > { %v650_v29 = vrot.slane %v1218_v28, %v1386_v5  ;;  %v1219_v30 = vld [vmem:[%s1383_s28] ss:$0 sps:$4 sm:$0xff]  }
  0x20   : > { %436 = vrot.lane.b32.xlu1 %v1389_v6, %s1291_s10  ;;  %420 = vrot.lane.b32.xlu0 %v419_v15, %s1292_s11  ;;  %v683_v31 = vrot.slane %v1219_v30, %v1386_v5  ;;  %v1220_v32 = vld [vmem:[%s1383_s28] ss:$0 sps:$4 sm:$0xff]   ;;  %s1308_s10 = smov 48   ;;  %s1309_s11 = smov 42  }
  0x21   : > { %v716_v33 = vrot.slane %v1220_v32, %v1386_v5 }
  0x24   : > { %469 = vrot.lane.b32.xlu1 %v1389_v6, %s1293_s12  ;;  %453 = vrot.lane.b32.xlu0 %v452_v17, %s1294_s13  ;;  %s1310_s12 = smov 43  }
  0x28   : > { %502 = vrot.lane.b32.xlu1 %v1389_v6, %s1295_s14  ;;  %486 = vrot.lane.b32.xlu0 %v485_v19, %s1296_s15  ;;  %s276_s14 = scalar_lea.vmem %s1559_s1, %s1581_s18 }
  0x29   : > { %v740_v7 = vld [vmem:[%s276_s14] sm:$0x1] }
  0x2c   : > { %535 = vrot.lane.b32.xlu1 %v1389_v6, %s1297_s16  ;;  %519 = vrot.lane.b32.xlu0 %v518_v21, %s1298_s17  ;;  %s1099_s17 = sshll.u32 %s1581_s18, 1 }
  0x30   : > { %568 = vrot.lane.b32.xlu1 %v1389_v6, %s1299_s25  ;;  %552 = vrot.lane.b32.xlu0 %v551_v23, %s1300_s26  ;;  %s1102_s25 = sshll.u32 %s1579_s19, 3 }
  0x34   : > { %601 = vrot.lane.b32.xlu1 %v1389_v6, %s1301_s27  ;;  %585 = vrot.lane.b32.xlu0 %v584_v25, %s1302_s29  ;;  %s280_s29 = scalar_lea.vmem %s1560_s2, %s1099_s17 }
  0x38   : > { %634 = vrot.lane.b32.xlu1 %v1389_v6, %s1303_s30  ;;  %618 = vrot.lane.b32.xlu0 %v617_v27, %s1304_s6  ;;  %s291_s30 = sadd.s32 %s1102_s25, %s1099_s17 }
  0x3c   : > { %667 = vrot.lane.b32.xlu1 %v1389_v6, %s1305_s7  ;;  %651 = vrot.lane.b32.xlu0 %v650_v29, %s1306_s8  ;;  %s1524_s8 = scalar_lea.vmem %s1563_s5, %s291_s30 }
  0x3d   : > { %950 = vst [vmem:[%s1524_s8] sm:$0x3] %v1311_v34 }
  0x40   : > { %700 = vrot.lane.b32.xlu1 %v1389_v6, %s1307_s9  ;;  %684 = vrot.lane.b32.xlu0 %v683_v31, %s1308_s10  ;;  %s284_s9 = scalar_lea.vmem %s1561_s3, %s1099_s17 }
  0x44   : > { %733 = vrot.lane.b32.xlu1 %v1389_v6, %s1309_s11  ;;  %717 = vrot.lane.b32.xlu0 %v716_v33, %s1310_s12 }
  0x86   : > { %v371_v35 = vpop.permute.xlu1 %370  ;;  %v338_v36 = vpop.permute.xlu0 %337 }
  0x87   : > { %v372_v37 = vrot.slane %v371_v35, 4  ;;  %v339_v38 = vrot.slane %v338_v36, 4 }
  0x89   : > { %v374_v39 = vsel %vm373_vm3, %v371_v35, %v372_v37  ;;  %v341_v40 = vsel %vm340_vm4, %v338_v36, %v339_v38  ;;  %vm489_vm3 = vcmask 736256   ;;  %vm538_vm4 = vcmask 687104  }
  0x8a   : > { %376 = vst.msk [vmem:[#allocation2 + $0x10] sm:$0x33] %vm1392_vm2, %v374_v39  ;;  %343 = vst.msk [vmem:[#allocation2 + $0x8] sm:$0x33] %vm1392_vm2, %v341_v40  ;;  %v404_v41 = vpop.permute.xlu1 %403  ;;  %v319_v42 = vpop.permute.xlu0 %318 }
  0x8b   : > { %v405_v43 = vrot.slane %v404_v41, 4  ;;  %v320_v45 = vrot.slane %v319_v42, 4 }
  0x8d   : > { %v407_v46 = vsel %vm406_vm7, %v404_v41, %v405_v43  ;;  %v322_v47 = vsel %vm321_vm8, %v319_v42, %v320_v45  ;;  %vm555_vm7 = vcmask 654336   ;;  %vm604_vm8 = vcmask 457728  }
  0x8e   : > { %409 = vst.msk [vmem:[#allocation2 + $0x18] sm:$0x33] %vm1392_vm2, %v407_v46  ;;  %v355_v48 = vpop.permute.xlu1 %354  ;;  %v388_v49 = vpop.permute.xlu0 %387 }
  0x8f   : > { %327 = vst.msk [vmem:[#allocation2] sm:$0xcc] %vm1446_vm9, %v322_v47  ;;  %v356_v50 = vrot.slane %v355_v48, 4  ;;  %v389_v51 = vrot.slane %v388_v49, 4 }
  0x91   : > { %v358_v52 = vsel %vm357_vm10, %v355_v48, %v356_v50  ;;  %v391_v53 = vsel %vm390_vm11, %v388_v49, %v389_v51  ;;  %vm588_vm10 = vcmask 637952   ;;  %vm637_vm11 = vcmask 441344  }
  0x92   : > { %360 = vst.msk [vmem:[#allocation2 + $0x8] sm:$0xcc] %vm1446_vm9, %v358_v52  ;;  %393 = vst.msk [vmem:[#allocation2 + $0x10] sm:$0xcc] %vm1446_vm9, %v391_v53  ;;  %v437_v54 = vpop.permute.xlu1 %436  ;;  %v421_v55 = vpop.permute.xlu0 %420 }
  0x93   : > { %v438_v56 = vrot.slane %v437_v54, 4  ;;  %v422_v57 = vrot.slane %v421_v55, 4 }
  0x95   : > { %v440_v58 = vsel %vm439_vm12, %v437_v54, %v438_v56  ;;  %v424_v59 = vsel %vm423_vm13, %v421_v55, %v422_v57  ;;  %vm621_vm12 = vcmask 449536   ;;  %vm670_vm13 = vcmask 400384  }
  0x96   : > { %442 = vst.msk [vmem:[#allocation2 + $0x20] sm:$0x33] %vm1392_vm2, %v440_v58  ;;  %v470_v60 = vpop.permute.xlu1 %469  ;;  %v454_v61 = vpop.permute.xlu0 %453 }
  0x97   : > { %426 = vst.msk [vmem:[#allocation2 + $0x18] sm:$0xcc] %vm1446_vm9, %v424_v59  ;;  %v471_v62 = vrot.slane %v470_v60, 4  ;;  %v455_v63 = vrot.slane %v454_v61, 4 }
  0x99   : > { %v473_v0 = vsel %vm472_vm14, %v470_v60, %v471_v62  ;;  %v457_v1 = vsel %vm456_vm15, %v454_v61, %v455_v63  ;;  %v1221_v2 = vld [vmem:[#allocation2 + $0x4] ss:$8 sps:$4 sm:$0xff]   ;;  %v1223_v4 = vld [vmem:[#allocation2] ss:$8 sps:$4 sm:$0xff]   ;;  %vm654_vm14 = vcmask 408576   ;;  %vm703_vm15 = vcmask 359424  }
  0x9a   : > { %475 = vst.msk [vmem:[#allocation2 + $0x28] sm:$0x33] %vm1392_vm2, %v473_v0  ;;  %v503_v5 = vpop.permute.xlu1 %502  ;;  %v487_v6 = vpop.permute.xlu0 %486  ;;  %834 = vmatprep.subr.bf16.mxu0 %v1221_v2 }
  0x9b   : > { %459 = vst.msk [vmem:[#allocation2 + $0x20] sm:$0xcc] %vm1446_vm9, %v457_v1  ;;  %v504_v8 = vrot.slane %v503_v5, 4  ;;  %v488_v9 = vrot.slane %v487_v6, 4  ;;  %835 = vmatpush1.bf16.msra.mxu0 %v1223_v4 }
  0x9d   : > { %v506_v10 = vsel %vm505_vm1, %v503_v5, %v504_v8  ;;  %v490_v11 = vsel %vm489_vm3, %v487_v6, %v488_v9  ;;  %vm687_vm1 = vcmask 392192   ;;  %vm736_vm3 = vcmask 343040   ;;  %v875_v6 = vld [vmem:[%s1562_s4] sm:$0x3] }
  0x9e   : > { %v1224_v12 = vld [vmem:[#allocation2 + $0x14] ss:$8 sps:$4 sm:$0xff]   ;;  %v1226_v13 = vld [vmem:[#allocation2 + $0x10] ss:$8 sps:$4 sm:$0xff]   ;;  %508 = vst.msk [vmem:[#allocation2 + $0x30] sm:$0x33] %vm1392_vm2, %v506_v10  ;;  %v536_v14 = vpop.permute.xlu1 %535  ;;  %v520_v15 = vpop.permute.xlu0 %519  ;;  %v1509_v9 = vrot.slane %v875_v6, %v879_v44 }
  0x9f   : > { %492 = vst.msk [vmem:[#allocation2 + $0x28] sm:$0xcc] %vm1446_vm9, %v490_v11  ;;  %v537_v16 = vrot.slane %v536_v14, 4  ;;  %v521_v17 = vrot.slane %v520_v15, 4  ;;  %836 = vmatprep.subr.bf16.mxu0 %v1224_v12  ;;  %v883_v8 = vsub.s32 1, %v1377_v3 }
  0xa0   : > { %837 = vmatpush1.bf16.msra.mxu0 %v1226_v13 }
  0xa1   : > { %v539_v18 = vsel %vm538_vm4, %v536_v14, %v537_v16  ;;  %v523_v19 = vsel %vm522_vm5, %v520_v15, %v521_v17  ;;  %vm720_vm4 = vcmask 351232   ;;  %vm827_vm5 = vcmask 1045504  }
  0xa2   : > { %541 = vst.msk [vmem:[#allocation2 + $0x38] sm:$0x33] %vm1392_vm2, %v539_v18  ;;  %v569_v20 = vpop.permute.xlu1 %568  ;;  %v553_v21 = vpop.permute.xlu0 %552  ;;  %v1511_v10 = vrot.slane %v875_v6, %v883_v8 }
  0xa3   : > { %525 = vst.msk [vmem:[#allocation2 + $0x30] sm:$0xcc] %vm1446_vm9, %v523_v19  ;;  %v570_v22 = vrot.slane %v569_v20, 4  ;;  %v554_v23 = vrot.slane %v553_v21, 4 }
  0xa5   : > { %v572_v24 = vsel %vm571_vm6, %v569_v20, %v570_v22  ;;  %v556_v25 = vsel %vm555_vm7, %v553_v21, %v554_v23  ;;  %v926_v20 = vld [vmem:[%s280_s29] sm:$0x3]  ;;  %vm975_vm7 = vcmask 1040728  }
  0xa6   : > { %v1227_v26 = vld [vmem:[#allocation2 + $0x24] ss:$8 sps:$4 sm:$0xff]   ;;  %v1229_v27 = vld [vmem:[#allocation2 + $0x20] ss:$8 sps:$4 sm:$0xff]   ;;  %574 = vst.msk [vmem:[#allocation2 + $0x40] sm:$0x33] %vm1392_vm2, %v572_v24  ;;  %v602_v28 = vpop.permute.xlu1 %601  ;;  %v586_v29 = vpop.permute.xlu0 %585 }
  0xa7   : > { %558 = vst.msk [vmem:[#allocation2 + $0x38] sm:$0xcc] %vm1446_vm9, %v556_v25  ;;  %v603_v30 = vrot.slane %v602_v28, 4  ;;  %v587_v31 = vrot.slane %v586_v29, 4  ;;  %838 = vmatprep.subr.bf16.mxu0 %v1227_v26 }
  0xa8   : > { %839 = vmatpush1.bf16.msra.mxu0 %v1229_v27 }
  0xa9   : > { %v605_v32 = vsel %vm604_vm8, %v602_v28, %v603_v30  ;;  %v589_v33 = vsel %vm588_vm10, %v586_v29, %v587_v31  ;;  %vm976_vm8 = vcmask 476161  }
  0xaa   : > { %607 = vst.msk [vmem:[#allocation2 + $0x48] sm:$0x33] %vm1392_vm2, %v605_v32  ;;  %v635_v35 = vpop.permute.xlu1 %634  ;;  %v619_v36 = vpop.permute.xlu0 %618  ;;  %vm977_vm10 = vmor %vm976_vm8, %vm975_vm7 }
  0xab   : > { %591 = vst.msk [vmem:[#allocation2 + $0x40] sm:$0xcc] %vm1446_vm9, %v589_v33  ;;  %v636_v37 = vrot.slane %v635_v35, 4  ;;  %v620_v38 = vrot.slane %v619_v36, 4 }
  0xad   : > { %v638_v39 = vsel %vm637_vm11, %v635_v35, %v636_v37  ;;  %v622_v40 = vsel %vm621_vm12, %v619_v36, %v620_v38 }
  0xae   : > { %v1230_v41 = vld [vmem:[#allocation2 + $0x34] ss:$8 sps:$4 sm:$0xff]   ;;  %v1232_v42 = vld [vmem:[#allocation2 + $0x30] ss:$8 sps:$4 sm:$0xff]   ;;  %640 = vst.msk [vmem:[#allocation2 + $0x50] sm:$0x33] %vm1392_vm2, %v638_v39  ;;  %v668_v43 = vpop.permute.xlu1 %667  ;;  %v652_v45 = vpop.permute.xlu0 %651 }
  0xaf   : > { %624 = vst.msk [vmem:[#allocation2 + $0x48] sm:$0xcc] %vm1446_vm9, %v622_v40  ;;  %v669_v46 = vrot.slane %v668_v43, 4  ;;  %v653_v47 = vrot.slane %v652_v45, 4  ;;  %840 = vmatprep.subr.bf16.mxu0 %v1230_v41  ;;  %v934_v39 = vld [vmem:[%s284_s9] sm:$0x3] }
  0xb0   : > { %841 = vmatpush1.bf16.msra.mxu0 %v1232_v42 }
  0xb1   : > { %v671_v48 = vsel %vm670_vm13, %v668_v43, %v669_v46  ;;  %v655_v49 = vsel %vm654_vm14, %v652_v45, %v653_v47 }
  0xb2   : > { %673 = vst.msk [vmem:[#allocation2 + $0x58] sm:$0x33] %vm1392_vm2, %v671_v48  ;;  %v701_v50 = vpop.permute.xlu1 %700  ;;  %v685_v51 = vpop.permute.xlu0 %684 }
  0xb3   : > { %657 = vst.msk [vmem:[#allocation2 + $0x50] sm:$0xcc] %vm1446_vm9, %v655_v49  ;;  %v702_v52 = vrot.slane %v701_v50, 4  ;;  %v686_v53 = vrot.slane %v685_v51, 4 }
  0xb5   : > { %v704_v54 = vsel %vm703_vm15, %v701_v50, %v702_v52  ;;  %v688_v55 = vsel %vm687_vm1, %v685_v51, %v686_v53 }
  0xb6   : > { %v1233_v56 = vld [vmem:[#allocation2 + $0x44] ss:$8 sps:$4 sm:$0xff]   ;;  %v1235_v57 = vld [vmem:[#allocation2 + $0x40] ss:$8 sps:$4 sm:$0xff]   ;;  %706 = vst.msk [vmem:[#allocation2 + $0x60] sm:$0x33] %vm1392_vm2, %v704_v54  ;;  %v734_v58 = vpop.permute.xlu1 %733  ;;  %v718_v59 = vpop.permute.xlu0 %717 }
  0xb7   : > { %690 = vst.msk [vmem:[#allocation2 + $0x58] sm:$0xcc] %vm1446_vm9, %v688_v55  ;;  %v735_v60 = vrot.slane %v734_v58, 4  ;;  %v719_v61 = vrot.slane %v718_v59, 4  ;;  %842 = vmatprep.subr.bf16.mxu0 %v1233_v56  ;;  %v1312_v56 = vmov 1966171168  }
  0xb8   : > { %843 = vmatpush1.bf16.msra.mxu0 %v1235_v57  ;;  %v957_v57 = vunpack.c.l.s4 %v1312_v56 }
  0xb9   : > { %v737_v62 = vsel %vm736_vm3, %v734_v58, %v735_v60  ;;  %v721_v63 = vsel %vm720_vm4, %v718_v59, %v719_v61 }
  0xba   : > { %739 = vst.msk [vmem:[#allocation2 + $0x68] sm:$0x33] %vm1392_vm2, %v737_v62  ;;  %vm823_vm2 = vcmask 883712   ;;  %v958_v62 = vunpack.c.0.s8 %v957_v57 }
  0xbb   : > { %723 = vst.msk [vmem:[#allocation2 + $0x60] sm:$0xcc] %vm1446_vm9, %v721_v63  ;;  %vm890_vm9 = vcmask 123904  }
  0xbe   : > { %v1236_v0 = vld [vmem:[#allocation2 + $0x54] ss:$8 sps:$4 sm:$0xff]   ;;  %v1238_v1 = vld [vmem:[#allocation2 + $0x50] ss:$8 sps:$4 sm:$0xff]  }
  0xbf   : > { %844 = vmatprep.subr.bf16.mxu0 %v1236_v0 }
  0xc0   : > { %845 = vmatpush1.bf16.msra.mxu0 %v1238_v1 }
  0xc2   : > { %v1239_v2 = vld [vmem:[#allocation2 + $0x64] ss:$8 sps:$4 sm:$0x3f]   ;;  %v1241_v4 = vld [vmem:[#allocation2 + $0x60] ss:$8 sps:$4 sm:$0x3f]  }
  0xc3   : > { %1131 = vmatprep.subr.msk.bf16.mxu0 %vm827_vm5, %v1239_v2  ;;  %v829_v5 = vsel %vm827_vm5, %v1241_v4, 0 }
  0xc4   : > { %847 = vmatpush1.bf16.msra.mxu0 %v829_v5 }
  0xc7   : > { %1132 = vmatmul.mubr.msk.bf16.vlgmr.msra.gmra.mrb[0].mxu0 %vm823_vm2, %v740_v7  ;;  %v961_v7 = vsub.s32 %v958_v62, %v1377_v3 }
 0x19a   : > { %v868_v11 = vpop.f32.mrb[0].mxu0 }
 0x19b   : > { %v887_v12 = vmul.f32 %v1509_v9, %v868_v11  ;;  %v870_v13 = vpop.f32.mrb[1].mxu0 }
 0x19c   : > { %v888_v14 = vmul.f32 %v1511_v10, %v870_v13  ;;  %v872_v15 = vpop.f32.mrb[2].mxu0 }
 0x19d   : > { %v873_v16 = vpop.f32.mrb[3].mxu0  ;;  %v889_v17 = vsel %vm304_vm0, %v887_v12, 0.0 }
 0x19e   : > { %v891_v18 = vsel %vm890_vm9, %v888_v14, 0.0 }
 0x19f   : > { %v892_v19 = vadd.f32 %v891_v18, %v889_v17 }
 0x1a1   : > { %893 = vadd.xlane.f32.xlu0 %v892_v19 }
 0x1b7   : > { %929 = vperm.xlu0 %1206, %v926_v20  }
 0x22e   : > { %v894_v21 = vpop.xlane.xlu0 %893 }
 0x22f   : > { %v895_v22 = vsel %vm304_vm0, %v894_v21, 0.0 }
 0x230   : > { %v896_v23 = vrot.slane %v895_v22, 4 }
 0x232   : > { %v897_v24 = vadd.f32 %v896_v23, %v895_v22 }
 0x234   : > { %v898_v25 = vrot.slane %v897_v24, 2 }
 0x236   : > { %v899_v26 = vadd.f32 %v898_v25, %v897_v24  ;;  %v930_v52 = vpop.permute.xlu0 %929 }
 0x238   : > { %v900_v27 = vrot.slane %v899_v26, 1 }
 0x23a   : > { %v901_v28 = vadd.f32 %v900_v27, %v899_v26 }
 0x23c   : > { %v902_v29 = vmul.f32 0.0078125, %v901_v28 }
 0x23e   : > { %v903_v30 = vsub.f32 %v868_v11, %v902_v29  ;;  %v904_v31 = vsub.f32 %v870_v13, %v902_v29 }
 0x240   : > { %v905_v32 = vmul.f32 %v903_v30, %v1509_v9  ;;  %v906_v33 = vmul.f32 %v904_v31, %v1511_v10 }
 0x242   : > { %v907_v35 = vmul.f32 %v905_v32, %v905_v32  ;;  %v908_v36 = vmul.f32 %v906_v33, %v906_v33 }
 0x244   : > { %v909_v34 = vsel %vm304_vm0, %v907_v35, 0.0  ;;  %v910_v37 = vsel %vm890_vm9, %v908_v36, 0.0 }
 0x245   : > { %v911_v38 = vadd.f32 %v910_v37, %v909_v34 }
 0x247   : > { %912 = vadd.xlane.f32.xlu1 %v911_v38 }
 0x258   : > { %937 = vperm.xlu1 %1207, %v934_v39  }
 0x2d4   : > { %v913_v40 = vpop.xlane.xlu1 %912 }
 0x2d5   : > { %v914_v41 = vsel %vm304_vm0, %v913_v40, 0.0 }
 0x2d6   : > { %v915_v42 = vrot.slane %v914_v41, 4 }
 0x2d8   : > { %v916_v43 = vadd.f32 %v915_v42, %v914_v41  ;;  %v938_v55 = vpop.permute.xlu1 %937 }
 0x2da   : > { %v917_v45 = vrot.slane %v916_v43, 2 }
 0x2dc   : > { %v918_v46 = vadd.f32 %v917_v45, %v916_v43 }
 0x2de   : > { %v919_v47 = vrot.slane %v918_v46, 1 }
 0x2e0   : > { %v920_v48 = vadd.f32 %v919_v47, %v918_v46 }
 0x2e2   : > { %v921_v49 = vmul.f32 0.0078125, %v920_v48 }
 0x2e4   : > { %v922_v50 = vadd.f32 1e-05, %v921_v49 }
 0x2e6   : > { %1242 = vrsqrt.f32 %v922_v50 }
 0x2f0   : > { %v1243_v51 = vpop.eup %1242 }
 0x2f1   : > { %v924_v53 = vmul.f32 %v1243_v51, %v903_v30  ;;  %v925_v54 = vmul.f32 %v1243_v51, %v904_v31 }
 0x2f3   : > { %v932_v58 = vmul.f32 %v930_v52, %v924_v53  ;;  %v933_v59 = vmul.f32 %v930_v52, %v925_v54 }
 0x2f5   : > { %v940_v60 = vadd.f32 %v938_v55, %v932_v58  ;;  %v941_v61 = vadd.f32 %v938_v55, %v933_v59 }
 0x2f7   : > { %vm942_vm0 = vcmp.gt.f32.partialorder %v940_v60, 0.0  ;;  %vm943_vm6 = vcmp.gt.f32.partialorder %v941_v61, 0.0  ;;  %v944_v63 = vmul.f32 0.01, %v940_v60  ;;  %v945_v0 = vmul.f32 0.01, %v941_v61 }
 0x2f9   : > { %v946_v1 = vsel %vm942_vm0, %v940_v60, %v944_v63  ;;  %v947_v2 = vsel %vm943_vm6, %v941_v61, %v945_v0 }
 0x2fa   : > { %v948_v4 = vmul.f32 %v946_v1, %v1509_v9  ;;  %v949_v5 = vmul.f32 %v947_v2, %v1511_v10 }
 0x2fc   : > { %v1133_v44 = vpack.c.bf16 %v949_v5, %v948_v4 }
 0x2fe   : > { %v962_v6 = vrot.slane %v1133_v44, %v961_v7 }
 0x300   : > { %v969_v8 = vrot.slane %v962_v6, %v961_v7 }
 0x302   : > { %970 = vrot.lane.b32.xlu1 %v969_v8, %s1310_s12 }
 0x374   : > { %v971_v11 = vpop.permute.xlu1 %970 }
 0x375   : > { %v972_v12 = vrot.slane %v971_v11, 7 }
 0x377   : > { %v973_v13 = vsel %vm720_vm4, %v972_v12, %v971_v11 }
 0x378   : > { %978 = vst.msk [vmem:[%s1524_s8] sm:$0x3] %vm977_vm10, %v973_v13 }
 0x379 PF: > { %s15_s22 = sadd.s32 1, %s1282_s22   ;;  %s1568_s18 = smov %s1274_s20 }
 0x37a   : > { %p12_p7 = scmp.ge.s32.totalorder %s15_s22, 10   ;;  %s1569_s19 = smov %s1278_s21 }
 0x37b   : > { %s1570_s20 = smov %s1573_s23  ;;  %s1571_s21 = smov %s1577_s24 }
 0x37c   :  { %14 = sbr.rel (!%p12_p7) target bundleno = 3 (0x3), region = 79 }

// kernel: convd_forward.5
= control target key start
LH: loop header
LB: loop body
LE: loop exit
PB: predicated region body
PF: predicated region fallthrough
CT: control target
= control target key end

     0   :  { %s1257_s18 = smov 0   ;;  %s1259_s19 = smov 0   ;;  %s1440_s0 = inlined_call_operand.vmem [shape: bf16[2,8,256], index: 0, kind: input, shape index: {}]   ;;  %s1441_s1 = inlined_call_operand.vmem [shape: bf16[4,2,216], index: 1, kind: input, shape index: {}]   ;;  %s1442_s2 = inlined_call_operand.vmem [shape: f32[4,2,1], index: 2, kind: input, shape index: {}]   ;;  %s1443_s3 = inlined_call_operand.vmem [shape: f32[4,2,1], index: 3, kind: input, shape index: {}]   ;;  %s1444_s4 = inlined_call_operand.vmem [shape: f32[1,144], index: 4, kind: input, shape index: {}]   ;;  %s1445_s5 = inlined_call_operand.vmem [shape: f32[2,4,2,256], index: 5, kind: output, shape index: {}]  }
   0x1   :  { %s1261_s20 = smov 0   ;;  %s1263_s21 = smov 0  }
   0x2   :  { %s1265_s22 = smov 0  }
   0x3 LB: > { %s24_s23 = sadd.s32 1, %s1187_s20  ;;  %s27_s24 = sadd.s32 1, %s1191_s21  ;;  %s1195_s22 = sphi %s1265_s22, %s15_s22   ;;  %s1191_s21 = sphi %s1263_s21, %s1451_s21   ;;  %s1187_s20 = sphi %s1261_s20, %s1450_s20   ;;  %s1183_s19 = sphi %s1259_s19, %s1449_s19   ;;  %s1179_s18 = sphi %s1257_s18, %s1448_s18  }
   0x4   : > { %p25_p0 = scmp.ge.s32.totalorder %s24_s23, 4  ;;  %p999_p1 = scmp.ge.s32.totalorder %s1195_s22, 1 }
   0x5   : > { %p228_p2 = scmp.lt.s32.totalorder %s1195_s22, 9 }
   0x6   : > { %s1453_s23 = smov (%p25_p0, %s24_s23), 0  ;;  %s1455_s24 = smov (!%p25_p0, %s27_s24), %s1191_s21 }
   0x7   : > { %p229_p3 = pnand %p999_p1, %p228_p2  ;;  %p29_p4 = scmp.ge.s32.totalorder %s1455_s24, 2 }
   0x8   : > { %p272_p5 = scmp.lt.s32.totalorder (!%p229_p3), %s1183_s19, 1  ;;  %vm300_vm0 = vcmask (!%p229_p3), 1043456   ;;  %vm301_vm1 = vcmask (!%p229_p3), 130052   ;;  %s1197_s29 = smov (!%p229_p3), 127   ;;  %v1221_v2 = vmov (!%p229_p3), 1966171168   ;;  %v578_v4 = vlaneseq (!%p229_p3) }
   0x9   : > { %s1457_s24 = smov (%p29_p4, %s1455_s24), 0  ;;  %232 = sbr.rel (%p229_p3) target bundleno = 890 (0x37a), region = 40 }
   0xa   : > { %vm1293_vm2 = vmor (!%p229_p3), %vm301_vm1, %vm300_vm0  ;;  %s1198_s30 = smov (!%p229_p3), 122   ;;  %s1199_s6 = smov (!%p229_p3), 126   ;;  %v576_v3 = vunpack.c.l.s4 (!%p229_p3), %v1221_v2  ;;  %v1313_v6 = vshrl.u32 (!%p229_p3), %v578_v4, 7  ;;  %vm725_vm3 = vcmask (!%p229_p3), 719872   ;;  %vm309_vm4 = vcmask (!%p229_p3), 1039360  }
   0xb   : > { %s1200_s7 = smov (!%p229_p3), 121   ;;  %s1201_s8 = smov (!%p229_p3), 120   ;;  %vm327_vm5 = vcmask (!%p229_p3), 998400   ;;  %vm318_vm6 = vcmask (!%p229_p3), 1031168   ;;  %vm336_vm7 = vcmask (!%p229_p3), 990208   ;;  %vm345_vm8 = vcmask (!%p229_p3), 982016  }
   0xc   : > { %s1202_s9 = smov (!%p229_p3), 116   ;;  %s1203_s10 = smov (!%p229_p3), 115   ;;  %v577_v5 = vunpack.c.0.s8 (!%p229_p3), %v576_v3  ;;  %vm354_vm9 = vcmask (!%p229_p3), 949248   ;;  %vm363_vm10 = vcmask (!%p229_p3), 941056   ;;  %vm372_vm11 = vcmask (!%p229_p3), 932864  }
   0xd   : > { %s1204_s11 = smov (!%p229_p3), 114   ;;  %s1205_s12 = smov (!%p229_p3), 92   ;;  %vm381_vm12 = vcmask (!%p229_p3), 752640   ;;  %vm390_vm13 = vcmask (!%p229_p3), 744448   ;;  %vm399_vm14 = vcmask (!%p229_p3), 736256   ;;  %vm408_vm15 = vcmask (!%p229_p3), 703488  }
   0xe   : > { %s1206_s13 = smov (!%p229_p3), 91   ;;  %s1207_s14 = smov (!%p229_p3), 90   ;;  %v1320_v9 = vsub.s32 (!%p229_p3), %v577_v5, %v1313_v6  ;;  %vm417_vm1 = vcmask (!%p229_p3), 695296   ;;  %v780_v0 = vsub.s32 (!%p229_p3), 0, %v1313_v6 }
   0xf   : > { %s1208_s15 = smov (!%p229_p3), 86   ;;  %s1209_s16 = smov (!%p229_p3), 85  }
  0x10   : > { %s1459_s19 = smov (!%p272_p5, %s1183_s19), 1  ;;  %s1210_s17 = smov 84  }
  0x11   : > { %s1041_s25 = sshll.u32 %s1459_s19, 3  ;;  %s1211_s26 = smov 80  }
  0x12   : > { %s276_s28 = scalar_lea.vmem %s1440_s0, %s1041_s25  ;;  %s1212_s27 = smov 79  }
  0x13   : > { %v304_v1 = vld [vmem:[%s276_s28] sm:$0xff]  ;;  %s1213_s28 = smov 78   ;;  %p277_p6 = scmp.lt.s32.totalorder %s1179_s18, 3 }
  0x14   : > { %306 = vrot.lane.b32.xlu0 %v304_v1, %s1197_s29  ;;  %324 = vrot.lane.b32.xlu1 %v304_v1, %s1198_s30  ;;  %303 = vst.msk [vmem:[#allocation2] sm:$0xff] %vm1293_vm2, %v304_v1  ;;  %s1214_s29 = smov 56   ;;  %s1215_s30 = smov 55  }
  0x15   : > { %s1461_s18 = smov (!%p277_p6, %s1179_s18), 3 }
  0x18   : > { %315 = vrot.lane.b32.xlu0 %v304_v1, %s1199_s6  ;;  %333 = vrot.lane.b32.xlu1 %v304_v1, %s1200_s7  ;;  %s1216_s6 = smov 54   ;;  %s1217_s7 = smov 50  }
  0x1c   : > { %342 = vrot.lane.b32.xlu0 %v304_v1, %s1201_s8  ;;  %351 = vrot.lane.b32.xlu1 %v304_v1, %s1202_s9  ;;  %s1218_s8 = smov 49   ;;  %s1219_s9 = smov 48  }
  0x20   : > { %360 = vrot.lane.b32.xlu0 %v304_v1, %s1203_s10  ;;  %369 = vrot.lane.b32.xlu1 %v304_v1, %s1204_s11  ;;  %s1220_s10 = smov 44   ;;  %s1306_s11 = sshll.u32 %s1461_s18, 1 }
  0x24   : > { %378 = vrot.lane.b32.xlu0 %v304_v1, %s1205_s12  ;;  %387 = vrot.lane.b32.xlu1 %v304_v1, %s1206_s13  ;;  %s1222_s12 = smov 43   ;;  %s1223_s13 = smov 42  }
  0x28   : > { %396 = vrot.lane.b32.xlu0 %v304_v1, %s1207_s14  ;;  %405 = vrot.lane.b32.xlu1 %v304_v1, %s1208_s15 }
  0x2c   : > { %414 = vrot.lane.b32.xlu0 %v304_v1, %s1209_s16  ;;  %423 = vrot.lane.b32.xlu1 %v304_v1, %s1210_s17  ;;  %s280_s16 = scalar_lea.vmem %s1441_s1, %s1306_s11 }
  0x2d   : > { %v1315_v7 = vld.sshfl [vmem:[%s280_s16] sm:$0x11 pattern:$0x75316420] }
  0x2e   : > { %v574_v8 = vcombine.high %v1315_v7, %v1315_v7  ;;  %v581_v11 = vrot.slane %v1315_v7, %v1320_v9 }
  0x30   : > { %432 = vrot.lane.b32.xlu0 %v304_v1, %s1211_s26  ;;  %441 = vrot.lane.b32.xlu1 %v304_v1, %s1212_s27  ;;  %v588_v10 = vrot.slane %v574_v8, %v1320_v9 }
  0x32   : > { %1038 = vmatprep.mubr.msk.bf16.mxu0 %vm725_vm3, %v588_v10  ;;  %vm426_vm3 = vcmask 687104  }
  0x34   : > { %450 = vrot.lane.b32.xlu0 %v304_v1, %s1213_s28  ;;  %459 = vrot.lane.b32.xlu1 %v304_v1, %s1214_s29  ;;  %s284_s28 = scalar_lea.vmem %s1442_s2, %s1306_s11 }
  0x38   : > { %468 = vrot.lane.b32.xlu0 %v304_v1, %s1215_s30  ;;  %477 = vrot.lane.b32.xlu1 %v304_v1, %s1216_s6  ;;  %s288_s6 = scalar_lea.vmem %s1443_s3, %s1306_s11 }
  0x3c   : > { %486 = vrot.lane.b32.xlu0 %v304_v1, %s1217_s7  ;;  %495 = vrot.lane.b32.xlu1 %v304_v1, %s1218_s8  ;;  %s295_s7 = sadd.s32 %s1041_s25, %s1306_s11 }
  0x3d   : > { %s1007_s8 = sshll.u32 %s295_s7, 1 }
  0x40   : > { %504 = vrot.lane.b32.xlu0 %v304_v1, %s1219_s9  ;;  %513 = vrot.lane.b32.xlu1 %v304_v1, %s1220_s10 }
  0x44   : > { %522 = vrot.lane.b32.xlu0 %v304_v1, %s1222_s12  ;;  %531 = vrot.lane.b32.xlu1 %v304_v1, %s1223_s13  ;;  %s1415_s13 = scalar_lea.vmem %s1445_s5, %s1007_s8 }
  0x86   : > { %v307_v12 = vpop.permute.xlu0 %306  ;;  %v325_v13 = vpop.permute.xlu1 %324 }
  0x87   : > { %v308_v14 = vrot.slane %v307_v12, 4  ;;  %v326_v15 = vrot.slane %v325_v13, 4 }
  0x89   : > { %v310_v16 = vsel %vm309_vm4, %v307_v12, %v308_v14  ;;  %v328_v17 = vsel %vm327_vm5, %v325_v13, %v326_v15  ;;  %vm435_vm4 = vcmask 654336   ;;  %vm444_vm5 = vcmask 646144  }
  0x8a   : > { %312 = vst.msk [vmem:[#allocation2 + $0x8] sm:$0xff] %vm1293_vm2, %v310_v16  ;;  %330 = vst.msk [vmem:[#allocation2 + $0x18] sm:$0xff] %vm1293_vm2, %v328_v17  ;;  %v316_v18 = vpop.permute.xlu0 %315  ;;  %v334_v19 = vpop.permute.xlu1 %333 }
  0x8b   : > { %v317_v20 = vrot.slane %v316_v18, 4  ;;  %v335_v21 = vrot.slane %v334_v19, 4 }
  0x8d   : > { %v319_v22 = vsel %vm318_vm6, %v316_v18, %v317_v20  ;;  %v337_v23 = vsel %vm336_vm7, %v334_v19, %v335_v21  ;;  %vm453_vm6 = vcmask 637952   ;;  %vm462_vm7 = vcmask 457728  }
  0x8e   : > { %321 = vst.msk [vmem:[#allocation2 + $0x10] sm:$0xff] %vm1293_vm2, %v319_v22  ;;  %339 = vst.msk [vmem:[#allocation2 + $0x20] sm:$0xff] %vm1293_vm2, %v337_v23  ;;  %v343_v24 = vpop.permute.xlu0 %342  ;;  %v352_v25 = vpop.permute.xlu1 %351 }
  0x8f   : > { %v344_v26 = vrot.slane %v343_v24, 4  ;;  %v353_v27 = vrot.slane %v352_v25, 4 }
  0x91   : > { %v346_v28 = vsel %vm345_vm8, %v343_v24, %v344_v26  ;;  %v355_v29 = vsel %vm354_vm9, %v352_v25, %v353_v27  ;;  %v1114_v30 = vld [vmem:[#allocation2 + $0x4] ss:$8 sps:$4 sm:$0xff]   ;;  %v1116_v31 = vld [vmem:[#allocation2] ss:$8 sps:$4 sm:$0xff]   ;;  %vm471_vm8 = vcmask 449536   ;;  %vm480_vm9 = vcmask 441344  }
  0x92   : > { %348 = vst.msk [vmem:[#allocation2 + $0x28] sm:$0xff] %vm1293_vm2, %v346_v28  ;;  %357 = vst.msk [vmem:[#allocation2 + $0x30] sm:$0xff] %vm1293_vm2, %v355_v29  ;;  %v361_v32 = vpop.permute.xlu0 %360  ;;  %v370_v33 = vpop.permute.xlu1 %369  ;;  %735 = vmatprep.subr.bf16.mxu0 %v1114_v30 }
  0x93   : > { %v362_v34 = vrot.slane %v361_v32, 4  ;;  %v371_v35 = vrot.slane %v370_v33, 4  ;;  %736 = vmatpush1.bf16.msra.mxu0 %v1116_v31 }
  0x95   : > { %v364_v36 = vsel %vm363_vm10, %v361_v32, %v362_v34  ;;  %v373_v37 = vsel %vm372_vm11, %v370_v33, %v371_v35  ;;  %v1117_v38 = vld [vmem:[#allocation2 + $0x14] ss:$8 sps:$4 sm:$0xff]   ;;  %v1119_v39 = vld [vmem:[#allocation2 + $0x10] ss:$8 sps:$4 sm:$0xff]   ;;  %vm489_vm10 = vcmask 408576   ;;  %vm498_vm11 = vcmask 400384  }
  0x96   : > { %366 = vst.msk [vmem:[#allocation2 + $0x38] sm:$0xff] %vm1293_vm2, %v364_v36  ;;  %375 = vst.msk [vmem:[#allocation2 + $0x40] sm:$0xff] %vm1293_vm2, %v373_v37  ;;  %v379_v40 = vpop.permute.xlu0 %378  ;;  %v388_v41 = vpop.permute.xlu1 %387  ;;  %737 = vmatprep.subr.bf16.mxu0 %v1117_v38 }
  0x97   : > { %v380_v42 = vrot.slane %v379_v40, 4  ;;  %v389_v43 = vrot.slane %v388_v41, 4  ;;  %738 = vmatpush1.bf16.msra.mxu0 %v1119_v39 }
  0x99   : > { %v382_v44 = vsel %vm381_vm12, %v379_v40, %v380_v42  ;;  %v391_v45 = vsel %vm390_vm13, %v388_v41, %v389_v43  ;;  %v1120_v46 = vld [vmem:[#allocation2 + $0x24] ss:$8 sps:$4 sm:$0xff]   ;;  %v1122_v47 = vld [vmem:[#allocation2 + $0x20] ss:$8 sps:$4 sm:$0xff]   ;;  %vm507_vm12 = vcmask 392192   ;;  %vm516_vm13 = vcmask 359424  }
  0x9a   : > { %384 = vst.msk [vmem:[#allocation2 + $0x48] sm:$0xff] %vm1293_vm2, %v382_v44  ;;  %393 = vst.msk [vmem:[#allocation2 + $0x50] sm:$0xff] %vm1293_vm2, %v391_v45  ;;  %v397_v48 = vpop.permute.xlu0 %396  ;;  %v406_v49 = vpop.permute.xlu1 %405  ;;  %739 = vmatprep.subr.bf16.mxu0 %v1120_v46 }
  0x9b   : > { %v398_v50 = vrot.slane %v397_v48, 4  ;;  %v407_v51 = vrot.slane %v406_v49, 4  ;;  %740 = vmatpush1.bf16.msra.mxu0 %v1122_v47 }
  0x9d   : > { %v400_v52 = vsel %vm399_vm14, %v397_v48, %v398_v50  ;;  %v409_v53 = vsel %vm408_vm15, %v406_v49, %v407_v51  ;;  %v1123_v54 = vld [vmem:[#allocation2 + $0x34] ss:$8 sps:$4 sm:$0xff]   ;;  %v1125_v55 = vld [vmem:[#allocation2 + $0x30] ss:$8 sps:$4 sm:$0xff]   ;;  %vm525_vm14 = vcmask 351232   ;;  %vm534_vm15 = vcmask 343040  }
  0x9e   : > { %402 = vst.msk [vmem:[#allocation2 + $0x58] sm:$0xff] %vm1293_vm2, %v400_v52  ;;  %411 = vst.msk [vmem:[#allocation2 + $0x60] sm:$0xff] %vm1293_vm2, %v409_v53  ;;  %v415_v56 = vpop.permute.xlu0 %414  ;;  %v424_v57 = vpop.permute.xlu1 %423  ;;  %741 = vmatprep.subr.bf16.mxu0 %v1123_v54 }
  0x9f   : > { %v416_v58 = vrot.slane %v415_v56, 4  ;;  %v425_v59 = vrot.slane %v424_v57, 4  ;;  %742 = vmatpush1.bf16.msra.mxu0 %v1125_v55 }
  0xa1   : > { %v418_v60 = vsel %vm417_vm1, %v415_v56, %v416_v58  ;;  %v427_v61 = vsel %vm426_vm3, %v424_v57, %v425_v59  ;;  %v1126_v62 = vld [vmem:[#allocation2 + $0x44] ss:$8 sps:$4 sm:$0xff]   ;;  %v1128_v63 = vld [vmem:[#allocation2 + $0x40] ss:$8 sps:$4 sm:$0xff]  }
  0xa2   : > { %420 = vst.msk [vmem:[#allocation2 + $0x68] sm:$0xff] %vm1293_vm2, %v418_v60  ;;  %429 = vst.msk [vmem:[#allocation2 + $0x70] sm:$0xff] %vm1293_vm2, %v427_v61  ;;  %v433_v1 = vpop.permute.xlu0 %432  ;;  %v442_v2 = vpop.permute.xlu1 %441  ;;  %743 = vmatprep.subr.bf16.mxu0 %v1126_v62  ;;  %v776_v61 = vld [vmem:[%s1444_s4] sm:$0x3]  ;;  %v784_v62 = vsub.s32 1, %v1313_v6 }
  0xa3   : > { %v434_v3 = vrot.slane %v433_v1, 4  ;;  %v443_v4 = vrot.slane %v442_v2, 4  ;;  %744 = vmatpush1.bf16.msra.mxu0 %v1128_v63  ;;  %v1388_v63 = vrot.slane %v776_v61, %v780_v0 }
  0xa5   : > { %v436_v5 = vsel %vm435_vm4, %v433_v1, %v434_v3  ;;  %v445_v8 = vsel %vm444_vm5, %v442_v2, %v443_v4  ;;  %v1129_v10 = vld [vmem:[#allocation2 + $0x54] ss:$8 sps:$4 sm:$0xff]   ;;  %v1131_v12 = vld [vmem:[#allocation2 + $0x50] ss:$8 sps:$4 sm:$0xff]   ;;  %v1390_v1 = vrot.slane %v776_v61, %v784_v62  ;;  %vm869_vm4 = vcmask 1041752  }
  0xa6   : > { %438 = vst.msk [vmem:[#allocation2 + $0x78] sm:$0xff] %vm1293_vm2, %v436_v5  ;;  %447 = vst.msk [vmem:[#allocation2 + $0x80] sm:$0xff] %vm1293_vm2, %v445_v8  ;;  %v451_v13 = vpop.permute.xlu0 %450  ;;  %v460_v14 = vpop.permute.xlu1 %459  ;;  %745 = vmatprep.subr.bf16.mxu0 %v1129_v10  ;;  %vm870_vm5 = vcmask 478210  }
  0xa7   : > { %v452_v15 = vrot.slane %v451_v13, 4  ;;  %v461_v16 = vrot.slane %v460_v14, 4  ;;  %746 = vmatpush1.bf16.msra.mxu0 %v1131_v12  ;;  %v1224_v12 = vmov 0  }
  0xa8   : > { %1112 = vset.pattern.permute.xlu0 %v1224_v12  ;;  %1113 = vset.pattern.permute.xlu1 %v1224_v12 }
  0xa9   : > { %v454_v17 = vsel %vm453_vm6, %v451_v13, %v452_v15  ;;  %v463_v18 = vsel %vm462_vm7, %v460_v14, %v461_v16  ;;  %v1132_v19 = vld [vmem:[#allocation2 + $0x64] ss:$8 sps:$4 sm:$0xff]   ;;  %v1134_v20 = vld [vmem:[#allocation2 + $0x60] ss:$8 sps:$4 sm:$0xff]   ;;  %vm871_vm6 = vmor %vm870_vm5, %vm869_vm4 }
  0xaa   : > { %456 = vst.msk [vmem:[#allocation2 + $0x88] sm:$0xff] %vm1293_vm2, %v454_v17  ;;  %465 = vst.msk [vmem:[#allocation2 + $0x90] sm:$0xff] %vm1293_vm2, %v463_v18  ;;  %v469_v21 = vpop.permute.xlu0 %468  ;;  %v478_v22 = vpop.permute.xlu1 %477  ;;  %747 = vmatprep.subr.bf16.mxu0 %v1132_v19  ;;  %v828_v13 = vld [vmem:[%s284_s28] sm:$0x3] }
  0xab   : > { %v470_v23 = vrot.slane %v469_v21, 4  ;;  %v479_v24 = vrot.slane %v478_v22, 4  ;;  %748 = vmatpush1.bf16.msra.mxu0 %v1134_v20 }
  0xad   : > { %v472_v25 = vsel %vm471_vm8, %v469_v21, %v470_v23  ;;  %v481_v26 = vsel %vm480_vm9, %v478_v22, %v479_v24  ;;  %v1135_v27 = vld [vmem:[#allocation2 + $0x74] ss:$8 sps:$4 sm:$0xff]   ;;  %v1137_v28 = vld [vmem:[#allocation2 + $0x70] ss:$8 sps:$4 sm:$0xff]  }
  0xae   : > { %474 = vst.msk [vmem:[#allocation2 + $0x98] sm:$0xff] %vm1293_vm2, %v472_v25  ;;  %483 = vst.msk [vmem:[#allocation2 + $0xa0] sm:$0xff] %vm1293_vm2, %v481_v26  ;;  %v487_v29 = vpop.permute.xlu0 %486  ;;  %v496_v30 = vpop.permute.xlu1 %495  ;;  %749 = vmatprep.subr.bf16.mxu0 %v1135_v27 }
  0xaf   : > { %v488_v31 = vrot.slane %v487_v29, 4  ;;  %v497_v32 = vrot.slane %v496_v30, 4  ;;  %750 = vmatpush1.bf16.msra.mxu0 %v1137_v28 }
  0xb1   : > { %v490_v33 = vsel %vm489_vm10, %v487_v29, %v488_v31  ;;  %v499_v34 = vsel %vm498_vm11, %v496_v30, %v497_v32  ;;  %v1138_v35 = vld [vmem:[#allocation2 + $0x84] ss:$8 sps:$4 sm:$0xff]   ;;  %v1140_v36 = vld [vmem:[#allocation2 + $0x80] ss:$8 sps:$4 sm:$0xff]  }
  0xb2   : > { %492 = vst.msk [vmem:[#allocation2 + $0xa8] sm:$0xff] %vm1293_vm2, %v490_v33  ;;  %501 = vst.msk [vmem:[#allocation2 + $0xb0] sm:$0xff] %vm1293_vm2, %v499_v34  ;;  %v505_v37 = vpop.permute.xlu0 %504  ;;  %v514_v38 = vpop.permute.xlu1 %513  ;;  %751 = vmatprep.subr.bf16.mxu0 %v1138_v35  ;;  %v836_v32 = vld [vmem:[%s288_s6] sm:$0x3]  ;;  %v1225_v33 = vmov 0.0  }
  0xb3   : > { %v506_v39 = vrot.slane %v505_v37, 4  ;;  %v515_v40 = vrot.slane %v514_v38, 4  ;;  %752 = vmatpush1.bf16.msra.mxu0 %v1140_v36  ;;  %852 = vst [vmem:[%s1415_s13] sm:$0xf] %v1225_v33 }
  0xb5   : > { %v508_v41 = vsel %vm507_vm12, %v505_v37, %v506_v39  ;;  %v517_v42 = vsel %vm516_vm13, %v514_v38, %v515_v40  ;;  %v1141_v43 = vld [vmem:[#allocation2 + $0x94] ss:$8 sps:$4 sm:$0xff]   ;;  %v1143_v44 = vld [vmem:[#allocation2 + $0x90] ss:$8 sps:$4 sm:$0xff]  }
  0xb6   : > { %510 = vst.msk [vmem:[#allocation2 + $0xb8] sm:$0xff] %vm1293_vm2, %v508_v41  ;;  %519 = vst.msk [vmem:[#allocation2 + $0xc0] sm:$0xff] %vm1293_vm2, %v517_v42  ;;  %v523_v45 = vpop.permute.xlu0 %522  ;;  %v532_v46 = vpop.permute.xlu1 %531  ;;  %753 = vmatprep.subr.bf16.mxu0 %v1141_v43 }
  0xb7   : > { %v524_v47 = vrot.slane %v523_v45, 4  ;;  %v533_v48 = vrot.slane %v532_v46, 4  ;;  %754 = vmatpush1.bf16.msra.mxu0 %v1143_v44 }
  0xb9   : > { %v526_v49 = vsel %vm525_vm14, %v523_v45, %v524_v47  ;;  %v535_v50 = vsel %vm534_vm15, %v532_v46, %v533_v48  ;;  %v1144_v51 = vld [vmem:[#allocation2 + $0xa4] ss:$8 sps:$4 sm:$0xff]   ;;  %v1146_v52 = vld [vmem:[#allocation2 + $0xa0] ss:$8 sps:$4 sm:$0xff]  }
  0xba   : > { %528 = vst.msk [vmem:[#allocation2 + $0xc8] sm:$0xff] %vm1293_vm2, %v526_v49  ;;  %537 = vst.msk [vmem:[#allocation2 + $0xd0] sm:$0xff] %vm1293_vm2, %v535_v50  ;;  %755 = vmatprep.subr.bf16.mxu0 %v1144_v51  ;;  %vm792_vm2 = vcmask 123904   ;;  %v1226_v49 = vmov 1983009808  }
  0xbb   : > { %756 = vmatpush1.bf16.msra.mxu0 %v1146_v52  ;;  %v857_v50 = vunpack.c.l.s4 %v1226_v49 }
  0xbd   : > { %v1147_v53 = vld [vmem:[#allocation2 + $0xb4] ss:$8 sps:$4 sm:$0xff]   ;;  %v1149_v54 = vld [vmem:[#allocation2 + $0xb0] ss:$8 sps:$4 sm:$0xff]  }
  0xbe   : > { %757 = vmatprep.subr.bf16.mxu0 %v1147_v53 }
  0xbf   : > { %758 = vmatpush1.bf16.msra.mxu0 %v1149_v54 }
  0xc1   : > { %v1150_v55 = vld [vmem:[#allocation2 + $0xc4] ss:$8 sps:$4 sm:$0xff]   ;;  %v1152_v56 = vld [vmem:[#allocation2 + $0xc0] ss:$8 sps:$4 sm:$0xff]   ;;  %v565_v57 = vld [vmem:[#allocation2 + $0xd0] sm:$0xff] }
  0xc2   : > { %759 = vmatprep.subr.bf16.mxu0 %v1150_v55  ;;  %v1036_v58 = vcombine.high %v565_v57, %v565_v57  ;;  %v1035_v59 = vcombine.low %v565_v57, %v565_v57  ;;  %v858_v55 = vunpack.c.0.s8 %v857_v50 }
  0xc3   : > { %760 = vmatpush1.bf16.msra.mxu0 %v1152_v56 }
  0xc4   : > { %1037 = vmatprep.subr.msk.bf16.mxu0 %vm300_vm0, %v1036_v58  ;;  %v730_v60 = vsel %vm300_vm0, %v1035_v59, 0  ;;  %vm790_vm0 = vcmask 1041408   ;;  %v861_v61 = vsub.s32 %v858_v55, %v1313_v6 }
  0xc7   : > { %762 = vmatpush1.bf16.msra.mxu0 %v730_v60 }
  0xca   : > { %768 = vmatmul.mubr.bf16.vlgmr.msra.gmra.mrb[0].mxu0 %v581_v11 }
 0x19d   : > { %v769_v2 = vpop.f32.mrb[0].mxu0 }
 0x19e   : > { %v788_v3 = vmul.f32 %v1388_v63, %v769_v2  ;;  %v771_v4 = vpop.f32.mrb[1].mxu0 }
 0x19f   : > { %v789_v7 = vmul.f32 %v1390_v1, %v771_v4  ;;  %v773_v9 = vpop.f32.mrb[2].mxu0 }
 0x1a0   : > { %v774_v11 = vpop.f32.mrb[3].mxu0  ;;  %v791_v5 = vsel %vm790_vm0, %v788_v3, 0.0 }
 0x1a1   : > { %v793_v8 = vsel %vm792_vm2, %v789_v7, 0.0 }
 0x1a2   : > { %v794_v10 = vadd.f32 %v793_v8, %v791_v5 }
 0x1a4   : > { %795 = vadd.xlane.f32.xlu0 %v794_v10 }
 0x1ba   : > { %831 = vperm.xlu0 %1112, %v828_v13  }
 0x231   : > { %v796_v14 = vpop.xlane.xlu0 %795 }
 0x232   : > { %v797_v15 = vsel %vm790_vm0, %v796_v14, 0.0 }
 0x233   : > { %v798_v16 = vrot.slane %v797_v15, 4 }
 0x235   : > { %v799_v17 = vadd.f32 %v798_v16, %v797_v15 }
 0x237   : > { %v800_v18 = vrot.slane %v799_v17, 2 }
 0x239   : > { %v801_v19 = vadd.f32 %v800_v18, %v799_v17  ;;  %v832_v45 = vpop.permute.xlu0 %831 }
 0x23b   : > { %v802_v20 = vrot.slane %v801_v19, 1 }
 0x23d   : > { %v803_v21 = vadd.f32 %v802_v20, %v801_v19 }
 0x23f   : > { %v804_v22 = vmul.f32 0.0078125, %v803_v21 }
 0x241   : > { %v805_v23 = vsub.f32 %v769_v2, %v804_v22  ;;  %v806_v24 = vsub.f32 %v771_v4, %v804_v22 }
 0x243   : > { %v807_v25 = vmul.f32 %v805_v23, %v1388_v63  ;;  %v808_v26 = vmul.f32 %v806_v24, %v1390_v1 }
 0x245   : > { %v809_v27 = vmul.f32 %v807_v25, %v807_v25  ;;  %v810_v28 = vmul.f32 %v808_v26, %v808_v26 }
 0x247   : > { %v811_v29 = vsel %vm790_vm0, %v809_v27, 0.0  ;;  %v812_v30 = vsel %vm792_vm2, %v810_v28, 0.0 }
 0x248   : > { %v813_v31 = vadd.f32 %v812_v30, %v811_v29 }
 0x24a   : > { %814 = vadd.xlane.f32.xlu1 %v813_v31 }
 0x25b   : > { %839 = vperm.xlu1 %1113, %v836_v32  }
 0x2d7   : > { %v815_v34 = vpop.xlane.xlu1 %814 }
 0x2d8   : > { %v816_v35 = vsel %vm790_vm0, %v815_v34, 0.0 }
 0x2d9   : > { %v817_v36 = vrot.slane %v816_v35, 4 }
 0x2db   : > { %v818_v37 = vadd.f32 %v817_v36, %v816_v35  ;;  %v840_v48 = vpop.permute.xlu1 %839 }
 0x2dd   : > { %v819_v38 = vrot.slane %v818_v37, 2 }
 0x2df   : > { %v820_v39 = vadd.f32 %v819_v38, %v818_v37 }
 0x2e1   : > { %v821_v40 = vrot.slane %v820_v39, 1 }
 0x2e3   : > { %v822_v41 = vadd.f32 %v821_v40, %v820_v39 }
 0x2e5   : > { %v823_v42 = vmul.f32 0.0078125, %v822_v41 }
 0x2e7   : > { %v824_v43 = vadd.f32 1e-05, %v823_v42 }
 0x2e9   : > { %1155 = vrsqrt.f32 %v824_v43 }
 0x2f3   : > { %v1156_v44 = vpop.eup %1155 }
 0x2f4   : > { %v826_v46 = vmul.f32 %v1156_v44, %v805_v23  ;;  %v827_v47 = vmul.f32 %v1156_v44, %v806_v24 }
 0x2f6   : > { %v834_v51 = vmul.f32 %v832_v45, %v826_v46  ;;  %v835_v52 = vmul.f32 %v832_v45, %v827_v47 }
 0x2f8   : > { %v842_v53 = vadd.f32 %v840_v48, %v834_v51  ;;  %v843_v54 = vadd.f32 %v840_v48, %v835_v52 }
 0x2fa   : > { %vm844_vm1 = vcmp.gt.f32.partialorder %v842_v53, 0.0  ;;  %vm845_vm3 = vcmp.gt.f32.partialorder %v843_v54, 0.0  ;;  %v846_v56 = vmul.f32 0.01, %v842_v53  ;;  %v847_v57 = vmul.f32 0.01, %v843_v54 }
 0x2fc   : > { %v848_v58 = vsel %vm844_vm1, %v842_v53, %v846_v56  ;;  %v849_v59 = vsel %vm845_vm3, %v843_v54, %v847_v57 }
 0x2fd   : > { %v850_v60 = vmul.f32 %v848_v58, %v1388_v63  ;;  %v851_v0 = vmul.f32 %v849_v59, %v1390_v1 }
 0x2ff   : > { %v855_v62 = vcombine.low %v850_v60, %v851_v0 }
 0x301   : > { %v862_v2 = vrot.slane %v855_v62, %v861_v61 }
 0x303   : > { %863 = vrot.lane.b32.xlu1 %v862_v2, %s1222_s12 }
 0x375   : > { %v864_v3 = vpop.permute.xlu1 %863 }
 0x376   : > { %v865_v4 = vrot.slane %v864_v3, 6 }
 0x378   : > { %v867_v7 = vsel %vm525_vm14, %v865_v4, %v864_v3 }
 0x379   : > { %872 = vst.msk [vmem:[%s1415_s13] sm:$0xf] %vm871_vm6, %v867_v7 }
 0x37a PF: > { %s15_s22 = sadd.s32 1, %s1195_s22   ;;  %s1448_s18 = smov %s1187_s20 }
 0x37b   : > { %p12_p7 = scmp.ge.s32.totalorder %s15_s22, 10   ;;  %s1449_s19 = smov %s1191_s21 }
 0x37c   : > { %s1450_s20 = smov %s1453_s23  ;;  %s1451_s21 = smov %s1457_s24 }
 0x37d   :  { %14 = sbr.rel (!%p12_p7) target bundleno = 3 (0x3), region = 79 }

</bundles_post_ra>
